<compile_context>
chip_gen: v7x
topology: tpu7x:2x2x1
jax: 0.10.0
libtpu: 0.0.40
codegen_flags: <defaults>
</compile_context>

<pallas_src>
import functools

import jax
import jax.numpy as jnp
from jax.experimental import pallas as pl
from jax.experimental.pallas import tpu as pltpu

_LANE = 128


def _round_up(v, m):
    return ((v + m - 1) // m) * m


def _pad2(a, rows, cols):
    return jnp.pad(a, ((0, rows - a.shape[0]), (0, cols - a.shape[1])))


def _block_diag_batch(adj):
    """(B, N, N) -> block-diagonal (B*N, B*N)."""
    b, n, _ = adj.shape
    eye = jnp.eye(b, dtype=adj.dtype)
    bd = eye[:, None, :, None] * adj[:, :, None, :]      # (B, N, B, N)
    return bd.reshape(b * n, b * n)


# ----------------------------------------------------------------------------
# Fused kernel: encoder stand-in + (heads x gcn_steps) GCN updates
# ----------------------------------------------------------------------------
def _polygnn_fused_kernel(x_ref, encw_ref, encb_ref,
                          coords_ref, adj_ref, boff_ref,
                          w1a_ref, w1b_ref, b1_ref,
                          w2a_ref, w2b_ref, b2_ref,
                          wfc_ref, bfc_ref,
                          out_ref, *,
                          num_heads, gcn_steps, n_points, grid_size, normstep):
    BGG = x_ref.shape[0]                       # B * grid * grid (flat rows)
    BN = coords_ref.shape[1]                   # B * n_points
    g = float(grid_size)

    # --- encoder / pregcn_cnn stand-in: 1x1 conv + ReLU (computed once,
    #     reused by every head / step; lanes padded to 128).
    flat = jnp.maximum(
        jnp.dot(x_ref[...], encw_ref[...], preferred_element_type=jnp.float32)
        + encb_ref[...], 0.0)                  # (B*GG, Dp)

    batch_off = boff_ref[...]                  # (BN, 1) int32: b * GG per row
    col_iota = jax.lax.broadcasted_iota(jnp.int32, (BN, BGG), 1)

    for h in range(coords_ref.shape[0]):       # heads (static)
        coords = coords_ref[h]                 # (BN, 128); lanes 0,1 = x,y; rest 0
        adj = adj_ref[h]                       # (BN, BN) block-diagonal
        for s in range(gcn_steps):             # steps (static)
            idx = h * num_heads + s            # mirrors gnns[i*num_heads + s]

            # --- interpolated_sum (bilinear sampling) as a one-hot matmul
            X = coords[:, 0:1]
            Y = coords[:, 1:2]
            Xs = X * g
            Ys = Y * g
            X0 = jnp.floor(Xs)
            X1 = X0 + 1.0
            Y0 = jnp.floor(Ys)
            Y1 = Y0 + 1.0
            w00 = (X1 - Xs) * (Y1 - Ys)
            w01 = (X1 - Xs) * (Ys - Y0)
            w10 = (Xs - X0) * (Y1 - Ys)
            w11 = (Xs - X0) * (Ys - Y0)
            X0c = jnp.clip(X0, 0.0, g - 1.0).astype(jnp.int32)
            X1c = jnp.clip(X1, 0.0, g - 1.0).astype(jnp.int32)
            Y0c = jnp.clip(Y0, 0.0, g - 1.0).astype(jnp.int32)
            Y1c = jnp.clip(Y1, 0.0, g - 1.0).astype(jnp.int32)
            id00 = batch_off + X0c + Y0c * grid_size
            id01 = batch_off + X0c + Y1c * grid_size
            id10 = batch_off + X1c + Y0c * grid_size
            id11 = batch_off + X1c + Y1c * grid_size
            gather_w = (w00 * (col_iota == id00).astype(jnp.float32)
                        + w01 * (col_iota == id01).astype(jnp.float32)
                        + w10 * (col_iota == id10).astype(jnp.float32)
                        + w11 * (col_iota == id11).astype(jnp.float32))
            feat = jnp.dot(gather_w, flat,
                           preferred_element_type=jnp.float32)      # (BN, Dp)

            # --- 2-layer graph convolution + fc head (all lane-padded to 128)
            ax = jnp.dot(adj, feat, preferred_element_type=jnp.float32)
            h1 = jnp.maximum(
                jnp.dot(feat, w1a_ref[idx], preferred_element_type=jnp.float32)
                + jnp.dot(ax, w1b_ref[idx], preferred_element_type=jnp.float32)
                + b1_ref[idx], 0.0)                                  # (BN, Hp)
            ah1 = jnp.dot(adj, h1, preferred_element_type=jnp.float32)
            h2 = jnp.maximum(
                jnp.dot(h1, w2a_ref[idx], preferred_element_type=jnp.float32)
                + jnp.dot(ah1, w2b_ref[idx], preferred_element_type=jnp.float32)
                + b2_ref[idx], 0.0)                                  # (BN, Hp)
            pred = (jnp.dot(h2, wfc_ref[idx], preferred_element_type=jnp.float32)
                    + bfc_ref[idx])            # (BN, 128); lanes >= 2 are zero

            if normstep:
                # rsqrt on the EUP; padded lanes are zero so the norm matches
                # torch.norm(pred, dim=2).  eps avoids the 0/0 hazard.
                inv_norm = jax.lax.rsqrt(
                    jnp.sum(pred * pred, axis=-1, keepdims=True) + 1e-12)
                step_vec = pred * inv_norm
            else:
                step_vec = pred
            coords = jnp.clip(coords + step_vec, 0.0, 1.0)   # padded lanes stay 0
            out_ref[h, s] = coords


def polygnn_forward_pallas(x_flat, enc_w, enc_b, coords0, adjbd, batch_off,
                           w1a, w1b, b1, w2a, w2b, b2, wfc, bfc, *,
                           num_heads, gcn_steps, n_points, grid_size, normstep):
    NH, BN, CP = coords0.shape

    def full(a):
        z = (0,) * a.ndim
        return pl.BlockSpec(a.shape, lambda i, z=z: z)

    kern = functools.partial(
        _polygnn_fused_kernel,
        num_heads=num_heads, gcn_steps=gcn_steps, n_points=n_points,
        grid_size=grid_size, normstep=normstep)

    return pl.pallas_call(
        kern,
        out_shape=jax.ShapeDtypeStruct((NH, gcn_steps, BN, CP), jnp.float32),
        grid_spec=pltpu.PrefetchScalarGridSpec(
            num_scalar_prefetch=0,
            grid=(1,),
            in_specs=[full(x_flat), full(enc_w), full(enc_b),
                      full(coords0), full(adjbd), full(batch_off),
                      full(w1a), full(w1b), full(b1),
                      full(w2a), full(w2b), full(b2),
                      full(wfc), full(bfc)],
            out_specs=pl.BlockSpec((NH, gcn_steps, BN, CP),
                                   lambda i: (0, 0, 0, 0)),
        ),
        # Single grid step (everything fused / batch folded into M), so no
        # "parallel" axis -- avoids pointless megacore split on v7x.
        compiler_params=pltpu.CompilerParams(dimension_semantics=("arbitrary",)),
    )(x_flat, enc_w, enc_b, coords0, adjbd, batch_off,
      w1a, w1b, b1, w2a, w2b, b2, wfc, bfc)


# ----------------------------------------------------------------------------
# PolyGNN (Pallas) — parameter construction + forward glue
# ----------------------------------------------------------------------------
class PolyGNNPallas:
    def __init__(self, key, gcn_out_dim=64, gcn_steps=2, get_point_annotation=False,
                 nInputChannels=3, opts=None):
        self.gcn_out_dim = gcn_out_dim
        self.gcn_steps = gcn_steps
        self.opts = opts
        if get_point_annotation:
            nInputChannels = 4
        gcn_in_dim = opts["gcn_in_dim"]
        self.gcn_in_dim = gcn_in_dim

        self.Dp = _round_up(gcn_in_dim, _LANE)    # padded feature lanes
        self.Hp = _round_up(gcn_out_dim, _LANE)   # padded hidden lanes

        K = opts["num_heads"] * gcn_steps
        keys = jax.random.split(key, 1 + max(K, 1))

        # encoder/pregcn 1x1 conv: kaiming_normal fan_in, relu; bias 0.
        enc_w = (jax.random.normal(keys[0], (nInputChannels, gcn_in_dim), jnp.float32)
                 * jnp.sqrt(2.0 / nInputChannels))
        self.enc_w = _pad2(enc_w, nInputChannels, self.Dp)
        self.enc_b = jnp.zeros((1, self.Dp), jnp.float32)

        # GCN linear layers: normal(0, 0.01), bias 0 (matching the module init),
        # zero-padded to lane-dense shapes and stacked over (num_heads*steps).
        H = gcn_out_dim
        w1a, w1b, w2a, w2b, wfc = [], [], [], [], []
        for idx in range(K):
            ks = jax.random.split(keys[1 + idx], 5)
            w1a.append(_pad2(jax.random.normal(ks[0], (gcn_in_dim, H), jnp.float32) * 0.01,
                             self.Dp, self.Hp))
            w1b.append(_pad2(jax.random.normal(ks[1], (gcn_in_dim, H), jnp.float32) * 0.01,
                             self.Dp, self.Hp))
            w2a.append(_pad2(jax.random.normal(ks[2], (H, H), jnp.float32) * 0.01,
                             self.Hp, self.Hp))
            w2b.append(_pad2(jax.random.normal(ks[3], (H, H), jnp.float32) * 0.01,
                             self.Hp, self.Hp))
            wfc.append(_pad2(jax.random.normal(ks[4], (H, 2), jnp.float32) * 0.01,
                             self.Hp, _LANE))
        if K > 0:
            self.w1a = jnp.stack(w1a)
            self.w1b = jnp.stack(w1b)
            self.w2a = jnp.stack(w2a)
            self.w2b = jnp.stack(w2b)
            self.wfc = jnp.stack(wfc)
            self.b1 = jnp.zeros((K, 1, self.Hp), jnp.float32)   # b1a + b1b (both 0)
            self.b2 = jnp.zeros((K, 1, self.Hp), jnp.float32)
            self.bfc = jnp.zeros((K, 1, _LANE), jnp.float32)

    def forward(self, x, init_control, gcn_component):
        out_dict = {"pred_coor": [], "roi_pooled": [], "init_control": []}
        if self.gcn_steps == 0 or len(init_control) == 0:
            return out_dict

        B, C, H, W = x.shape
        grid = self.opts["grid_size_encoder"]
        # stand-in encoder keeps spatial resolution (real backbones downsample).
        assert H * W == grid * grid, "encoder stand-in expects H*W == grid^2"

        # NCHW -> NHWC -> flat (B*H*W, C); flat index = b*GG + y*W + x
        x_flat = jnp.transpose(x, (0, 2, 3, 1)).reshape(B * H * W, C)

        N = init_control[0].shape[1]
        BN = B * N
        coords0 = jnp.stack([
            jnp.pad(c.reshape(BN, 2).astype(jnp.float32), ((0, 0), (0, _LANE - 2)))
            for c in init_control])                                 # (NH, BN, 128)
        adjbd = jnp.stack([
            _block_diag_batch(gc["adj_matrix"].astype(jnp.float32))
            for gc in gcn_component])                               # (NH, BN, BN)
        batch_off = ((jnp.arange(BN, dtype=jnp.int32) // N)
                     * (grid * grid))[:, None]                      # (BN, 1)

        out_padded = polygnn_forward_pallas(
            x_flat, self.enc_w, self.enc_b, coords0, adjbd, batch_off,
            self.w1a, self.w1b, self.b1, self.w2a, self.w2b, self.b2,
            self.wfc, self.bfc,
            num_heads=self.opts["num_heads"], gcn_steps=self.gcn_steps,
            n_points=N, grid_size=grid, normstep=self.opts["normstep"])

        for h, init_control_h in enumerate(init_control):
            out_dict["init_control"].append(init_control_h)
            pred_head = [out_padded[h, s, :, :2].reshape(B, N, 2)
                         for s in range(self.gcn_steps)]
            out_dict["pred_coor"].append(pred_head)
        return out_dict


if __name__ == "__main__":
    B, C, Hs, Ws = 2, 3, 16, 16      # input image
    N = 16                            # control points per contour (cp_num)
    opts = {
        "encoder": "unet",
        "gcn_in_dim": 32,
        "grid_size_encoder": 16,
        "num_heads": 1,
        "normstep": True,
        "psp": False,
        "cp_num": N,
    }
    gcn_steps = 2
    gcn_out_dim = 64

    key = jax.random.PRNGKey(0)
    k_model, k_x, k_ctrl = jax.random.split(key, 3)

    model = PolyGNNPallas(k_model, gcn_out_dim=gcn_out_dim, gcn_steps=gcn_steps,
                          nInputChannels=C, opts=opts)

    x = jax.random.normal(k_x, (B, C, Hs, Ws), jnp.float32)

    # init control points in [0, 1] per head; cycle-graph adjacency (row-normalized)
    init_control = [jax.random.uniform(k_ctrl, (B, N, 2), jnp.float32)]
    eye = jnp.eye(N, dtype=jnp.float32)
    adj = (jnp.roll(eye, 1, axis=1) + jnp.roll(eye, -1, axis=1) + eye) / 3.0
    gcn_component = [{"adj_matrix": jnp.broadcast_to(adj, (B, N, N))}]

    out = model.forward(x, init_control, gcn_component)

    leaves = []
    for head in out["pred_coor"]:
        leaves.extend(head)
    leaves = jax.block_until_ready(leaves)

    ok = all(bool(jnp.all(jnp.isfinite(p))) for p in leaves)
    ok = ok and all(p.shape == (B, N, 2) for p in leaves)
    ok = ok and len(leaves) == gcn_steps * len(init_control)
    if ok:
        print("KERNEL_OK")
</pallas_src>

<mosaic_0001>
module attributes {stable_mosaic.version = 11 : i64} {
  func.func @_polygnn_fused_kernel(%arg0: i32, %arg1: memref<512x3xf32, #tpu.memory_space<vmem>>, %arg2: memref<3x128xf32, #tpu.memory_space<vmem>>, %arg3: memref<1x128xf32, #tpu.memory_space<vmem>>, %arg4: memref<1x32x128xf32, #tpu.memory_space<vmem>>, %arg5: memref<1x32x32xf32, #tpu.memory_space<vmem>>, %arg6: memref<32x1xi32, #tpu.memory_space<vmem>>, %arg7: memref<2x128x128xf32, #tpu.memory_space<vmem>>, %arg8: memref<2x128x128xf32, #tpu.memory_space<vmem>>, %arg9: memref<2x1x128xf32, #tpu.memory_space<vmem>>, %arg10: memref<2x128x128xf32, #tpu.memory_space<vmem>>, %arg11: memref<2x128x128xf32, #tpu.memory_space<vmem>>, %arg12: memref<2x1x128xf32, #tpu.memory_space<vmem>>, %arg13: memref<2x128x128xf32, #tpu.memory_space<vmem>>, %arg14: memref<2x1x128xf32, #tpu.memory_space<vmem>>, %arg15: memref<1x2x32x128xf32, #tpu.memory_space<vmem>>) attributes {dimension_semantics = [#tpu.dimension_semantics<arbitrary>], iteration_bounds = array<i64: 1>, scalar_prefetch = 0 : i64, scratch_operands = 0 : i64, tpu.core_type = #tpu.core_type<tc>, window_params = [{pipeline_mode = #tpu.pipeline_mode<synchronous>, transform_indices = @transform_0, window_bounds = array<i64: 512, 3>}, {pipeline_mode = #tpu.pipeline_mode<synchronous>, transform_indices = @transform_1, window_bounds = array<i64: 3, 128>}, {pipeline_mode = #tpu.pipeline_mode<synchronous>, transform_indices = @transform_2, window_bounds = array<i64: 1, 128>}, {pipeline_mode = #tpu.pipeline_mode<synchronous>, transform_indices = @transform_3, window_bounds = array<i64: 1, 32, 128>}, {pipeline_mode = #tpu.pipeline_mode<synchronous>, transform_indices = @transform_4, window_bounds = array<i64: 1, 32, 32>}, {pipeline_mode = #tpu.pipeline_mode<synchronous>, transform_indices = @transform_5, window_bounds = array<i64: 32, 1>}, {pipeline_mode = #tpu.pipeline_mode<synchronous>, transform_indices = @transform_6, window_bounds = array<i64: 2, 128, 128>}, {pipeline_mode = #tpu.pipeline_mode<synchronous>, transform_indices = @transform_7, window_bounds = array<i64: 2, 128, 128>}, {pipeline_mode = #tpu.pipeline_mode<synchronous>, transform_indices = @transform_8, window_bounds = array<i64: 2, 1, 128>}, {pipeline_mode = #tpu.pipeline_mode<synchronous>, transform_indices = @transform_9, window_bounds = array<i64: 2, 128, 128>}, {pipeline_mode = #tpu.pipeline_mode<synchronous>, transform_indices = @transform_10, window_bounds = array<i64: 2, 128, 128>}, {pipeline_mode = #tpu.pipeline_mode<synchronous>, transform_indices = @transform_11, window_bounds = array<i64: 2, 1, 128>}, {pipeline_mode = #tpu.pipeline_mode<synchronous>, transform_indices = @transform_12, window_bounds = array<i64: 2, 128, 128>}, {pipeline_mode = #tpu.pipeline_mode<synchronous>, transform_indices = @transform_13, window_bounds = array<i64: 2, 1, 128>}, {pipeline_mode = #tpu.pipeline_mode<synchronous>, transform_indices = @transform_14, window_bounds = array<i64: 1, 2, 32, 128>}]} {
    %c0 = arith.constant 0 : index
    %c0_0 = arith.constant 0 : index
    %0 = vector.load %arg1[%c0, %c0_0] : memref<512x3xf32, #tpu.memory_space<vmem>>, vector<512x3xf32>
    %c0_1 = arith.constant 0 : index
    %c0_2 = arith.constant 0 : index
    %1 = vector.load %arg2[%c0_1, %c0_2] : memref<3x128xf32, #tpu.memory_space<vmem>>, vector<3x128xf32>
    %cst = arith.constant dense<0.000000e+00> : vector<512x128xf32>
    %2 = tpu.matmul %0, %1, %cst {dimension_numbers = #tpu.dot_dimension_numbers<[1], [0], [0], [1], [0, 0, 1, 1], [], []>} : vector<512x3xf32>, vector<3x128xf32>, vector<512x128xf32> -> vector<512x128xf32>
    %c0_3 = arith.constant 0 : index
    %c0_4 = arith.constant 0 : index
    %3 = vector.load %arg3[%c0_3, %c0_4] : memref<1x128xf32, #tpu.memory_space<vmem>>, vector<1x128xf32>
    %4 = vector.broadcast %3 : vector<1x128xf32> to vector<512x128xf32>
    %5 = arith.addf %2, %4 : vector<512x128xf32>
    %cst_5 = arith.constant 0.000000e+00 : f32
    %6 = vector.broadcast %cst_5 : f32 to vector<512x128xf32>
    %7 = arith.maximumf %5, %6 : vector<512x128xf32>
    %c0_6 = arith.constant 0 : index
    %c0_7 = arith.constant 0 : index
    %8 = vector.load %arg6[%c0_6, %c0_7] : memref<32x1xi32, #tpu.memory_space<vmem>>, vector<32x1xi32>
    %9 = tpu.iota {dimensions = array<i32: 1>} : vector<32x512xi32>
    %c0_8 = arith.constant 0 : index
    %c0_9 = arith.constant 0 : index
    %c0_10 = arith.constant 0 : index
    %10 = vector.load %arg4[%c0_8, %c0_9, %c0_10] : memref<1x32x128xf32, #tpu.memory_space<vmem>>, vector<1x32x128xf32>
    %11 = vector.shape_cast %10 : vector<1x32x128xf32> to vector<32x128xf32>
    %c0_11 = arith.constant 0 : index
    %c0_12 = arith.constant 0 : index
    %c0_13 = arith.constant 0 : index
    %12 = vector.load %arg5[%c0_11, %c0_12, %c0_13] : memref<1x32x32xf32, #tpu.memory_space<vmem>>, vector<1x32x32xf32>
    %13 = vector.shape_cast %12 : vector<1x32x32xf32> to vector<32x32xf32>
    %14 = vector.extract_strided_slice %11 {offsets = [0, 0], sizes = [32, 1], strides = [1, 1]} : vector<32x128xf32> to vector<32x1xf32>
    %15 = vector.extract_strided_slice %11 {offsets = [0, 1], sizes = [32, 1], strides = [1, 1]} : vector<32x128xf32> to vector<32x1xf32>
    %cst_14 = arith.constant 1.600000e+01 : f32
    %16 = vector.broadcast %cst_14 : f32 to vector<32x1xf32>
    %17 = arith.mulf %14, %16 : vector<32x1xf32>
    %cst_15 = arith.constant 1.600000e+01 : f32
    %18 = vector.broadcast %cst_15 : f32 to vector<32x1xf32>
    %19 = arith.mulf %15, %18 : vector<32x1xf32>
    %20 = math.floor %17 : vector<32x1xf32>
    %cst_16 = arith.constant 1.000000e+00 : f32
    %21 = vector.broadcast %cst_16 : f32 to vector<32x1xf32>
    %22 = arith.addf %20, %21 : vector<32x1xf32>
    %23 = math.floor %19 : vector<32x1xf32>
    %cst_17 = arith.constant 1.000000e+00 : f32
    %24 = vector.broadcast %cst_17 : f32 to vector<32x1xf32>
    %25 = arith.addf %23, %24 : vector<32x1xf32>
    %26 = arith.subf %22, %17 : vector<32x1xf32>
    %27 = arith.subf %25, %19 : vector<32x1xf32>
    %28 = arith.mulf %26, %27 : vector<32x1xf32>
    %29 = arith.subf %22, %17 : vector<32x1xf32>
    %30 = arith.subf %19, %23 : vector<32x1xf32>
    %31 = arith.mulf %29, %30 : vector<32x1xf32>
    %32 = arith.subf %17, %20 : vector<32x1xf32>
    %33 = arith.subf %25, %19 : vector<32x1xf32>
    %34 = arith.mulf %32, %33 : vector<32x1xf32>
    %35 = arith.subf %17, %20 : vector<32x1xf32>
    %36 = arith.subf %19, %23 : vector<32x1xf32>
    %37 = arith.mulf %35, %36 : vector<32x1xf32>
    %cst_18 = arith.constant 0.000000e+00 : f32
    %cst_19 = arith.constant 1.500000e+01 : f32
    %38 = vector.broadcast %cst_18 : f32 to vector<32x1xf32>
    %39 = arith.maximumf %38, %20 : vector<32x1xf32>
    %40 = vector.broadcast %cst_19 : f32 to vector<32x1xf32>
    %41 = arith.minimumf %40, %39 : vector<32x1xf32>
    %42 = arith.fptosi %41 : vector<32x1xf32> to vector<32x1xi32>
    %cst_20 = arith.constant 0.000000e+00 : f32
    %cst_21 = arith.constant 1.500000e+01 : f32
    %43 = vector.broadcast %cst_20 : f32 to vector<32x1xf32>
    %44 = arith.maximumf %43, %22 : vector<32x1xf32>
    %45 = vector.broadcast %cst_21 : f32 to vector<32x1xf32>
    %46 = arith.minimumf %45, %44 : vector<32x1xf32>
    %47 = arith.fptosi %46 : vector<32x1xf32> to vector<32x1xi32>
    %cst_22 = arith.constant 0.000000e+00 : f32
    %cst_23 = arith.constant 1.500000e+01 : f32
    %48 = vector.broadcast %cst_22 : f32 to vector<32x1xf32>
    %49 = arith.maximumf %48, %23 : vector<32x1xf32>
    %50 = vector.broadcast %cst_23 : f32 to vector<32x1xf32>
    %51 = arith.minimumf %50, %49 : vector<32x1xf32>
    %52 = arith.fptosi %51 : vector<32x1xf32> to vector<32x1xi32>
    %cst_24 = arith.constant 0.000000e+00 : f32
    %cst_25 = arith.constant 1.500000e+01 : f32
    %53 = vector.broadcast %cst_24 : f32 to vector<32x1xf32>
    %54 = arith.maximumf %53, %25 : vector<32x1xf32>
    %55 = vector.broadcast %cst_25 : f32 to vector<32x1xf32>
    %56 = arith.minimumf %55, %54 : vector<32x1xf32>
    %57 = arith.fptosi %56 : vector<32x1xf32> to vector<32x1xi32>
    %58 = arith.addi %8, %42 : vector<32x1xi32>
    %c16_i32 = arith.constant 16 : i32
    %59 = vector.broadcast %c16_i32 : i32 to vector<32x1xi32>
    %60 = arith.muli %52, %59 : vector<32x1xi32>
    %61 = arith.addi %58, %60 : vector<32x1xi32>
    %62 = arith.addi %8, %42 : vector<32x1xi32>
    %c16_i32_26 = arith.constant 16 : i32
    %63 = vector.broadcast %c16_i32_26 : i32 to vector<32x1xi32>
    %64 = arith.muli %57, %63 : vector<32x1xi32>
    %65 = arith.addi %62, %64 : vector<32x1xi32>
    %66 = arith.addi %8, %47 : vector<32x1xi32>
    %c16_i32_27 = arith.constant 16 : i32
    %67 = vector.broadcast %c16_i32_27 : i32 to vector<32x1xi32>
    %68 = arith.muli %52, %67 : vector<32x1xi32>
    %69 = arith.addi %66, %68 : vector<32x1xi32>
    %70 = arith.addi %8, %47 : vector<32x1xi32>
    %c16_i32_28 = arith.constant 16 : i32
    %71 = vector.broadcast %c16_i32_28 : i32 to vector<32x1xi32>
    %72 = arith.muli %57, %71 : vector<32x1xi32>
    %73 = arith.addi %70, %72 : vector<32x1xi32>
    %74 = vector.broadcast %61 : vector<32x1xi32> to vector<32x512xi32>
    %75 = arith.cmpi eq, %9, %74 : vector<32x512xi32>
    %76 = arith.extui %75 : vector<32x512xi1> to vector<32x512xi32>
    %77 = arith.sitofp %76 : vector<32x512xi32> to vector<32x512xf32>
    %78 = vector.broadcast %28 : vector<32x1xf32> to vector<32x512xf32>
    %79 = arith.mulf %78, %77 : vector<32x512xf32>
    %80 = vector.broadcast %65 : vector<32x1xi32> to vector<32x512xi32>
    %81 = arith.cmpi eq, %9, %80 : vector<32x512xi32>
    %82 = arith.extui %81 : vector<32x512xi1> to vector<32x512xi32>
    %83 = arith.sitofp %82 : vector<32x512xi32> to vector<32x512xf32>
    %84 = vector.broadcast %31 : vector<32x1xf32> to vector<32x512xf32>
    %85 = arith.mulf %84, %83 : vector<32x512xf32>
    %86 = arith.addf %79, %85 : vector<32x512xf32>
    %87 = vector.broadcast %69 : vector<32x1xi32> to vector<32x512xi32>
    %88 = arith.cmpi eq, %9, %87 : vector<32x512xi32>
    %89 = arith.extui %88 : vector<32x512xi1> to vector<32x512xi32>
    %90 = arith.sitofp %89 : vector<32x512xi32> to vector<32x512xf32>
    %91 = vector.broadcast %34 : vector<32x1xf32> to vector<32x512xf32>
    %92 = arith.mulf %91, %90 : vector<32x512xf32>
    %93 = arith.addf %86, %92 : vector<32x512xf32>
    %94 = vector.broadcast %73 : vector<32x1xi32> to vector<32x512xi32>
    %95 = arith.cmpi eq, %9, %94 : vector<32x512xi32>
    %96 = arith.extui %95 : vector<32x512xi1> to vector<32x512xi32>
    %97 = arith.sitofp %96 : vector<32x512xi32> to vector<32x512xf32>
    %98 = vector.broadcast %37 : vector<32x1xf32> to vector<32x512xf32>
    %99 = arith.mulf %98, %97 : vector<32x512xf32>
    %100 = arith.addf %93, %99 : vector<32x512xf32>
    %cst_29 = arith.constant dense<0.000000e+00> : vector<32x128xf32>
    %101 = tpu.matmul %100, %7, %cst_29 {dimension_numbers = #tpu.dot_dimension_numbers<[1], [0], [0], [1], [0, 0, 1, 1], [], []>} : vector<32x512xf32>, vector<512x128xf32>, vector<32x128xf32> -> vector<32x128xf32>
    %cst_30 = arith.constant dense<0.000000e+00> : vector<32x128xf32>
    %102 = tpu.matmul %13, %101, %cst_30 {dimension_numbers = #tpu.dot_dimension_numbers<[1], [0], [0], [1], [0, 0, 1, 1], [], []>} : vector<32x32xf32>, vector<32x128xf32>, vector<32x128xf32> -> vector<32x128xf32>
    %c0_31 = arith.constant 0 : index
    %c0_32 = arith.constant 0 : index
    %c0_33 = arith.constant 0 : index
    %103 = vector.load %arg7[%c0_31, %c0_32, %c0_33] : memref<2x128x128xf32, #tpu.memory_space<vmem>>, vector<1x128x128xf32>
    %104 = vector.shape_cast %103 : vector<1x128x128xf32> to vector<128x128xf32>
    %cst_34 = arith.constant dense<0.000000e+00> : vector<32x128xf32>
    %105 = tpu.matmul %101, %104, %cst_34 {dimension_numbers = #tpu.dot_dimension_numbers<[1], [0], [0], [1], [0, 0, 1, 1], [], []>} : vector<32x128xf32>, vector<128x128xf32>, vector<32x128xf32> -> vector<32x128xf32>
    %c0_35 = arith.constant 0 : index
    %c0_36 = arith.constant 0 : index
    %c0_37 = arith.constant 0 : index
    %106 = vector.load %arg8[%c0_35, %c0_36, %c0_37] : memref<2x128x128xf32, #tpu.memory_space<vmem>>, vector<1x128x128xf32>
    %107 = vector.shape_cast %106 : vector<1x128x128xf32> to vector<128x128xf32>
    %cst_38 = arith.constant dense<0.000000e+00> : vector<32x128xf32>
    %108 = tpu.matmul %102, %107, %cst_38 {dimension_numbers = #tpu.dot_dimension_numbers<[1], [0], [0], [1], [0, 0, 1, 1], [], []>} : vector<32x128xf32>, vector<128x128xf32>, vector<32x128xf32> -> vector<32x128xf32>
    %109 = arith.addf %105, %108 : vector<32x128xf32>
    %c0_39 = arith.constant 0 : index
    %c0_40 = arith.constant 0 : index
    %c0_41 = arith.constant 0 : index
    %110 = vector.load %arg9[%c0_39, %c0_40, %c0_41] : memref<2x1x128xf32, #tpu.memory_space<vmem>>, vector<1x1x128xf32>
    %111 = vector.shape_cast %110 : vector<1x1x128xf32> to vector<1x128xf32>
    %112 = vector.broadcast %111 : vector<1x128xf32> to vector<32x128xf32>
    %113 = arith.addf %109, %112 : vector<32x128xf32>
    %cst_42 = arith.constant 0.000000e+00 : f32
    %114 = vector.broadcast %cst_42 : f32 to vector<32x128xf32>
    %115 = arith.maximumf %113, %114 : vector<32x128xf32>
    %cst_43 = arith.constant dense<0.000000e+00> : vector<32x128xf32>
    %116 = tpu.matmul %13, %115, %cst_43 {dimension_numbers = #tpu.dot_dimension_numbers<[1], [0], [0], [1], [0, 0, 1, 1], [], []>} : vector<32x32xf32>, vector<32x128xf32>, vector<32x128xf32> -> vector<32x128xf32>
    %c0_44 = arith.constant 0 : index
    %c0_45 = arith.constant 0 : index
    %c0_46 = arith.constant 0 : index
    %117 = vector.load %arg10[%c0_44, %c0_45, %c0_46] : memref<2x128x128xf32, #tpu.memory_space<vmem>>, vector<1x128x128xf32>
    %118 = vector.shape_cast %117 : vector<1x128x128xf32> to vector<128x128xf32>
    %cst_47 = arith.constant dense<0.000000e+00> : vector<32x128xf32>
    %119 = tpu.matmul %115, %118, %cst_47 {dimension_numbers = #tpu.dot_dimension_numbers<[1], [0], [0], [1], [0, 0, 1, 1], [], []>} : vector<32x128xf32>, vector<128x128xf32>, vector<32x128xf32> -> vector<32x128xf32>
    %c0_48 = arith.constant 0 : index
    %c0_49 = arith.constant 0 : index
    %c0_50 = arith.constant 0 : index
    %120 = vector.load %arg11[%c0_48, %c0_49, %c0_50] : memref<2x128x128xf32, #tpu.memory_space<vmem>>, vector<1x128x128xf32>
    %121 = vector.shape_cast %120 : vector<1x128x128xf32> to vector<128x128xf32>
    %cst_51 = arith.constant dense<0.000000e+00> : vector<32x128xf32>
    %122 = tpu.matmul %116, %121, %cst_51 {dimension_numbers = #tpu.dot_dimension_numbers<[1], [0], [0], [1], [0, 0, 1, 1], [], []>} : vector<32x128xf32>, vector<128x128xf32>, vector<32x128xf32> -> vector<32x128xf32>
    %123 = arith.addf %119, %122 : vector<32x128xf32>
    %c0_52 = arith.constant 0 : index
    %c0_53 = arith.constant 0 : index
    %c0_54 = arith.constant 0 : index
    %124 = vector.load %arg12[%c0_52, %c0_53, %c0_54] : memref<2x1x128xf32, #tpu.memory_space<vmem>>, vector<1x1x128xf32>
    %125 = vector.shape_cast %124 : vector<1x1x128xf32> to vector<1x128xf32>
    %126 = vector.broadcast %125 : vector<1x128xf32> to vector<32x128xf32>
    %127 = arith.addf %123, %126 : vector<32x128xf32>
    %cst_55 = arith.constant 0.000000e+00 : f32
    %128 = vector.broadcast %cst_55 : f32 to vector<32x128xf32>
    %129 = arith.maximumf %127, %128 : vector<32x128xf32>
    %c0_56 = arith.constant 0 : index
    %c0_57 = arith.constant 0 : index
    %c0_58 = arith.constant 0 : index
    %130 = vector.load %arg13[%c0_56, %c0_57, %c0_58] : memref<2x128x128xf32, #tpu.memory_space<vmem>>, vector<1x128x128xf32>
    %131 = vector.shape_cast %130 : vector<1x128x128xf32> to vector<128x128xf32>
    %cst_59 = arith.constant dense<0.000000e+00> : vector<32x128xf32>
    %132 = tpu.matmul %129, %131, %cst_59 {dimension_numbers = #tpu.dot_dimension_numbers<[1], [0], [0], [1], [0, 0, 1, 1], [], []>} : vector<32x128xf32>, vector<128x128xf32>, vector<32x128xf32> -> vector<32x128xf32>
    %c0_60 = arith.constant 0 : index
    %c0_61 = arith.constant 0 : index
    %c0_62 = arith.constant 0 : index
    %133 = vector.load %arg14[%c0_60, %c0_61, %c0_62] : memref<2x1x128xf32, #tpu.memory_space<vmem>>, vector<1x1x128xf32>
    %134 = vector.shape_cast %133 : vector<1x1x128xf32> to vector<1x128xf32>
    %135 = vector.broadcast %134 : vector<1x128xf32> to vector<32x128xf32>
    %136 = arith.addf %132, %135 : vector<32x128xf32>
    %137 = arith.mulf %136, %136 : vector<32x128xf32>
    %cst_63 = arith.constant dense<0.000000e+00> : vector<32xf32>
    %138 = vector.multi_reduction <add>, %137, %cst_63 [1] : vector<32x128xf32> to vector<32xf32>
    %139 = vector.shape_cast %138 : vector<32xf32> to vector<32x1xf32>
    %cst_64 = arith.constant 9.99999996E-13 : f32
    %140 = vector.broadcast %cst_64 : f32 to vector<32x1xf32>
    %141 = arith.addf %139, %140 : vector<32x1xf32>
    %142 = math.rsqrt %141 : vector<32x1xf32>
    %143 = vector.broadcast %142 : vector<32x1xf32> to vector<32x128xf32>
    %144 = arith.mulf %136, %143 : vector<32x128xf32>
    %145 = arith.addf %11, %144 : vector<32x128xf32>
    %cst_65 = arith.constant 0.000000e+00 : f32
    %cst_66 = arith.constant 1.000000e+00 : f32
    %146 = vector.broadcast %cst_65 : f32 to vector<32x128xf32>
    %147 = arith.maximumf %146, %145 : vector<32x128xf32>
    %148 = vector.broadcast %cst_66 : f32 to vector<32x128xf32>
    %149 = arith.minimumf %148, %147 : vector<32x128xf32>
    %c0_67 = arith.constant 0 : index
    %c0_68 = arith.constant 0 : index
    %c0_69 = arith.constant 0 : index
    %c0_70 = arith.constant 0 : index
    %150 = vector.load %arg15[%c0_67, %c0_68, %c0_69, %c0_70] : memref<1x2x32x128xf32, #tpu.memory_space<vmem>>, vector<1x1x32x128xf32>
    %151 = vector.shape_cast %150 : vector<1x1x32x128xf32> to vector<32x128xf32>
    %152 = vector.shape_cast %149 : vector<32x128xf32> to vector<1x1x32x128xf32>
    tpu.vector_store %arg15[%c0_67, %c0_68, %c0_69, %c0_70], %152 {strides = array<i32>} : memref<1x2x32x128xf32, #tpu.memory_space<vmem>>, vector<1x1x32x128xf32>,
    %153 = vector.extract_strided_slice %149 {offsets = [0, 0], sizes = [32, 1], strides = [1, 1]} : vector<32x128xf32> to vector<32x1xf32>
    %154 = vector.extract_strided_slice %149 {offsets = [0, 1], sizes = [32, 1], strides = [1, 1]} : vector<32x128xf32> to vector<32x1xf32>
    %cst_71 = arith.constant 1.600000e+01 : f32
    %155 = vector.broadcast %cst_71 : f32 to vector<32x1xf32>
    %156 = arith.mulf %153, %155 : vector<32x1xf32>
    %cst_72 = arith.constant 1.600000e+01 : f32
    %157 = vector.broadcast %cst_72 : f32 to vector<32x1xf32>
    %158 = arith.mulf %154, %157 : vector<32x1xf32>
    %159 = math.floor %156 : vector<32x1xf32>
    %cst_73 = arith.constant 1.000000e+00 : f32
    %160 = vector.broadcast %cst_73 : f32 to vector<32x1xf32>
    %161 = arith.addf %159, %160 : vector<32x1xf32>
    %162 = math.floor %158 : vector<32x1xf32>
    %cst_74 = arith.constant 1.000000e+00 : f32
    %163 = vector.broadcast %cst_74 : f32 to vector<32x1xf32>
    %164 = arith.addf %162, %163 : vector<32x1xf32>
    %165 = arith.subf %161, %156 : vector<32x1xf32>
    %166 = arith.subf %164, %158 : vector<32x1xf32>
    %167 = arith.mulf %165, %166 : vector<32x1xf32>
    %168 = arith.subf %161, %156 : vector<32x1xf32>
    %169 = arith.subf %158, %162 : vector<32x1xf32>
    %170 = arith.mulf %168, %169 : vector<32x1xf32>
    %171 = arith.subf %156, %159 : vector<32x1xf32>
    %172 = arith.subf %164, %158 : vector<32x1xf32>
    %173 = arith.mulf %171, %172 : vector<32x1xf32>
    %174 = arith.subf %156, %159 : vector<32x1xf32>
    %175 = arith.subf %158, %162 : vector<32x1xf32>
    %176 = arith.mulf %174, %175 : vector<32x1xf32>
    %cst_75 = arith.constant 0.000000e+00 : f32
    %cst_76 = arith.constant 1.500000e+01 : f32
    %177 = vector.broadcast %cst_75 : f32 to vector<32x1xf32>
    %178 = arith.maximumf %177, %159 : vector<32x1xf32>
    %179 = vector.broadcast %cst_76 : f32 to vector<32x1xf32>
    %180 = arith.minimumf %179, %178 : vector<32x1xf32>
    %181 = arith.fptosi %180 : vector<32x1xf32> to vector<32x1xi32>
    %cst_77 = arith.constant 0.000000e+00 : f32
    %cst_78 = arith.constant 1.500000e+01 : f32
    %182 = vector.broadcast %cst_77 : f32 to vector<32x1xf32>
    %183 = arith.maximumf %182, %161 : vector<32x1xf32>
    %184 = vector.broadcast %cst_78 : f32 to vector<32x1xf32>
    %185 = arith.minimumf %184, %183 : vector<32x1xf32>
    %186 = arith.fptosi %185 : vector<32x1xf32> to vector<32x1xi32>
    %cst_79 = arith.constant 0.000000e+00 : f32
    %cst_80 = arith.constant 1.500000e+01 : f32
    %187 = vector.broadcast %cst_79 : f32 to vector<32x1xf32>
    %188 = arith.maximumf %187, %162 : vector<32x1xf32>
    %189 = vector.broadcast %cst_80 : f32 to vector<32x1xf32>
    %190 = arith.minimumf %189, %188 : vector<32x1xf32>
    %191 = arith.fptosi %190 : vector<32x1xf32> to vector<32x1xi32>
    %cst_81 = arith.constant 0.000000e+00 : f32
    %cst_82 = arith.constant 1.500000e+01 : f32
    %192 = vector.broadcast %cst_81 : f32 to vector<32x1xf32>
    %193 = arith.maximumf %192, %164 : vector<32x1xf32>
    %194 = vector.broadcast %cst_82 : f32 to vector<32x1xf32>
    %195 = arith.minimumf %194, %193 : vector<32x1xf32>
    %196 = arith.fptosi %195 : vector<32x1xf32> to vector<32x1xi32>
    %197 = arith.addi %8, %181 : vector<32x1xi32>
    %c16_i32_83 = arith.constant 16 : i32
    %198 = vector.broadcast %c16_i32_83 : i32 to vector<32x1xi32>
    %199 = arith.muli %191, %198 : vector<32x1xi32>
    %200 = arith.addi %197, %199 : vector<32x1xi32>
    %201 = arith.addi %8, %181 : vector<32x1xi32>
    %c16_i32_84 = arith.constant 16 : i32
    %202 = vector.broadcast %c16_i32_84 : i32 to vector<32x1xi32>
    %203 = arith.muli %196, %202 : vector<32x1xi32>
    %204 = arith.addi %201, %203 : vector<32x1xi32>
    %205 = arith.addi %8, %186 : vector<32x1xi32>
    %c16_i32_85 = arith.constant 16 : i32
    %206 = vector.broadcast %c16_i32_85 : i32 to vector<32x1xi32>
    %207 = arith.muli %191, %206 : vector<32x1xi32>
    %208 = arith.addi %205, %207 : vector<32x1xi32>
    %209 = arith.addi %8, %186 : vector<32x1xi32>
    %c16_i32_86 = arith.constant 16 : i32
    %210 = vector.broadcast %c16_i32_86 : i32 to vector<32x1xi32>
    %211 = arith.muli %196, %210 : vector<32x1xi32>
    %212 = arith.addi %209, %211 : vector<32x1xi32>
    %213 = vector.broadcast %200 : vector<32x1xi32> to vector<32x512xi32>
    %214 = arith.cmpi eq, %9, %213 : vector<32x512xi32>
    %215 = arith.extui %214 : vector<32x512xi1> to vector<32x512xi32>
    %216 = arith.sitofp %215 : vector<32x512xi32> to vector<32x512xf32>
    %217 = vector.broadcast %167 : vector<32x1xf32> to vector<32x512xf32>
    %218 = arith.mulf %217, %216 : vector<32x512xf32>
    %219 = vector.broadcast %204 : vector<32x1xi32> to vector<32x512xi32>
    %220 = arith.cmpi eq, %9, %219 : vector<32x512xi32>
    %221 = arith.extui %220 : vector<32x512xi1> to vector<32x512xi32>
    %222 = arith.sitofp %221 : vector<32x512xi32> to vector<32x512xf32>
    %223 = vector.broadcast %170 : vector<32x1xf32> to vector<32x512xf32>
    %224 = arith.mulf %223, %222 : vector<32x512xf32>
    %225 = arith.addf %218, %224 : vector<32x512xf32>
    %226 = vector.broadcast %208 : vector<32x1xi32> to vector<32x512xi32>
    %227 = arith.cmpi eq, %9, %226 : vector<32x512xi32>
    %228 = arith.extui %227 : vector<32x512xi1> to vector<32x512xi32>
    %229 = arith.sitofp %228 : vector<32x512xi32> to vector<32x512xf32>
    %230 = vector.broadcast %173 : vector<32x1xf32> to vector<32x512xf32>
    %231 = arith.mulf %230, %229 : vector<32x512xf32>
    %232 = arith.addf %225, %231 : vector<32x512xf32>
    %233 = vector.broadcast %212 : vector<32x1xi32> to vector<32x512xi32>
    %234 = arith.cmpi eq, %9, %233 : vector<32x512xi32>
    %235 = arith.extui %234 : vector<32x512xi1> to vector<32x512xi32>
    %236 = arith.sitofp %235 : vector<32x512xi32> to vector<32x512xf32>
    %237 = vector.broadcast %176 : vector<32x1xf32> to vector<32x512xf32>
    %238 = arith.mulf %237, %236 : vector<32x512xf32>
    %239 = arith.addf %232, %238 : vector<32x512xf32>
    %cst_87 = arith.constant dense<0.000000e+00> : vector<32x128xf32>
    %240 = tpu.matmul %239, %7, %cst_87 {dimension_numbers = #tpu.dot_dimension_numbers<[1], [0], [0], [1], [0, 0, 1, 1], [], []>} : vector<32x512xf32>, vector<512x128xf32>, vector<32x128xf32> -> vector<32x128xf32>
    %cst_88 = arith.constant dense<0.000000e+00> : vector<32x128xf32>
    %241 = tpu.matmul %13, %240, %cst_88 {dimension_numbers = #tpu.dot_dimension_numbers<[1], [0], [0], [1], [0, 0, 1, 1], [], []>} : vector<32x32xf32>, vector<32x128xf32>, vector<32x128xf32> -> vector<32x128xf32>
    %c1 = arith.constant 1 : index
    %c0_89 = arith.constant 0 : index
    %c0_90 = arith.constant 0 : index
    %242 = vector.load %arg7[%c1, %c0_89, %c0_90] : memref<2x128x128xf32, #tpu.memory_space<vmem>>, vector<1x128x128xf32>
    %243 = vector.shape_cast %242 : vector<1x128x128xf32> to vector<128x128xf32>
    %cst_91 = arith.constant dense<0.000000e+00> : vector<32x128xf32>
    %244 = tpu.matmul %240, %243, %cst_91 {dimension_numbers = #tpu.dot_dimension_numbers<[1], [0], [0], [1], [0, 0, 1, 1], [], []>} : vector<32x128xf32>, vector<128x128xf32>, vector<32x128xf32> -> vector<32x128xf32>
    %c1_92 = arith.constant 1 : index
    %c0_93 = arith.constant 0 : index
    %c0_94 = arith.constant 0 : index
    %245 = vector.load %arg8[%c1_92, %c0_93, %c0_94] : memref<2x128x128xf32, #tpu.memory_space<vmem>>, vector<1x128x128xf32>
    %246 = vector.shape_cast %245 : vector<1x128x128xf32> to vector<128x128xf32>
    %cst_95 = arith.constant dense<0.000000e+00> : vector<32x128xf32>
    %247 = tpu.matmul %241, %246, %cst_95 {dimension_numbers = #tpu.dot_dimension_numbers<[1], [0], [0], [1], [0, 0, 1, 1], [], []>} : vector<32x128xf32>, vector<128x128xf32>, vector<32x128xf32> -> vector<32x128xf32>
    %248 = arith.addf %244, %247 : vector<32x128xf32>
    %c1_96 = arith.constant 1 : index
    %c0_97 = arith.constant 0 : index
    %c0_98 = arith.constant 0 : index
    %249 = vector.load %arg9[%c1_96, %c0_97, %c0_98] : memref<2x1x128xf32, #tpu.memory_space<vmem>>, vector<1x1x128xf32>
    %250 = vector.shape_cast %249 : vector<1x1x128xf32> to vector<1x128xf32>
    %251 = vector.broadcast %250 : vector<1x128xf32> to vector<32x128xf32>
    %252 = arith.addf %248, %251 : vector<32x128xf32>
    %cst_99 = arith.constant 0.000000e+00 : f32
    %253 = vector.broadcast %cst_99 : f32 to vector<32x128xf32>
    %254 = arith.maximumf %252, %253 : vector<32x128xf32>
    %cst_100 = arith.constant dense<0.000000e+00> : vector<32x128xf32>
    %255 = tpu.matmul %13, %254, %cst_100 {dimension_numbers = #tpu.dot_dimension_numbers<[1], [0], [0], [1], [0, 0, 1, 1], [], []>} : vector<32x32xf32>, vector<32x128xf32>, vector<32x128xf32> -> vector<32x128xf32>
    %c1_101 = arith.constant 1 : index
    %c0_102 = arith.constant 0 : index
    %c0_103 = arith.constant 0 : index
    %256 = vector.load %arg10[%c1_101, %c0_102, %c0_103] : memref<2x128x128xf32, #tpu.memory_space<vmem>>, vector<1x128x128xf32>
    %257 = vector.shape_cast %256 : vector<1x128x128xf32> to vector<128x128xf32>
    %cst_104 = arith.constant dense<0.000000e+00> : vector<32x128xf32>
    %258 = tpu.matmul %254, %257, %cst_104 {dimension_numbers = #tpu.dot_dimension_numbers<[1], [0], [0], [1], [0, 0, 1, 1], [], []>} : vector<32x128xf32>, vector<128x128xf32>, vector<32x128xf32> -> vector<32x128xf32>
    %c1_105 = arith.constant 1 : index
    %c0_106 = arith.constant 0 : index
    %c0_107 = arith.constant 0 : index
    %259 = vector.load %arg11[%c1_105, %c0_106, %c0_107] : memref<2x128x128xf32, #tpu.memory_space<vmem>>, vector<1x128x128xf32>
    %260 = vector.shape_cast %259 : vector<1x128x128xf32> to vector<128x128xf32>
    %cst_108 = arith.constant dense<0.000000e+00> : vector<32x128xf32>
    %261 = tpu.matmul %255, %260, %cst_108 {dimension_numbers = #tpu.dot_dimension_numbers<[1], [0], [0], [1], [0, 0, 1, 1], [], []>} : vector<32x128xf32>, vector<128x128xf32>, vector<32x128xf32> -> vector<32x128xf32>
    %262 = arith.addf %258, %261 : vector<32x128xf32>
    %c1_109 = arith.constant 1 : index
    %c0_110 = arith.constant 0 : index
    %c0_111 = arith.constant 0 : index
    %263 = vector.load %arg12[%c1_109, %c0_110, %c0_111] : memref<2x1x128xf32, #tpu.memory_space<vmem>>, vector<1x1x128xf32>
    %264 = vector.shape_cast %263 : vector<1x1x128xf32> to vector<1x128xf32>
    %265 = vector.broadcast %264 : vector<1x128xf32> to vector<32x128xf32>
    %266 = arith.addf %262, %265 : vector<32x128xf32>
    %cst_112 = arith.constant 0.000000e+00 : f32
    %267 = vector.broadcast %cst_112 : f32 to vector<32x128xf32>
    %268 = arith.maximumf %266, %267 : vector<32x128xf32>
    %c1_113 = arith.constant 1 : index
    %c0_114 = arith.constant 0 : index
    %c0_115 = arith.constant 0 : index
    %269 = vector.load %arg13[%c1_113, %c0_114, %c0_115] : memref<2x128x128xf32, #tpu.memory_space<vmem>>, vector<1x128x128xf32>
    %270 = vector.shape_cast %269 : vector<1x128x128xf32> to vector<128x128xf32>
    %cst_116 = arith.constant dense<0.000000e+00> : vector<32x128xf32>
    %271 = tpu.matmul %268, %270, %cst_116 {dimension_numbers = #tpu.dot_dimension_numbers<[1], [0], [0], [1], [0, 0, 1, 1], [], []>} : vector<32x128xf32>, vector<128x128xf32>, vector<32x128xf32> -> vector<32x128xf32>
    %c1_117 = arith.constant 1 : index
    %c0_118 = arith.constant 0 : index
    %c0_119 = arith.constant 0 : index
    %272 = vector.load %arg14[%c1_117, %c0_118, %c0_119] : memref<2x1x128xf32, #tpu.memory_space<vmem>>, vector<1x1x128xf32>
    %273 = vector.shape_cast %272 : vector<1x1x128xf32> to vector<1x128xf32>
    %274 = vector.broadcast %273 : vector<1x128xf32> to vector<32x128xf32>
    %275 = arith.addf %271, %274 : vector<32x128xf32>
    %276 = arith.mulf %275, %275 : vector<32x128xf32>
    %cst_120 = arith.constant dense<0.000000e+00> : vector<32xf32>
    %277 = vector.multi_reduction <add>, %276, %cst_120 [1] : vector<32x128xf32> to vector<32xf32>
    %278 = vector.shape_cast %277 : vector<32xf32> to vector<32x1xf32>
    %cst_121 = arith.constant 9.99999996E-13 : f32
    %279 = vector.broadcast %cst_121 : f32 to vector<32x1xf32>
    %280 = arith.addf %278, %279 : vector<32x1xf32>
    %281 = math.rsqrt %280 : vector<32x1xf32>
    %282 = vector.broadcast %281 : vector<32x1xf32> to vector<32x128xf32>
    %283 = arith.mulf %275, %282 : vector<32x128xf32>
    %284 = arith.addf %149, %283 : vector<32x128xf32>
    %cst_122 = arith.constant 0.000000e+00 : f32
    %cst_123 = arith.constant 1.000000e+00 : f32
    %285 = vector.broadcast %cst_122 : f32 to vector<32x128xf32>
    %286 = arith.maximumf %285, %284 : vector<32x128xf32>
    %287 = vector.broadcast %cst_123 : f32 to vector<32x128xf32>
    %288 = arith.minimumf %287, %286 : vector<32x128xf32>
    %c0_124 = arith.constant 0 : index
    %c1_125 = arith.constant 1 : index
    %c0_126 = arith.constant 0 : index
    %c0_127 = arith.constant 0 : index
    %289 = vector.load %arg15[%c0_124, %c1_125, %c0_126, %c0_127] : memref<1x2x32x128xf32, #tpu.memory_space<vmem>>, vector<1x1x32x128xf32>
    %290 = vector.shape_cast %289 : vector<1x1x32x128xf32> to vector<32x128xf32>
    %291 = vector.shape_cast %288 : vector<32x128xf32> to vector<1x1x32x128xf32>
    tpu.vector_store %arg15[%c0_124, %c1_125, %c0_126, %c0_127], %291 {strides = array<i32>} : memref<1x2x32x128xf32, #tpu.memory_space<vmem>>, vector<1x1x32x128xf32>,
    return
  }
  func.func @transform_0(%arg0: i32) -> (i32, i32) {
    %c0_i32 = arith.constant 0 : i32
    %c0_i32_0 = arith.constant 0 : i32
    %c0_i32_1 = arith.constant 0 : i32
    return %c0_i32, %c0_i32_0 : i32, i32
  }
  func.func @transform_1(%arg0: i32) -> (i32, i32) {
    %c0_i32 = arith.constant 0 : i32
    %c0_i32_0 = arith.constant 0 : i32
    %c0_i32_1 = arith.constant 0 : i32
    return %c0_i32, %c0_i32_0 : i32, i32
  }
  func.func @transform_2(%arg0: i32) -> (i32, i32) {
    %c0_i32 = arith.constant 0 : i32
    %c0_i32_0 = arith.constant 0 : i32
    %c0_i32_1 = arith.constant 0 : i32
    return %c0_i32, %c0_i32_0 : i32, i32
  }
  func.func @transform_3(%arg0: i32) -> (i32, i32, i32) {
    %c0_i32 = arith.constant 0 : i32
    %c0_i32_0 = arith.constant 0 : i32
    %c0_i32_1 = arith.constant 0 : i32
    %c0_i32_2 = arith.constant 0 : i32
    return %c0_i32, %c0_i32_0, %c0_i32_1 : i32, i32, i32
  }
  func.func @transform_4(%arg0: i32) -> (i32, i32, i32) {
    %c0_i32 = arith.constant 0 : i32
    %c0_i32_0 = arith.constant 0 : i32
    %c0_i32_1 = arith.constant 0 : i32
    %c0_i32_2 = arith.constant 0 : i32
    return %c0_i32, %c0_i32_0, %c0_i32_1 : i32, i32, i32
  }
  func.func @transform_5(%arg0: i32) -> (i32, i32) {
    %c0_i32 = arith.constant 0 : i32
    %c0_i32_0 = arith.constant 0 : i32
    %c0_i32_1 = arith.constant 0 : i32
    return %c0_i32, %c0_i32_0 : i32, i32
  }
  func.func @transform_6(%arg0: i32) -> (i32, i32, i32) {
    %c0_i32 = arith.constant 0 : i32
    %c0_i32_0 = arith.constant 0 : i32
    %c0_i32_1 = arith.constant 0 : i32
    %c0_i32_2 = arith.constant 0 : i32
    return %c0_i32, %c0_i32_0, %c0_i32_1 : i32, i32, i32
  }
  func.func @transform_7(%arg0: i32) -> (i32, i32, i32) {
    %c0_i32 = arith.constant 0 : i32
    %c0_i32_0 = arith.constant 0 : i32
    %c0_i32_1 = arith.constant 0 : i32
    %c0_i32_2 = arith.constant 0 : i32
    return %c0_i32, %c0_i32_0, %c0_i32_1 : i32, i32, i32
  }
  func.func @transform_8(%arg0: i32) -> (i32, i32, i32) {
    %c0_i32 = arith.constant 0 : i32
    %c0_i32_0 = arith.constant 0 : i32
    %c0_i32_1 = arith.constant 0 : i32
    %c0_i32_2 = arith.constant 0 : i32
    return %c0_i32, %c0_i32_0, %c0_i32_1 : i32, i32, i32
  }
  func.func @transform_9(%arg0: i32) -> (i32, i32, i32) {
    %c0_i32 = arith.constant 0 : i32
    %c0_i32_0 = arith.constant 0 : i32
    %c0_i32_1 = arith.constant 0 : i32
    %c0_i32_2 = arith.constant 0 : i32
    return %c0_i32, %c0_i32_0, %c0_i32_1 : i32, i32, i32
  }
  func.func @transform_10(%arg0: i32) -> (i32, i32, i32) {
    %c0_i32 = arith.constant 0 : i32
    %c0_i32_0 = arith.constant 0 : i32
    %c0_i32_1 = arith.constant 0 : i32
    %c0_i32_2 = arith.constant 0 : i32
    return %c0_i32, %c0_i32_0, %c0_i32_1 : i32, i32, i32
  }
  func.func @transform_11(%arg0: i32) -> (i32, i32, i32) {
    %c0_i32 = arith.constant 0 : i32
    %c0_i32_0 = arith.constant 0 : i32
    %c0_i32_1 = arith.constant 0 : i32
    %c0_i32_2 = arith.constant 0 : i32
    return %c0_i32, %c0_i32_0, %c0_i32_1 : i32, i32, i32
  }
  func.func @transform_12(%arg0: i32) -> (i32, i32, i32) {
    %c0_i32 = arith.constant 0 : i32
    %c0_i32_0 = arith.constant 0 : i32
    %c0_i32_1 = arith.constant 0 : i32
    %c0_i32_2 = arith.constant 0 : i32
    return %c0_i32, %c0_i32_0, %c0_i32_1 : i32, i32, i32
  }
  func.func @transform_13(%arg0: i32) -> (i32, i32, i32) {
    %c0_i32 = arith.constant 0 : i32
    %c0_i32_0 = arith.constant 0 : i32
    %c0_i32_1 = arith.constant 0 : i32
    %c0_i32_2 = arith.constant 0 : i32
    return %c0_i32, %c0_i32_0, %c0_i32_1 : i32, i32, i32
  }
  func.func @transform_14(%arg0: i32) -> (i32, i32, i32, i32) {
    %c0_i32 = arith.constant 0 : i32
    %c0_i32_0 = arith.constant 0 : i32
    %c0_i32_1 = arith.constant 0 : i32
    %c0_i32_2 = arith.constant 0 : i32
    %c0_i32_3 = arith.constant 0 : i32
    return %c0_i32, %c0_i32_0, %c0_i32_1, %c0_i32_2 : i32, i32, i32, i32
  }
}

</mosaic_0001>

<bundles_post_ra>
// kernel: tpu_custom_call.1
= control target key start
LH: loop header
LB: loop body
LE: loop exit
PB: predicated region body
PF: predicated region fallthrough
CT: control target
= control target key end

     0   :  { %19 = vsyncpa [#allocation3], 0  ;;  %s7994_s0 = inlined_call_operand.vmem [shape: f32[512,3], index: 0, kind: input, shape index: {}]   ;;  %s7995_s1 = inlined_call_operand.hbm [shape: f32[3,128], index: 1, kind: input, shape index: {}]   ;;  %s7996_s2 = inlined_call_operand.hbm [shape: f32[1,128], index: 2, kind: input, shape index: {}]   ;;  %s7997_s3 = inlined_call_operand.vmem [shape: f32[1,32,128], index: 3, kind: input, shape index: {}]   ;;  %s7998_s4 = inlined_call_operand.vmem [shape: f32[1,32,32], index: 4, kind: input, shape index: {}]   ;;  %s7999_s5 = inlined_call_operand.vmem [shape: s32[32,1], index: 5, kind: input, shape index: {}]   ;;  %s8000_s6 = inlined_call_operand.vmem [shape: f32[2,128,128], index: 6, kind: input, shape index: {}]   ;;  %s8001_s7 = inlined_call_operand.vmem [shape: f32[2,128,128], index: 7, kind: input, shape index: {}]   ;;  %s8002_s8 = inlined_call_operand.vmem [shape: f32[2,1,128], index: 8, kind: input, shape index: {}]   ;;  %s8003_s9 = inlined_call_operand.hbm [shape: f32[2,128,128], index: 9, kind: input, shape index: {}]   ;;  %s8004_s10 = inlined_call_operand.hbm [shape: f32[2,128,128], index: 10, kind: input, shape index: {}]   ;;  %s8005_s11 = inlined_call_operand.vmem [shape: f32[2,1,128], index: 11, kind: input, shape index: {}]   ;;  %s8006_s12 = inlined_call_operand.hbm [shape: f32[2,128,128], index: 12, kind: input, shape index: {}]   ;;  %s8007_s13 = inlined_call_operand.vmem [shape: f32[2,1,128], index: 13, kind: input, shape index: {}]   ;;  %s8008_s14 = inlined_call_operand.hbm [shape: f32[1,2,32,128], index: 14, kind: output, shape index: {}]  }
   0x1   :  { %20 = vsyncpa [#allocation6], 0 }
   0x2   :  { %21 = vsyncpa [#allocation9], 0 }
   0x3   :  { %22 = vsyncpa [#allocation4], 0  ;;  %s5863_s29 = smov [#allocation5]   ;;  %s5723_s17 = scalar_lea.hbm %s7996_s2, 16 }
   0x4   :  { %s41_s30 = sshll.u32 %s5863_s29, 4  ;;  %p5724_p0 = scmp.ne.s32.totalorder %s7996_s2, %s5723_s17  ;;  %s42_s30 = int_to_ptr.vmem [resolvable:$true] %s41_s30 }
   0x5   :  { %p5727_p1 = scmp.lt.u32.totalorder %s5723_s17, %s7996_s2 }
   0x7   :  { %p5729_p2 = pnand %p5727_p1, %p5724_p0 }
   0x9   :  { %5732 = shalt.err (!%p5729_p2)
}
   0xa   :  { %s5733_s22 = scalar_lea.vmem %s42_s30, 16  ;;  %s5737_s23 = scalar_lea.vmem %s42_s30, 32 }
   0xb   :  { %p5734_p3 = scmp.ne.s32.totalorder %s42_s30, %s5733_s22  ;;  %p5738_p4 = scmp.lt.s32.totalorder %s42_s30, %s42_s30 }
   0xc   :  { %p5739_p5 = scmp.lt.s32.totalorder %s5737_s23, %s5733_s22 }
   0xe   :  { %p5740_p6 = por %p5739_p5, %p5738_p4 }
  0x10   :  { %p5741_p7 = pnand %p5740_p6, %p5734_p3 }
  0x12   :  { %5744 = shalt.err (!%p5741_p7)
}
  0x13   :  { %44 = dma.hbm_to_vmem [thread:$0]  %s7996_s2, 16, %s42_s30, [#allocation6]  }
  0x14   :  { %s5864_s26 = smov [#allocation8]   ;;  %s5865_s28 = smov [#allocation2]  }
  0x15   :  { %s74_s27 = sshll.u32 %s5864_s26, 4  ;;  %s31_s29 = sshll.u32 %s5865_s28, 4  ;;  %s75_s27 = int_to_ptr.vmem [resolvable:$true] %s74_s27  ;;  %s32_s29 = int_to_ptr.vmem [resolvable:$true] %s31_s29 }
  0x16   :  { %s5745_s17 = scalar_lea.hbm %s8004_s10, 4096 }
  0x17   :  { %p5746_p8 = scmp.ne.s32.totalorder %s8004_s10, %s5745_s17  ;;  %p5749_p9 = scmp.lt.u32.totalorder %s5745_s17, %s8004_s10 }
  0x19   :  { %p5751_p10 = pnand %p5749_p9, %p5746_p8 }
  0x1b   :  { %5754 = shalt.err (!%p5751_p10)
}
  0x1c   :  { %s5755_s2 = scalar_lea.vmem %s75_s27, 4096  ;;  %p5760_p12 = scmp.lt.s32.totalorder %s75_s27, %s75_s27 }
  0x1d   :  { %p5756_p11 = scmp.ne.s32.totalorder %s75_s27, %s5755_s2  ;;  %p5761_p13 = scmp.lt.s32.totalorder %s5755_s2, %s5755_s2 }
  0x1f   :  { %p5762_p0 = por %p5761_p13, %p5760_p12 }
  0x21   :  { %p5763_p1 = pnand %p5762_p0, %p5756_p11 }
  0x23   :  { %5766 = shalt.err (!%p5763_p1)
}
  0x24   :  { %s5866_s30 = smov 128   ;;  %s5867_s22 = smov 8  }
  0x25   :  { %80 = dma.hbm_to_vmem [thread:$0]  %s8004_s10, 4096, %s75_s27, [#allocation9], %s5866_s30, %s5866_s30, %s5867_s22  }
  0x26   :  { %s5767_s28 = scalar_lea.hbm %s7995_s1, 64 }
  0x27   :  { %p5768_p2 = scmp.ne.s32.totalorder %s7995_s1, %s5767_s28  ;;  %p5771_p3 = scmp.lt.u32.totalorder %s5767_s28, %s7995_s1 }
  0x29   :  { %p5773_p4 = pnand %p5771_p3, %p5768_p2 }
  0x2b   :  { %5776 = shalt.err (!%p5773_p4)
}
  0x2c   :  { %s5777_s19 = scalar_lea.vmem %s32_s29, 64  ;;  %p5782_p6 = scmp.lt.s32.totalorder %s32_s29, %s32_s29 }
  0x2d   :  { %p5778_p5 = scmp.ne.s32.totalorder %s32_s29, %s5777_s19  ;;  %p5783_p7 = scmp.lt.s32.totalorder %s5777_s19, %s5777_s19 }
  0x2f   :  { %p5784_p8 = por %p5783_p7, %p5782_p6 }
  0x31   :  { %p5785_p9 = pnand %p5784_p8, %p5778_p5 }
  0x33   :  { %5788 = shalt.err (!%p5785_p9)
}
  0x34   :  { %34 = dma.hbm_to_vmem [thread:$0]  %s7995_s1, 64, %s32_s29, [#allocation3]  }
  0x35   :  { %s5868_s20 = smov [#allocation7]   ;;  %s5869_s2 = smov [#allocation10]  }
  0x36   :  { %s62_s21 = sshll.u32 %s5868_s20, 4  ;;  %s88_s23 = sshll.u32 %s5869_s2, 4  ;;  %s63_s21 = int_to_ptr.vmem [resolvable:$true] %s62_s21  ;;  %s89_s23 = int_to_ptr.vmem [resolvable:$true] %s88_s23 }
  0x37   :  { %s5789_s26 = scalar_lea.hbm %s8003_s9, 4096 }
  0x38   :  { %p5790_p10 = scmp.ne.s32.totalorder %s8003_s9, %s5789_s26  ;;  %p5793_p11 = scmp.lt.u32.totalorder %s5789_s26, %s8003_s9 }
  0x3a   :  { %p5795_p12 = pnand %p5793_p11, %p5790_p10 }
  0x3c   :  { %5798 = shalt.err (!%p5795_p12)
}
  0x3d   :  { %s5799_s1 = scalar_lea.vmem %s63_s21, 4096  ;;  %p5804_p0 = scmp.lt.s32.totalorder %s63_s21, %s63_s21 }
  0x3e   :  { %p5800_p13 = scmp.ne.s32.totalorder %s63_s21, %s5799_s1  ;;  %p5805_p1 = scmp.lt.s32.totalorder %s5799_s1, %s5799_s1 }
  0x40   :  { %p5806_p2 = por %p5805_p1, %p5804_p0 }
  0x42   :  { %p5807_p3 = pnand %p5806_p2, %p5800_p13 }
  0x44   :  { %5810 = shalt.err (!%p5807_p3)
}
  0x45   :  { %68 = dma.hbm_to_vmem [thread:$0]  %s8003_s9, 4096, %s63_s21, [#allocation6], %s5866_s30, %s5866_s30, %s5867_s22  }
  0x46   :  { %s5811_s27 = scalar_lea.hbm %s8006_s12, 4096 }
  0x47   :  { %p5812_p4 = scmp.ne.s32.totalorder %s8006_s12, %s5811_s27  ;;  %p5815_p5 = scmp.lt.u32.totalorder %s5811_s27, %s8006_s12 }
  0x49   :  { %p5817_p6 = pnand %p5815_p5, %p5812_p4 }
  0x4b   :  { %5820 = shalt.err (!%p5817_p6)
}
  0x4c   :  { %s5821_s26 = scalar_lea.vmem %s89_s23, 4096  ;;  %p5826_p8 = scmp.lt.s32.totalorder %s89_s23, %s89_s23 }
  0x4d   :  { %p5822_p7 = scmp.ne.s32.totalorder %s89_s23, %s5821_s26  ;;  %p5827_p9 = scmp.lt.s32.totalorder %s5821_s26, %s5821_s26 }
  0x4f   :  { %p5828_p10 = por %p5827_p9, %p5826_p8 }
  0x51   :  { %p5829_p11 = pnand %p5828_p10, %p5822_p7 }
  0x53   :  { %5832 = shalt.err (!%p5829_p11)
}
  0x54   :  { %94 = dma.hbm_to_vmem [thread:$0]  %s8006_s12, 4096, %s89_s23, [#allocation9], %s5866_s30, %s5866_s30, %s5867_s22  }
  0x55   :  { %5855 = dma.done.wait [#allocation3], 64  }
  0x56   :  { %5856 = vsyncadd [#allocation3], 4294967232 }
  0x57   :  { %5857 = dma.done.wait [#allocation6], 4112  }
  0x58   :  { %5858 = vsyncadd [#allocation6], 4294963184 }
  0x59   :  { %5859 = dma.done.wait [#allocation9], 8192  }
  0x5a   :  { %5860 = vsyncadd [#allocation9], 4294959104  ;;  %vm377_vm0 = vcmask 1042432   ;;  %vm184_vm1 = vcmask 23552   ;;  %v176_v0 = vld [vmem:[#allocation2] sm:$0x7] }
  0x5b   :  { %v112_v1 = vld [vmem:[%s7994_s0] sm:$0xff]  ;;  %v113_v2 = vld [vmem:[%s7994_s0 + $0x8] sm:$0xff]  ;;  %4600 = vmatprep.subr.msk.mxu0 %vm377_vm0, %v176_v0  ;;  %v114_v3 = vld [vmem:[%s7994_s0 + $0x10] sm:$0xff]  ;;  %v5870_v11 = vmov 0   ;;  %s5871_s29 = smov 127  }
  0x5c   :  { %4602 = vmatprep.mubr.msk.f32.mxu0 %vm184_vm1, %v112_v1  ;;  %4601 = vmatpush3.msk.msra.mxu0 %vm377_vm0, %v176_v0  ;;  %v115_v4 = vld [vmem:[%s7994_s0 + $0x18] sm:$0xff]  ;;  %v839_v5 = vld [vmem:[%s7997_s3] sm:$0xff]  ;;  %v840_v8 = vld [vmem:[%s7997_s3 + $0x8] sm:$0xff] }
  0x5d   :  { %4603 = vmatmul.mubr.msk.f32.vlgmr.msra.gmra.mrb[0].mxu0 %vm184_vm1, %v113_v2  ;;  %v116_v6 = vld [vmem:[%s7994_s0 + $0x20] sm:$0xff]  ;;  %v847_v7 = vmul.f32 16.0, %v839_v5  ;;  %v6042_v9 = vmul.f32 16.0, %v840_v8  ;;  %v841_v10 = vld [vmem:[%s7997_s3 + $0x10] sm:$0xff]  ;;  %5690 = vset.pattern.permute.xlu1 %v5870_v11  ;;  %v117_v14 = vld [vmem:[%s7994_s0 + $0x28] sm:$0xff] }
  0x5e   :  { %4605 = vmatprep.mubr.msk.f32.mxu0 %vm184_vm1, %v114_v3  ;;  %5689 = vset.pattern.permute.xlu0 %v5870_v11  ;;  %v6048_v13 = vmul.f32 16.0, %v841_v10  ;;  %v118_v16 = vld [vmem:[%s7994_s0 + $0x30] sm:$0xff]  ;;  %v119_v25 = vld [vmem:[%s7994_s0 + $0x38] sm:$0xff]  ;;  %v120_v30 = vld [vmem:[%s7994_s0 + $0x40] sm:$0xff] }
  0x5f   :  { %v851_v12 = vfloor.f32 %v847_v7  ;;  %v852_v15 = vfloor.f32 %v6042_v9  ;;  %v842_v29 = vld [vmem:[%s7997_s3 + $0x18] sm:$0xff]  ;;  %v121_v42 = vld [vmem:[%s7994_s0 + $0x48] sm:$0xff]  ;;  %v122_v45 = vld [vmem:[%s7994_s0 + $0x50] sm:$0xff] }
  0x60   :  { %v853_v19 = vfloor.f32 %v6048_v13  ;;  %v6078_v34 = vmul.f32 16.0, %v842_v29  ;;  %v123_v54 = vld [vmem:[%s7994_s0 + $0x58] sm:$0xff]  ;;  %v124_v55 = vld [vmem:[%s7994_s0 + $0x60] sm:$0xff]  ;;  %v125_v63 = vld [vmem:[%s7994_s0 + $0x68] sm:$0xff] }
  0x61   :  { %4606 = vmatmul.mubr.msk.f32.gmra.mrb[2].mxu0 %vm184_vm1, %v115_v4  ;;  %v855_v17 = vadd.f32 1.0, %v851_v12  ;;  %v915_v18 = vmax.f32 %v851_v12, 0.0  ;;  %v916_v20 = vmax.f32 %v852_v15, 0.0  ;;  %v856_v24 = vadd.f32 1.0, %v852_v15  ;;  %v126_v0 = vld [vmem:[%s7994_s0 + $0x70] sm:$0xff]  ;;  %v128_v8 = vld [vmem:[%s7994_s0 + $0x80] sm:$0xff] }
  0x62   :  { %4608 = vmatprep.mubr.msk.f32.mxu0 %vm184_vm1, %v116_v6  ;;  %v6066_v26 = vsub.f32 %v847_v7, %v851_v12  ;;  %v6068_v28 = vadd.f32 1.0, %v853_v19  ;;  %v917_v36 = vmax.f32 %v853_v19, 0.0  ;;  %v6085_v41 = vfloor.f32 %v6078_v34  ;;  %v137_v29 = vld [vmem:[%s7994_s0 + $0xc8] sm:$0xff] }
  0x63   :  { %v6060_v21 = vsub.f32 %v855_v17, %v847_v7  ;;  %v919_v22 = vmin.f32 %v915_v18, 15.0  ;;  %v927_v23 = vmax.f32 %v855_v17, 0.0  ;;  %v920_v27 = vmin.f32 %v916_v20, 15.0  ;;  %v127_v7 = vld [vmem:[%s7994_s0 + $0x78] sm:$0xff]  ;;  %v132_v20 = vld [vmem:[%s7994_s0 + $0xa0] sm:$0xff] }
  0x64   :  { %v928_v33 = vmax.f32 %v856_v24, 0.0  ;;  %v929_v37 = vmax.f32 %v6068_v28, 0.0  ;;  %v6092_v43 = vsub.f32 %v6042_v9, %v852_v15  ;;  %v6103_v49 = vadd.f32 1.0, %v6085_v41  ;;  %v130_v15 = vld [vmem:[%s7994_s0 + $0x90] sm:$0xff] }
  0x65   :  { %4609 = vmatmul.mubr.msk.f32.gmra.mrb[4].mxu0 %vm184_vm1, %v117_v14  ;;  %867 = vrot.lane.b32.xlu1 %v6060_v21, %s5871_s29  ;;  %v5646_v31 = vtrunc.f32 %v919_v22  ;;  %v931_v32 = vmin.f32 %v927_v23, 15.0  ;;  %v5648_v35 = vtrunc.f32 %v920_v27  ;;  %v921_v52 = vmin.f32 %v917_v36, 15.0  ;;  %v129_v14 = vld [vmem:[%s7994_s0 + $0x88] sm:$0xff]  ;;  %v135_v27 = vld [vmem:[%s7994_s0 + $0xb8] sm:$0xff]  ;;  %v144_v36 = vld [vmem:[%s7994_s0 + $0x100] sm:$0xff] }
  0x66   :  { %4611 = vmatprep.mubr.msk.f32.mxu0 %vm184_vm1, %v118_v16  ;;  %v932_v40 = vmin.f32 %v928_v33, 15.0  ;;  %v933_v44 = vmin.f32 %v929_v37, 15.0  ;;  %v930_v53 = vmax.f32 %v6103_v49, 0.0  ;;  %v6121_v56 = vsub.f32 %v6048_v13, %v853_v19  ;;  %v131_v19 = vld [vmem:[%s7994_s0 + $0x98] sm:$0xff]  ;;  %v133_v23 = vld [vmem:[%s7994_s0 + $0xa8] sm:$0xff] }
  0x67   :  { %v6082_v38 = vcvt.f32.s32 %v5646_v31  ;;  %v5654_v39 = vtrunc.f32 %v931_v32  ;;  %v6108_v51 = vcvt.f32.s32 %v5648_v35  ;;  %v5650_v61 = vtrunc.f32 %v921_v52  ;;  %v139_v31 = vld [vmem:[%s7994_s0 + $0xd8] sm:$0xff]  ;;  %v140_v32 = vld [vmem:[%s7994_s0 + $0xe0] sm:$0xff]  ;;  %v141_v33 = vld [vmem:[%s7994_s0 + $0xe8] sm:$0xff] }
  0x68   :  { %v5656_v48 = vtrunc.f32 %v932_v40  ;;  %v5658_v58 = vtrunc.f32 %v933_v44  ;;  %v934_v59 = vmin.f32 %v930_v53, 15.0  ;;  %v918_v62 = vmax.f32 %v6085_v41, 0.0  ;;  %v143_v35 = vld [vmem:[%s7994_s0 + $0xf8] sm:$0xff]  ;;  %v145_v37 = vld [vmem:[%s7994_s0 + $0x108] sm:$0xff]  ;;  %v150_v44 = vld [vmem:[%s7994_s0 + $0x130] sm:$0xff] }
  0x69   :  { %4612 = vmatmul.mubr.msk.f32.gmra.mrb[6].mxu0 %vm184_vm1, %v119_v25  ;;  %891 = vrot.lane.b32.xlu1 %v6066_v26, %s5871_s29  ;;  %v943_v46 = vmul.u32 16, %v6082_v38  ;;  %v6100_v47 = vcvt.f32.s32 %v5654_v39  ;;  %v944_v60 = vmul.u32 16, %v6108_v51  ;;  %v6144_v4 = vsub.f32 %v856_v24, %v6042_v9  ;;  %v134_v24 = vld [vmem:[%s7994_s0 + $0xb0] sm:$0xff]  ;;  %v147_v40 = vld [vmem:[%s7994_s0 + $0x118] sm:$0xff]  ;;  %v156_v52 = vld [vmem:[%s7994_s0 + $0x160] sm:$0xff] }
  0x6a   :  { %4614 = vmatprep.mubr.msk.f32.mxu0 %vm184_vm1, %v120_v30  ;;  %v6123_v57 = vcvt.f32.s32 %v5656_v48  ;;  %v6139_v2 = vcvt.f32.s32 %v5658_v58  ;;  %v5660_v3 = vtrunc.f32 %v934_v59  ;;  %v6146_v5 = vcvt.f32.s32 %v5650_v61  ;;  %v138_v30 = vld [vmem:[%s7994_s0 + $0xd0] sm:$0xff]  ;;  %v153_v48 = vld [vmem:[%s7994_s0 + $0x148] sm:$0xff]  ;;  %v160_v58 = vld [vmem:[%s7994_s0 + $0x180] sm:$0xff] }
  0x6b   :  { %947 = vrot.lane.b32.xlu0 %v943_v46, %s5871_s29  ;;  %v959_v50 = vmul.u32 16, %v6100_v47  ;;  %v922_v6 = vmin.f32 %v918_v62, 15.0  ;;  %v6176_v17 = vsub.f32 %v6068_v28, %v6048_v13  ;;  %v6190_v22 = vsub.f32 %v6078_v34, %v6085_v41  ;;  %v136_v28 = vld [vmem:[%s7994_s0 + $0xc0] sm:$0xff]  ;;  %v146_v39 = vld [vmem:[%s7994_s0 + $0x110] sm:$0xff]  ;;  %v157_v53 = vld [vmem:[%s7994_s0 + $0x168] sm:$0xff] }
  0x6c   :  { %v960_v1 = vmul.u32 16, %v6123_v57  ;;  %v961_v10 = vmul.u32 16, %v6139_v2  ;;  %v6157_v11 = vcvt.f32.s32 %v5660_v3  ;;  %v6209_v25 = vsub.f32 %v6103_v49, %v6078_v34  ;;  %v142_v34 = vld [vmem:[%s7994_s0 + $0xf0] sm:$0xff]  ;;  %v148_v41 = vld [vmem:[%s7994_s0 + $0x120] sm:$0xff]  ;;  %v161_v59 = vld [vmem:[%s7994_s0 + $0x188] sm:$0xff] }
  0x6d   :  { %4615 = vmatmul.mubr.msk.f32.gmra.mrb[8].mxu0 %vm184_vm1, %v121_v42  ;;  %893 = vrot.lane.b32.xlu1 %v6092_v43, %s5871_s29  ;;  %v945_v9 = vmul.u32 16, %v6146_v5  ;;  %v5652_v12 = vtrunc.f32 %v922_v6  ;;  %v149_v42 = vld [vmem:[%s7994_s0 + $0x128] sm:$0xff]  ;;  %v152_v46 = vld [vmem:[%s7994_s0 + $0x140] sm:$0xff]  ;;  %v154_v49 = vld [vmem:[%s7994_s0 + $0x150] sm:$0xff] }
  0x6e   :  { %4617 = vmatprep.mubr.msk.f32.mxu0 %vm184_vm1, %v122_v45  ;;  %v962_v16 = vmul.u32 16, %v6157_v11  ;;  %v151_v45 = vld [vmem:[%s7994_s0 + $0x138] sm:$0xff]  ;;  %v164_v62 = vld [vmem:[%s7994_s0 + $0x1a0] sm:$0xff]  ;;  %v169_v6 = vld [vmem:[%s7994_s0 + $0x1c8] sm:$0xff] }
  0x6f   :  { %963 = vrot.lane.b32.xlu0 %v959_v50, %s5871_s29  ;;  %v6178_v18 = vcvt.f32.s32 %v5652_v12  ;;  %v155_v50 = vld [vmem:[%s7994_s0 + $0x158] sm:$0xff]  ;;  %v168_v3 = vld [vmem:[%s7994_s0 + $0x1c0] sm:$0xff]  ;;  %v174_v12 = vld [vmem:[%s7994_s0 + $0x1f0] sm:$0xff] }
  0x70   :  { %v163_v61 = vld [vmem:[%s7994_s0 + $0x198] sm:$0xff] }
  0x71   :  { %4618 = vmatmul.mubr.msk.f32.gmra.mrb[10].mxu0 %vm184_vm1, %v123_v54  ;;  %895 = vrot.lane.b32.xlu1 %v6121_v56, %s5871_s29  ;;  %v946_v13 = vmul.u32 16, %v6178_v18  ;;  %v158_v54 = vld [vmem:[%s7994_s0 + $0x170] sm:$0xff] }
  0x72   :  { %4620 = vmatprep.mubr.msk.f32.mxu0 %vm184_vm1, %v124_v55  ;;  %v159_v55 = vld [vmem:[%s7994_s0 + $0x178] sm:$0xff] }
  0x73   :  { %949 = vrot.lane.b32.xlu0 %v944_v60, %s5871_s29  ;;  %v162_v60 = vld [vmem:[%s7994_s0 + $0x190] sm:$0xff] }
  0x75   :  { %4621 = vmatmul.mubr.msk.f32.gmra.mrb[12].mxu0 %vm184_vm1, %v125_v63  ;;  %965 = vrot.lane.b32.xlu1 %v960_v1, %s5871_s29  ;;  %v165_v63 = vld [vmem:[%s7994_s0 + $0x1a8] sm:$0xff]  ;;  %v167_v1 = vld [vmem:[%s7994_s0 + $0x1b8] sm:$0xff] }
  0x76   :  { %4623 = vmatprep.mubr.msk.f32.mxu0 %vm184_vm1, %v126_v0  ;;  %v166_v0 = vld [vmem:[%s7994_s0 + $0x1b0] sm:$0xff] }
  0x77   :  { %869 = vrot.lane.b32.xlu0 %v6144_v4, %s5871_s29 }
  0x79   :  { %4624 = vmatmul.mubr.msk.f32.gmra.mrb[14].mxu0 %vm184_vm1, %v127_v7  ;;  %967 = vrot.lane.b32.xlu1 %v961_v10, %s5871_s29  ;;  %v170_v7 = vld [vmem:[%s7994_s0 + $0x1d0] sm:$0xff]  ;;  %v172_v10 = vld [vmem:[%s7994_s0 + $0x1e0] sm:$0xff] }
  0x7a   :  { %4626 = vmatprep.mubr.msk.f32.mxu0 %vm184_vm1, %v128_v8  ;;  %v171_v8 = vld [vmem:[%s7994_s0 + $0x1d8] sm:$0xff] }
  0x7b   :  { %951 = vrot.lane.b32.xlu0 %v945_v9, %s5871_s29  ;;  %v173_v9 = vld [vmem:[%s7994_s0 + $0x1e8] sm:$0xff] }
  0x7d   :  { %4627 = vmatmul.mubr.msk.f32.gmra.mrb[16].mxu0 %vm184_vm1, %v129_v14  ;;  %969 = vrot.lane.b32.xlu1 %v962_v16, %s5871_s29  ;;  %v175_v14 = vld [vmem:[%s7994_s0 + $0x1f8] sm:$0xff] }
  0x7e   :  { %4629 = vmatprep.mubr.msk.f32.mxu0 %vm184_vm1, %v130_v15 }
  0x7f   :  { %871 = vrot.lane.b32.xlu0 %v6176_v17, %s5871_s29 }
  0x81   :  { %4630 = vmatmul.mubr.msk.f32.gmra.mrb[18].mxu0 %vm184_vm1, %v131_v19  ;;  %897 = vrot.lane.b32.xlu1 %v6190_v22, %s5871_s29 }
  0x82   :  { %4632 = vmatprep.mubr.msk.f32.mxu0 %vm184_vm1, %v132_v20 }
  0x83   :  { %953 = vrot.lane.b32.xlu0 %v946_v13, %s5871_s29 }
  0x85   :  { %4633 = vmatmul.mubr.msk.f32.gmra.mrb[20].mxu0 %vm184_vm1, %v133_v23 }
  0x86   :  { %4635 = vmatprep.mubr.msk.f32.mxu0 %vm184_vm1, %v134_v24 }
  0x87   :  { %873 = vrot.lane.b32.xlu0 %v6209_v25, %s5871_s29 }
  0x89   :  { %4636 = vmatmul.mubr.msk.f32.gmra.mrb[22].mxu0 %vm184_vm1, %v135_v27 }
  0x8a   :  { %4638 = vmatprep.mubr.msk.f32.mxu0 %vm184_vm1, %v136_v28 }
  0x8d   :  { %4639 = vmatmul.mubr.msk.f32.gmra.mrb[24].mxu0 %vm184_vm1, %v137_v29 }
  0x8e   :  { %4641 = vmatprep.mubr.msk.f32.mxu0 %vm184_vm1, %v138_v30 }
  0x91   :  { %4642 = vmatmul.mubr.msk.f32.gmra.mrb[26].mxu0 %vm184_vm1, %v139_v31 }
  0x92   :  { %4644 = vmatprep.mubr.msk.f32.mxu0 %vm184_vm1, %v140_v32 }
  0x95   :  { %4645 = vmatmul.mubr.msk.f32.gmra.mrb[28].mxu0 %vm184_vm1, %v141_v33 }
  0x96   :  { %4647 = vmatprep.mubr.msk.f32.mxu0 %vm184_vm1, %v142_v34 }
  0x99   :  { %4648 = vmatmul.mubr.msk.f32.gmra.mrb[30].mxu0 %vm184_vm1, %v143_v35  ;;  %v830_v35 = vld [vmem:[%s7999_s5] sm:$0xff] }
  0x9a   :  { %4650 = vmatprep.mubr.msk.f32.mxu0 %vm184_vm1, %v144_v36 }
  0x9d   :  { %4651 = vmatmul.mubr.msk.f32.gmra.mrb[32].mxu0 %vm184_vm1, %v145_v37 }
  0x9e   :  { %4653 = vmatprep.mubr.msk.f32.mxu0 %vm184_vm1, %v146_v39  ;;  %v975_v39 = vadd.s32 %v6100_v47, %v830_v35  ;;  %v832_v47 = vld [vmem:[%s7999_s5 + $0x10] sm:$0xff] }
  0xa1   :  { %4654 = vmatmul.mubr.msk.f32.gmra.mrb[34].mxu0 %vm184_vm1, %v147_v40  ;;  %v831_v40 = vld [vmem:[%s7999_s5 + $0x8] sm:$0xff] }
  0xa2   :  { %4656 = vmatprep.mubr.msk.f32.mxu0 %vm184_vm1, %v148_v41 }
  0xa5   :  { %4657 = vmatmul.mubr.msk.f32.gmra.mrb[36].mxu0 %vm184_vm1, %v149_v42 }
  0xa6   :  { %4659 = vmatprep.mubr.msk.f32.mxu0 %vm184_vm1, %v150_v44 }
  0xa9   :  { %4660 = vmatmul.mubr.msk.f32.gmra.mrb[38].mxu0 %vm184_vm1, %v151_v45  ;;  %v940_v45 = vadd.s32 %v6108_v51, %v831_v40 }
  0xaa   :  { %4662 = vmatprep.mubr.msk.f32.mxu0 %vm184_vm1, %v152_v46 }
  0xad   :  { %4663 = vmatmul.mubr.msk.f32.gmra.mrb[40].mxu0 %vm184_vm1, %v153_v48  ;;  %v976_v48 = vadd.s32 %v6123_v57, %v831_v40 }
  0xae   :  { %4665 = vmatprep.mubr.msk.f32.mxu0 %vm184_vm1, %v154_v49 }
  0xb1   :  { %4666 = vmatmul.mubr.msk.f32.gmra.mrb[42].mxu0 %vm184_vm1, %v155_v50 }
  0xb2   :  { %4668 = vmatprep.mubr.msk.f32.mxu0 %vm184_vm1, %v156_v52 }
  0xb5   :  { %4669 = vmatmul.mubr.msk.f32.gmra.mrb[44].mxu0 %vm184_vm1, %v157_v53 }
  0xb6   :  { %4671 = vmatprep.mubr.msk.f32.mxu0 %vm184_vm1, %v158_v54  ;;  %v833_v54 = vld [vmem:[%s7999_s5 + $0x18] sm:$0xff] }
  0xb9   :  { %4672 = vmatmul.mubr.msk.f32.gmra.mrb[46].mxu0 %vm184_vm1, %v159_v55 }
  0xba   :  { %4674 = vmatprep.mubr.msk.f32.mxu0 %vm184_vm1, %v160_v58  ;;  %v942_v58 = vadd.s32 %v6178_v18, %v833_v54 }
  0xbd   :  { %4675 = vmatmul.mubr.msk.f32.gmra.mrb[48].mxu0 %vm184_vm1, %v161_v59 }
  0xbe   :  { %4677 = vmatprep.mubr.msk.f32.mxu0 %vm184_vm1, %v162_v60 }
  0xc1   :  { %4678 = vmatmul.mubr.msk.f32.gmra.mrb[50].mxu0 %vm184_vm1, %v163_v61 }
  0xc2   :  { %4680 = vmatprep.mubr.msk.f32.mxu0 %vm184_vm1, %v164_v62 }
  0xc5   :  { %4681 = vmatmul.mubr.msk.f32.gmra.mrb[52].mxu0 %vm184_vm1, %v165_v63 }
  0xc6   :  { %4683 = vmatprep.mubr.msk.f32.mxu0 %vm184_vm1, %v166_v0 }
  0xc9   :  { %4684 = vmatmul.mubr.msk.f32.gmra.mrb[54].mxu0 %vm184_vm1, %v167_v1  ;;  %v978_v1 = vadd.s32 %v6157_v11, %v833_v54 }
  0xca   :  { %4686 = vmatprep.mubr.msk.f32.mxu0 %vm184_vm1, %v168_v3 }
  0xcd   :  { %4687 = vmatmul.mubr.msk.f32.gmra.mrb[56].mxu0 %vm184_vm1, %v169_v6 }
  0xce   :  { %4689 = vmatprep.mubr.msk.f32.mxu0 %vm184_vm1, %v170_v7 }
  0xd1   :  { %4690 = vmatmul.mubr.msk.f32.gmra.mrb[58].mxu0 %vm184_vm1, %v171_v8 }
  0xd2   :  { %4692 = vmatprep.mubr.msk.f32.mxu0 %vm184_vm1, %v172_v10 }
  0xd5   :  { %4693 = vmatmul.mubr.msk.f32.gmra.mrb[60].mxu0 %vm184_vm1, %v173_v9 }
  0xd6   :  { %4695 = vmatprep.mubr.msk.f32.mxu0 %vm184_vm1, %v174_v12 }
  0xd7   :  { %v868_v15 = vpop.permute.xlu1 %867 }
  0xd8   :  { %v907_v31 = vmul.f32 %v6066_v26, %v868_v15  ;;  %v879_v36 = vmul.f32 %v868_v15, %v6060_v21 }
  0xd9   :  { %4696 = vmatmul.mubr.msk.f32.gmra.mrb[62].mxu0 %vm184_vm1, %v175_v14 }
  0xdb   :  { %v892_v16 = vpop.permute.xlu1 %891 }
  0xdc   :  { %v903_v19 = vmul.f32 %v892_v16, %v6060_v21  ;;  %v911_v13 = vmul.f32 %v892_v16, %v6066_v26 }
  0xdd   :  { %v948_v20 = vpop.permute.xlu0 %947 }
  0xde   :  { %1145 = vperm.xlu0 %5689, %v903_v19   ;;  %v979_v44 = vadd.s32 %v975_v39, %v948_v20 }
  0xdf   :  { %v894_v23 = vpop.permute.xlu1 %893 }
  0xe0   :  { %v904_v27 = vmul.f32 %v894_v23, %v6144_v4  ;;  %v912_v32 = vmul.f32 %v894_v23, %v6092_v43 }
  0xe1   :  { %v964_v24 = vpop.permute.xlu0 %963 }
  0xe2   :  { %1369 = vperm.xlu0 %5689, %v911_v13   ;;  %v983_v60 = vadd.s32 %v975_v39, %v964_v24 }
  0xe3   :  { %v896_v28 = vpop.permute.xlu1 %895 }
  0xe4   :  { %v905_v29 = vmul.f32 %v896_v28, %v6176_v17  ;;  %v913_v0 = vmul.f32 %v896_v28, %v6121_v56 }
  0xe5   :  { %v950_v30 = vpop.permute.xlu0 %949 }
  0xe6   :  { %1155 = vperm.xlu1 %5690, %v905_v29   ;;  %1150 = vperm.xlu0 %5689, %v904_v27   ;;  %v980_v51 = vadd.s32 %v976_v48, %v950_v30 }
  0xe7   :  { %v966_v42 = vpop.permute.xlu1 %965 }
  0xe8   :  { %v972_v62 = vadd.s32 %v966_v42, %v940_v45  ;;  %v984_v7 = vadd.s32 %v976_v48, %v966_v42 }
  0xe9   :  { %v870_v33 = vpop.permute.xlu0 %869 }
  0xea   :  { %1374 = vperm.xlu1 %5690, %v912_v32   ;;  %v908_v34 = vmul.f32 %v6092_v43, %v870_v33  ;;  %1257 = vperm.xlu0 %5689, %v907_v31   ;;  %v880_v26 = vmul.f32 %v870_v33, %v6144_v4  ;;  %v939_v43 = vadd.s32 %v6082_v38, %v830_v35 }
  0xeb   :  { %v956_v4 = vadd.s32 %v950_v30, %v940_v45  ;;  %v968_v49 = vpop.permute.xlu1 %967  ;;  %v941_v38 = vadd.s32 %v6146_v5, %v832_v47 }
  0xec   :  { %v955_v46 = vadd.s32 %v948_v20, %v939_v43  ;;  %v971_v57 = vadd.s32 %v964_v24, %v939_v43 }
  0xed   :  { %v952_v37 = vpop.permute.xlu0 %951  ;;  %v973_v3 = vadd.s32 %v968_v49, %v941_v38 }
  0xee   :  { %1049 = vperm.xlu1 %5690, %v879_v36   ;;  %1262 = vperm.xlu0 %5689, %v908_v34   ;;  %v957_v52 = vadd.s32 %v952_v37, %v941_v38 }
  0xef   :  { %v970_v53 = vpop.permute.xlu1 %969 }
  0xf0   :  { %v974_v10 = vadd.s32 %v970_v53, %v942_v58  ;;  %v986_v11 = vadd.s32 %v978_v1, %v970_v53 }
  0xf1   :  { %v872_v41 = vpop.permute.xlu0 %871 }
  0xf2   :  { %1054 = vperm.xlu1 %5690, %v880_v26   ;;  %v881_v21 = vmul.f32 %v872_v41, %v6176_v17  ;;  %v909_v50 = vmul.f32 %v6121_v56, %v872_v41  ;;  %v977_v17 = vadd.s32 %v6139_v2, %v832_v47 }
  0xf3   :  { %v898_v59 = vpop.permute.xlu1 %897 }
  0xf4   :  { %1059 = vperm.xlu0 %5689, %v881_v21   ;;  %v981_v55 = vadd.s32 %v977_v17, %v952_v37  ;;  %v906_v2 = vmul.f32 %v898_v59, %v6209_v25  ;;  %v914_v9 = vmul.f32 %v898_v59, %v6190_v22  ;;  %v985_v56 = vadd.s32 %v977_v17, %v968_v49 }
  0xf5   :  { %v954_v5 = vpop.permute.xlu0 %953 }
  0xf6   :  { %1196 = vperm.xlu1 %5690, %v979_v44   ;;  %v958_v61 = vadd.s32 %v954_v5, %v942_v58  ;;  %v982_v6 = vadd.s32 %v978_v1, %v954_v5 }
  0xf8   :  { %988 = vperm.xlu0 %5689, %v955_v46  }
  0xf9   :  { %v874_v63 = vpop.permute.xlu0 %873 }
  0xfa   :  { %991 = vperm.xlu1 %5690, %v956_v4   ;;  %v882_v18 = vmul.f32 %v874_v63, %v6209_v25  ;;  %v910_v8 = vmul.f32 %v6190_v22, %v874_v63  ;;  %v6414_v25 = vld [vmem:[#allocation5] ss:$0 sm:$0xff] }
  0xfc   :  { %1267 = vperm.xlu0 %5689, %v909_v50  }
  0xfe   :  { %1199 = vperm.xlu1 %5690, %v980_v51  }
 0x100   :  { %994 = vperm.xlu0 %5689, %v957_v52  }
 0x102   :  { %1084 = vperm.xlu1 %5690, %v971_v57  }
 0x104   :  { %1202 = vperm.xlu0 %5689, %v981_v55  }
 0x106   :  { %1308 = vperm.xlu1 %5690, %v983_v60  }
 0x108   :  { %997 = vperm.xlu0 %5689, %v958_v61  }
 0x10a   :  { %1160 = vperm.xlu1 %5690, %v906_v2  }
 0x10c   :  { %1087 = vperm.xlu0 %5689, %v972_v62  }
 0x10e   :  { %1379 = vperm.xlu1 %5690, %v913_v0  }
 0x110   :  { %1064 = vperm.xlu0 %5689, %v882_v18  }
 0x112   :  { %1090 = vperm.xlu1 %5690, %v973_v3  }
 0x114   :  { %1205 = vperm.xlu0 %5689, %v982_v6  }
 0x116   :  { %1311 = vperm.xlu1 %5690, %v984_v7  }
 0x118   :  { %1272 = vperm.xlu0 %5689, %v910_v8  }
 0x11a   :  { %1093 = vperm.xlu1 %5690, %v974_v10  }
 0x11c   :  { %1384 = vperm.xlu0 %5689, %v914_v9  }
 0x11e   :  { %1314 = vperm.xlu1 %5690, %v985_v56  }
 0x122   :  { %1317 = vperm.xlu1 %5690, %v986_v11  }
 0x130   :  { %v4604_v12 = vpop.f32.mrb[0].mxu0 }
 0x131   :  { %v453_v14 = vadd.f32 %v4604_v12, %v6414_v25  ;;  %v447_v15 = vpop.f32.mrb[1].mxu0 }
 0x132   :  { %v448_v16 = vadd.f32 %v6414_v25, %v447_v15 }
 0x133   :  { %v767_v19 = vmax.f32 %v453_v14, 0.0 }
 0x134   :  { %v766_v20 = vmax.f32 %v448_v16, 0.0  ;;  %v4607_v13 = vpop.f32.mrb[2].mxu0 }
 0x135   :  { %v463_v22 = vadd.f32 %v4607_v13, %v6414_v25  ;;  %v457_v23 = vpop.f32.mrb[3].mxu0 }
 0x136   :  { %v458_v24 = vadd.f32 %v6414_v25, %v457_v23  ;;  %v6420_v27 = vpack.c.bf16 %v767_v19, %v766_v20 }
 0x137   :  { %v769_v28 = vmax.f32 %v463_v22, 0.0 }
 0x138   :  { %8039 = vst [vmem:[#allocation16_spill] sm:$0xff] %v6420_v27  ;;  %v768_v29 = vmax.f32 %v458_v24, 0.0  ;;  %v4610_v30 = vpop.f32.mrb[4].mxu0 }
 0x139   :  { %v473_v31 = vadd.f32 %v4610_v30, %v6414_v25  ;;  %v467_v32 = vpop.f32.mrb[5].mxu0 }
 0x13a   :  { %v6423_v33 = vpack.c.bf16 %v769_v28, %v768_v29  ;;  %v468_v34 = vadd.f32 %v6414_v25, %v467_v32 }
 0x13b   :  { %v771_v35 = vmax.f32 %v473_v31, 0.0 }
 0x13c   :  { %8040 = vst [vmem:[#allocation17_spill] sm:$0xff] %v6423_v33  ;;  %v770_v36 = vmax.f32 %v468_v34, 0.0  ;;  %v4613_v37 = vpop.f32.mrb[6].mxu0 }
 0x13d   :  { %v483_v39 = vadd.f32 %v4613_v37, %v6414_v25  ;;  %v477_v26 = vpop.f32.mrb[7].mxu0 }
 0x13e   :  { %v6427_v40 = vpack.c.bf16 %v771_v35, %v770_v36  ;;  %v478_v43 = vadd.f32 %v6414_v25, %v477_v26 }
 0x13f   :  { %v773_v41 = vmax.f32 %v483_v39, 0.0 }
 0x140   :  { %8041 = vst [vmem:[#allocation18_spill] sm:$0xff] %v6427_v40  ;;  %v772_v42 = vmax.f32 %v478_v43, 0.0  ;;  %v4616_v44 = vpop.f32.mrb[8].mxu0 }
 0x141   :  { %v493_v45 = vadd.f32 %v4616_v44, %v6414_v25  ;;  %v487_v21 = vpop.f32.mrb[9].mxu0 }
 0x142   :  { %v6431_v46 = vpack.c.bf16 %v773_v41, %v772_v42  ;;  %v488_v47 = vadd.f32 %v6414_v25, %v487_v21 }
 0x143   :  { %v775_v4 = vmax.f32 %v493_v45, 0.0 }
 0x144   :  { %8042 = vst [vmem:[#allocation19_spill] sm:$0xff] %v6431_v46  ;;  %v774_v48 = vmax.f32 %v488_v47, 0.0  ;;  %v4619_v49 = vpop.f32.mrb[10].mxu0 }
 0x145   :  { %v503_v38 = vadd.f32 %v4619_v49, %v6414_v25  ;;  %v497_v50 = vpop.f32.mrb[11].mxu0 }
 0x146   :  { %v6435_v51 = vpack.c.bf16 %v775_v4, %v774_v48  ;;  %v498_v52 = vadd.f32 %v6414_v25, %v497_v50 }
 0x147   :  { %v777_v17 = vmax.f32 %v503_v38, 0.0 }
 0x148   :  { %8043 = vst [vmem:[#allocation20_spill] sm:$0xff] %v6435_v51  ;;  %v776_v53 = vmax.f32 %v498_v52, 0.0  ;;  %v4622_v54 = vpop.f32.mrb[12].mxu0 }
 0x149   :  { %v513_v57 = vadd.f32 %v4622_v54, %v6414_v25  ;;  %v507_v55 = vpop.f32.mrb[13].mxu0 }
 0x14a   :  { %v6439_v58 = vpack.c.bf16 %v777_v17, %v776_v53  ;;  %v508_v5 = vadd.f32 %v6414_v25, %v507_v55 }
 0x14b   :  { %v779_v59 = vmax.f32 %v513_v57, 0.0 }
 0x14c   :  { %8044 = vst [vmem:[#allocation21_spill] sm:$0xff] %v6439_v58  ;;  %v778_v60 = vmax.f32 %v508_v5, 0.0  ;;  %v4625_v61 = vpop.f32.mrb[14].mxu0 }
 0x14d   :  { %v523_v2 = vadd.f32 %v4625_v61, %v6414_v25  ;;  %v517_v62 = vpop.f32.mrb[15].mxu0 }
 0x14e   :  { %v6443_v63 = vpack.c.bf16 %v779_v59, %v778_v60  ;;  %v518_v0 = vadd.f32 %v6414_v25, %v517_v62 }
 0x14f   :  { %v781_v1 = vmax.f32 %v523_v2, 0.0 }
 0x150   :  { %8045 = vst [vmem:[#allocation22_spill] sm:$0xff] %v6443_v63  ;;  %v780_v18 = vmax.f32 %v518_v0, 0.0  ;;  %v4628_v3 = vpop.f32.mrb[16].mxu0 }
 0x151   :  { %v533_v6 = vadd.f32 %v4628_v3, %v6414_v25  ;;  %v527_v7 = vpop.f32.mrb[17].mxu0 }
 0x152   :  { %v6447_v8 = vpack.c.bf16 %v781_v1, %v780_v18  ;;  %v528_v10 = vadd.f32 %v6414_v25, %v527_v7 }
 0x153   :  { %v783_v9 = vmax.f32 %v533_v6, 0.0 }
 0x154   :  { %8046 = vst [vmem:[#allocation23_spill] sm:$0xff] %v6447_v8  ;;  %v782_v56 = vmax.f32 %v528_v10, 0.0  ;;  %v4631_v11 = vpop.f32.mrb[18].mxu0 }
 0x155   :  { %v543_v12 = vadd.f32 %v4631_v11, %v6414_v25  ;;  %v537_v14 = vpop.f32.mrb[19].mxu0 }
 0x156   :  { %v538_v15 = vadd.f32 %v6414_v25, %v537_v14  ;;  %v6452_v16 = vpack.c.bf16 %v783_v9, %v782_v56 }
 0x157   :  { %v785_v19 = vmax.f32 %v543_v12, 0.0 }
 0x158   :  { %8047 = vst [vmem:[#allocation24_spill] sm:$0xff] %v6452_v16  ;;  %v784_v20 = vmax.f32 %v538_v15, 0.0  ;;  %v4634_v13 = vpop.f32.mrb[20].mxu0  ;;  %5135 = vmatprep.subr.bf16.mxu1 %v6452_v16 }
 0x159   :  { %v553_v22 = vadd.f32 %v4634_v13, %v6414_v25  ;;  %v547_v23 = vpop.f32.mrb[21].mxu0  ;;  %5137 = vmatpush3.bf16.msra.mxu1 %v6420_v27  ;;  %v834_v13 = vlaneseq }
 0x15a   :  { %v6457_v24 = vpack.c.bf16 %v785_v19, %v784_v20  ;;  %v548_v28 = vadd.f32 %v6414_v25, %v547_v23 }
 0x15b   :  { %v787_v29 = vmax.f32 %v553_v22, 0.0 }
 0x15c   :  { %8048 = vst [vmem:[#allocation25_spill] sm:$0xff] %v6457_v24  ;;  %v786_v30 = vmax.f32 %v548_v28, 0.0  ;;  %v4637_v31 = vpop.f32.mrb[22].mxu0  ;;  %5139 = vmatprep.subr.bf16.mxu1 %v6457_v24 }
 0x15d   :  { %v563_v32 = vadd.f32 %v4637_v31, %v6414_v25  ;;  %v557_v34 = vpop.f32.mrb[23].mxu0  ;;  %5141 = vmatpush3.bf16.msra.mxu1 %v6423_v33  ;;  %v6466_v39 = vpop.permute.xlu0 %1145 }
 0x15e   :  { %v6463_v35 = vpack.c.bf16 %v787_v29, %v786_v30  ;;  %v558_v36 = vadd.f32 %v6414_v25, %v557_v34 }
 0x15f   :  { %v789_v37 = vmax.f32 %v563_v32, 0.0 }
 0x160   :  { %8049 = vst [vmem:[#allocation26_spill] sm:$0xff] %v6463_v35  ;;  %v788_v26 = vmax.f32 %v558_v36, 0.0  ;;  %v4640_v43 = vpop.f32.mrb[24].mxu0  ;;  %5143 = vmatprep.subr.bf16.mxu1 %v6463_v35  ;;  %v6518_v36 = vand.u32 127, %v834_v13 }
 0x161   :  { %v573_v41 = vadd.f32 %v4640_v43, %v6414_v25  ;;  %v567_v42 = vpop.f32.mrb[25].mxu0  ;;  %5145 = vmatpush3.bf16.msra.mxu1 %v6427_v40  ;;  %v6477_v38 = vpop.permute.xlu0 %1369 }
 0x162   :  { %v6471_v44 = vpack.c.bf16 %v789_v37, %v788_v26  ;;  %v568_v45 = vadd.f32 %v6414_v25, %v567_v42 }
 0x163   :  { %v791_v21 = vmax.f32 %v573_v41, 0.0 }
 0x164   :  { %8050 = vst [vmem:[#allocation27_spill] sm:$0xff] %v6471_v44  ;;  %v790_v47 = vmax.f32 %v568_v45, 0.0  ;;  %v4643_v4 = vpop.f32.mrb[26].mxu0  ;;  %5147 = vmatprep.subr.bf16.mxu1 %v6471_v44 }
 0x165   :  { %v583_v48 = vadd.f32 %v4643_v4, %v6414_v25  ;;  %v577_v49 = vpop.f32.mrb[27].mxu0  ;;  %5149 = vmatpush3.bf16.msra.mxu1 %v6431_v46  ;;  %v6482_v53 = vpop.permute.xlu1 %1155 }
 0x166   :  { %v6479_v50 = vpack.c.bf16 %v791_v21, %v790_v47  ;;  %v578_v52 = vadd.f32 %v6414_v25, %v577_v49  ;;  %v6492_v62 = vpop.permute.xlu0 %1150 }
 0x167   :  { %v793_v17 = vmax.f32 %v583_v48, 0.0  ;;  %v6529_v48 = vadd.s32 256, %v6518_v36 }
 0x168   :  { %8051 = vst [vmem:[#allocation28_spill] sm:$0xff] %v6479_v50  ;;  %v792_v54 = vmax.f32 %v578_v52, 0.0  ;;  %v4646_v57 = vpop.f32.mrb[28].mxu0  ;;  %5151 = vmatprep.subr.bf16.mxu1 %v6479_v50 }
 0x169   :  { %v593_v55 = vadd.f32 %v4646_v57, %v6414_v25  ;;  %v587_v5 = vpop.f32.mrb[29].mxu0  ;;  %5153 = vmatpush3.bf16.msra.mxu1 %v6435_v51  ;;  %v6490_v2 = vpop.permute.xlu1 %1374  ;;  %v6532_v57 = vadd.s32 384, %v6518_v36 }
 0x16a   :  { %v6487_v59 = vpack.c.bf16 %v793_v17, %v792_v54  ;;  %v588_v60 = vadd.f32 %v6414_v25, %v587_v5  ;;  %v6505_v15 = vpop.permute.xlu0 %1257 }
 0x16b   :  { %v795_v61 = vmax.f32 %v593_v55, 0.0 }
 0x16c   :  { %8052 = vst [vmem:[#allocation29_spill] sm:$0xff] %v6487_v59  ;;  %v794_v0 = vmax.f32 %v588_v60, 0.0  ;;  %v4649_v1 = vpop.f32.mrb[30].mxu0  ;;  %5155 = vmatprep.subr.bf16.mxu1 %v6487_v59 }
 0x16d   :  { %v603_v18 = vadd.f32 %v4649_v1, %v6414_v25  ;;  %v597_v3 = vpop.f32.mrb[31].mxu0  ;;  %5157 = vmatpush3.bf16.msra.mxu1 %v6439_v58  ;;  %v6500_v9 = vpop.permute.xlu1 %1049 }
 0x16e   :  { %v6497_v6 = vpack.c.bf16 %v795_v61, %v794_v0  ;;  %v598_v7 = vadd.f32 %v6414_v25, %v597_v3  ;;  %v6522_v43 = vpop.permute.xlu0 %1262 }
 0x16f   :  { %v797_v10 = vmax.f32 %v603_v18, 0.0  ;;  %v6545_v18 = vadd.s32 128, %v6518_v36 }
 0x170   :  { %8053 = vst [vmem:[#allocation30_spill] sm:$0xff] %v6497_v6  ;;  %v796_v56 = vmax.f32 %v598_v7, 0.0  ;;  %v4652_v11 = vpop.f32.mrb[32].mxu0  ;;  %5159 = vmatprep.subr.bf16.mxu1 %v6497_v6 }
 0x171   :  { %v613_v12 = vadd.f32 %v4652_v11, %v6414_v25  ;;  %v607_v14 = vpop.f32.mrb[33].mxu0  ;;  %5161 = vmatpush3.bf16.msra.mxu1 %v6443_v63  ;;  %v6510_v23 = vpop.permute.xlu1 %1054 }
 0x172   :  { %v6507_v19 = vpack.c.bf16 %v797_v10, %v796_v56  ;;  %v608_v20 = vadd.f32 %v6414_v25, %v607_v14  ;;  %v8028_v56 = vmov 0.0  }
 0x173   :  { %v799_v22 = vmax.f32 %v613_v12, 0.0  ;;  %v6537_v60 = vpop.permute.xlu0 %1059 }
 0x174   :  { %8054 = vst [vmem:[#allocation31_spill] sm:$0xff] %v6507_v19  ;;  %v798_v28 = vmax.f32 %v608_v20, 0.0  ;;  %v4655_v29 = vpop.f32.mrb[34].mxu0  ;;  %5163 = vmatprep.subr.bf16.mxu1 %v6507_v19 }
 0x175   :  { %v623_v30 = vadd.f32 %v4655_v29, %v6414_v25  ;;  %v617_v31 = vpop.f32.mrb[35].mxu0  ;;  %5165 = vmatpush3.bf16.msra.mxu1 %v6447_v8  ;;  %v6520_v26 = vpop.permute.xlu1 %1196 }
 0x176   :  { %v6515_v32 = vpack.c.bf16 %v799_v22, %v798_v28  ;;  %v618_v34 = vadd.f32 %v6414_v25, %v617_v31  ;;  %vm1207_vm2 = vcmp.eq.s32.totalorder %v6518_v36, %v6520_v26  ;;  %vm1209_vm3 = vcmp.eq.s32.totalorder %v6529_v48, %v6520_v26 }
 0x177   :  { %v801_v37 = vmax.f32 %v623_v30, 0.0  ;;  %vm1210_vm4 = vcmp.eq.s32.totalorder %v6532_v57, %v6520_v26  ;;  %v3974_v11 = vsel %vm1207_vm2, 1.0, %v8028_v56  ;;  %v3976_v14 = vsel %vm1209_vm3, 1.0, %v8028_v56 }
 0x178   :  { %8055 = vst [vmem:[#allocation32_spill] sm:$0xff] %v6515_v32  ;;  %v800_v41 = vmax.f32 %v618_v34, 0.0  ;;  %v4658_v42 = vpop.f32.mrb[36].mxu0  ;;  %v3977_v29 = vsel %vm1210_vm4, 1.0, %v8028_v56  ;;  %v6563_v30 = vmul.f32 %v3974_v11, %v6505_v15  ;;  %v6567_v34 = vpop.permute.xlu0 %988  ;;  %vm1208_vm14 = vcmp.eq.s32.totalorder %v6545_v18, %v6520_v26 }
 0x179   :  { %v633_v45 = vadd.f32 %v4658_v42, %v6414_v25  ;;  %v627_v21 = vpop.f32.mrb[37].mxu0  ;;  %v992_v52 = vpop.permute.xlu1 %991  ;;  %vm999_vm10 = vcmp.eq.s32.totalorder %v6518_v36, %v6567_v34  ;;  %vm1001_vm13 = vcmp.eq.s32.totalorder %v6529_v48, %v6567_v34  ;;  %vm1000_vm4 = vcmp.eq.s32.totalorder %v6545_v18, %v6567_v34 }
 0x17a   :  { %v6525_v47 = vpack.c.bf16 %v801_v37, %v800_v41  ;;  %v628_v4 = vadd.f32 %v6414_v25, %v627_v21  ;;  %vm1003_vm5 = vcmp.eq.s32.totalorder %v6518_v36, %v992_v52  ;;  %vm1004_vm6 = vcmp.eq.s32.totalorder %v6545_v18, %v992_v52 }
 0x17b   :  { %v803_v49 = vmax.f32 %v633_v45, 0.0  ;;  %vm1005_vm7 = vcmp.eq.s32.totalorder %v6529_v48, %v992_v52  ;;  %vm1006_vm8 = vcmp.eq.s32.totalorder %v6532_v57, %v992_v52  ;;  %v1277_v37 = vmul.f32 %v3976_v14, %v6505_v15 }
 0x17c   :  { %8056 = vst [vmem:[#allocation33_spill] sm:$0xff] %v6525_v47  ;;  %v802_v17 = vmax.f32 %v628_v4, 0.0  ;;  %v4661_v54 = vpop.f32.mrb[38].mxu0  ;;  %v3946_v45 = vsel %vm1003_vm5, 1.0, %v8028_v56  ;;  %v3947_v21 = vsel %vm1004_vm6, 1.0, %v8028_v56  ;;  %v3949_v52 = vsel %vm1006_vm8, 1.0, %v8028_v56 }
 0x17d   :  { %v643_v55 = vadd.f32 %v4661_v54, %v6414_v25  ;;  %v637_v5 = vpop.f32.mrb[39].mxu0  ;;  %v6547_v3 = vpop.permute.xlu1 %1199  ;;  %v6578_v54 = vmul.f32 %v3977_v29, %v6505_v15  ;;  %vm1002_vm8 = vcmp.eq.s32.totalorder %v6532_v57, %v6567_v34 }
 0x17e   :  { %v6539_v61 = vpack.c.bf16 %v803_v49, %v802_v17  ;;  %v638_v0 = vadd.f32 %v6414_v25, %v637_v5  ;;  %v3948_v49 = vsel %vm1005_vm7, 1.0, %v8028_v56  ;;  %vm1211_vm11 = vcmp.eq.s32.totalorder %v6518_v36, %v6547_v3 }
 0x17f   :  { %v805_v1 = vmax.f32 %v643_v55, 0.0  ;;  %v6593_v11 = vmul.f32 %v3948_v49, %v6510_v23  ;;  %vm1212_vm12 = vcmp.eq.s32.totalorder %v6545_v18, %v6547_v3  ;;  %vm1213_vm0 = vcmp.eq.s32.totalorder %v6529_v48, %v6547_v3 }
 0x180   :  { %8057 = vst [vmem:[#allocation34_spill] sm:$0xff] %v6539_v61  ;;  %v804_v7 = vmax.f32 %v638_v0, 0.0  ;;  %v4664_v10 = vpop.f32.mrb[40].mxu0  ;;  %vm1214_vm1 = vcmp.eq.s32.totalorder %v6532_v57, %v6547_v3 }
 0x181   :  { %v653_v12 = vadd.f32 %v4664_v10, %v6414_v25  ;;  %v647_v20 = vpop.f32.mrb[41].mxu0  ;;  %v6565_v31 = vpop.permute.xlu1 %1084 }
 0x182   :  { %v6556_v13 = vpack.c.bf16 %v805_v1, %v804_v7  ;;  %v648_v22 = vadd.f32 %v6414_v25, %v647_v20  ;;  %vm1097_vm9 = vcmp.eq.s32.totalorder %v6529_v48, %v6565_v31  ;;  %v6586_v1 = vmul.f32 %v3946_v45, %v6510_v23 }
 0x183   :  { %v807_v28 = vmax.f32 %v653_v12, 0.0  ;;  %v6589_v7 = vmul.f32 %v3947_v21, %v6510_v23  ;;  %v3960_v10 = vsel %vm1097_vm9, 1.0, %v8028_v56  ;;  %v6596_v12 = vmul.f32 %v3949_v52, %v6510_v23  ;;  %v6616_v21 = vpop.permute.xlu0 %1267 }
 0x184   :  { %8058 = vst [vmem:[#allocation35_spill] sm:$0xff] %v6556_v13  ;;  %v806_v41 = vmax.f32 %v648_v22, 0.0  ;;  %v4667_v42 = vpop.f32.mrb[42].mxu0  ;;  %v1165_v29 = vmul.f32 %v3960_v10, %v6466_v39  ;;  %vm1095_vm15 = vcmp.eq.s32.totalorder %v6518_v36, %v6565_v31  ;;  %v3944_v45 = vsel %vm1001_vm13, 1.0, %v8028_v56 }
 0x185   :  { %v663_v4 = vadd.f32 %v4667_v42, %v6414_v25  ;;  %v657_v17 = vpop.f32.mrb[43].mxu0  ;;  %v1069_v49 = vmul.f32 %v3944_v45, %v6500_v9  ;;  %v3978_v52 = vsel %vm1211_vm11, 1.0, %v8028_v56  ;;  %vm1096_vm3 = vcmp.eq.s32.totalorder %v6545_v18, %v6565_v31 }
 0x186   :  { %v6580_v55 = vpack.c.bf16 %v807_v28, %v806_v41  ;;  %v658_v5 = vadd.f32 %v6414_v25, %v657_v17  ;;  %v6606_v41 = vpop.permute.xlu1 %1308  ;;  %v6631_v17 = vsel %vm1212_vm12, 1.0, %v8028_v56  ;;  %vm1098_vm5 = vcmp.eq.s32.totalorder %v6532_v57, %v6565_v31 }
 0x187   :  { %v809_v0 = vmax.f32 %v663_v4, 0.0  ;;  %vm1321_vm2 = vcmp.eq.s32.totalorder %v6529_v48, %v6606_v41  ;;  %v3959_v63 = vsel %vm1096_vm3, 1.0, %v8028_v56  ;;  %vm1319_vm6 = vcmp.eq.s32.totalorder %v6518_v36, %v6606_v41 }
 0x188   :  { %8059 = vst [vmem:[#allocation36_spill] sm:$0xff] %v6580_v55  ;;  %v808_v14 = vmax.f32 %v658_v5, 0.0  ;;  %v4670_v20 = vpop.f32.mrb[44].mxu0  ;;  %v3992_v45 = vsel %vm1321_vm2, 1.0, %v8028_v56  ;;  %v3990_v50 = vsel %vm1319_vm6, 1.0, %v8028_v56  ;;  %v3975_v31 = vsel %vm1208_vm14, 1.0, %v8028_v56 }
 0x189   :  { %v673_v22 = vadd.f32 %v4670_v20, %v6414_v25  ;;  %v667_v28 = vpop.f32.mrb[45].mxu0  ;;  %v1181_v20 = vadd.f32 %v1165_v29, %v1069_v49  ;;  %v1389_v19 = vmul.f32 %v3992_v45, %v6477_v38  ;;  %v3981_v45 = vsel %vm1214_vm1, 1.0, %v8028_v56 }
 0x18a   :  { %v6610_v23 = vpack.c.bf16 %v809_v0, %v808_v14  ;;  %v668_v42 = vadd.f32 %v6414_v25, %v667_v28  ;;  %v3958_v14 = vsel %vm1095_vm15, 1.0, %v8028_v56  ;;  %vm1320_vm7 = vcmp.eq.s32.totalorder %v6545_v18, %v6606_v41 }
 0x18b   :  { %v811_v4 = vmax.f32 %v673_v22, 0.0  ;;  %v1163_v29 = vmul.f32 %v3958_v14, %v6466_v39  ;;  %v6662_v14 = vpop.permute.xlu1 %1160  ;;  %v3991_v40 = vsel %vm1320_vm7, 1.0, %v8028_v56  ;;  %v1387_v26 = vmul.f32 %v3990_v50, %v6477_v38 }
 0x18c   :  { %8060 = vst [vmem:[#allocation37_spill] sm:$0xff] %v6610_v23  ;;  %v810_v5 = vmax.f32 %v668_v42, 0.0  ;;  %v4673_v0 = vpop.f32.mrb[46].mxu0 }
 0x18d   :  { %v683_v10 = vadd.f32 %v4673_v0, %v6414_v25  ;;  %v677_v22 = vpop.f32.mrb[47].mxu0  ;;  %v1293_v0 = vadd.f32 %v1277_v37, %v1181_v20 }
 0x18e   :  { %v6639_v28 = vpack.c.bf16 %v811_v4, %v810_v5  ;;  %v678_v42 = vadd.f32 %v6414_v25, %v677_v22  ;;  %v3942_v4 = vsel %vm999_vm10, 1.0, %v8028_v56  ;;  %v6654_v22 = vpop.permute.xlu0 %994  ;;  %vm1322_vm10 = vcmp.eq.s32.totalorder %v6532_v57, %v6606_v41 }
 0x18f   :  { %v813_v8 = vmax.f32 %v683_v10, 0.0  ;;  %v3943_v10 = vsel %vm1000_vm4, 1.0, %v8028_v56  ;;  %v6660_v37 = vadd.f32 %v1389_v19, %v1293_v0  ;;  %v6676_v19 = vmul.f32 %v3978_v52, %v6522_v43  ;;  %v6702_v33 = vpop.permute.xlu1 %1379 }
 0x190   :  { %v812_v49 = vmax.f32 %v678_v42, 0.0  ;;  %v4676_v5 = vpop.f32.mrb[48].mxu0  ;;  %v3980_v42 = vsel %vm1213_vm0, 1.0, %v8028_v56  ;;  %v3961_v0 = vsel %vm1098_vm5, 1.0, %v8028_v56  ;;  %v1067_v59 = vmul.f32 %v3942_v4, %v6500_v9 }
 0x191   :  { %v693_v6 = vadd.f32 %v4676_v5, %v6414_v25  ;;  %v687_v20 = vpop.f32.mrb[49].mxu0  ;;  %v6714_v50 = vmul.f32 %v3980_v42, %v6522_v43  ;;  %vm1007_vm9 = vcmp.eq.s32.totalorder %v6518_v36, %v6654_v22  ;;  %v6727_v42 = vmul.f32 %v3961_v0, %v6466_v39 }
 0x192   :  { %v6672_v58 = vpack.c.bf16 %v813_v8, %v812_v49  ;;  %v688_v5 = vadd.f32 %v6414_v25, %v687_v20  ;;  %v1068_v8 = vmul.f32 %v3943_v10, %v6500_v9  ;;  %v1164_v49 = vmul.f32 %v3959_v63, %v6466_v39  ;;  %v6697_v63 = vpop.permute.xlu0 %1202 }
 0x193   :  { %v815_v51 = vmax.f32 %v693_v6, 0.0  ;;  %v1179_v6 = vadd.f32 %v1163_v29, %v1067_v59  ;;  %v1276_v10 = vmul.f32 %v3975_v31, %v6505_v15  ;;  %v1388_v29 = vmul.f32 %v3991_v40, %v6477_v38  ;;  %8062 = vst [vmem:[#allocation39_spill] sm:$0xff] %v6714_v50 }
 0x194   :  { %v814_v46 = vmax.f32 %v688_v5, 0.0  ;;  %v4679_v3 = vpop.f32.mrb[50].mxu0  ;;  %v1180_v44 = vadd.f32 %v1164_v49, %v1068_v8  ;;  %v6711_v15 = vmul.f32 %v6631_v17, %v6522_v43  ;;  %v6724_v17 = vmul.f32 %v3981_v45, %v6522_v43 }
 0x195   :  { %v703_v20 = vadd.f32 %v4679_v3, %v6414_v25  ;;  %v697_v52 = vpop.f32.mrb[51].mxu0  ;;  %v1291_v35 = vadd.f32 %v6563_v30, %v1179_v6  ;;  %vm1008_vm11 = vcmp.eq.s32.totalorder %v6545_v18, %v6654_v22  ;;  %vm1009_vm12 = vcmp.eq.s32.totalorder %v6529_v48, %v6654_v22  ;;  %v6752_v6 = vpop.permute.xlu1 %1090 }
 0x196   :  { %v6693_v4 = vpack.c.bf16 %v815_v51, %v814_v46  ;;  %v698_v5 = vadd.f32 %v6414_v25, %v697_v52  ;;  %v1292_v59 = vadd.f32 %v1276_v10, %v1180_v44  ;;  %v6740_v39 = vpop.permute.xlu0 %997  ;;  %vm1010_vm13 = vcmp.eq.s32.totalorder %v6532_v57, %v6654_v22 }
 0x197   :  { %v817_v3 = vmax.f32 %v703_v20, 0.0  ;;  %v1403_v49 = vadd.f32 %v1387_v26, %v1291_v35  ;;  %v3945_v35 = vsel %vm1002_vm8, 1.0, %v8028_v56  ;;  %v3950_v34 = vsel %vm1007_vm9, 1.0, %v8028_v56 }
 0x198   :  { %8061 = vst [vmem:[#allocation38_spill] sm:$0xff] %v6693_v4  ;;  %v816_v46 = vmax.f32 %v698_v5, 0.0  ;;  %v4682_v51 = vpop.f32.mrb[52].mxu0  ;;  %5167 = vmatprep.subr.bf16.mxu0 %v6693_v4  ;;  %5614 = vmatprep.subr.bf16.mxu1 %v6693_v4  ;;  %v1404_v40 = vadd.f32 %v1388_v29, %v1292_v59  ;;  %vm1215_vm14 = vcmp.eq.s32.totalorder %v6518_v36, %v6697_v63  ;;  %v3952_v26 = vsel %vm1009_vm12, 1.0, %v8028_v56 }
 0x199   :  { %v713_v30 = vadd.f32 %v4682_v51, %v6414_v25  ;;  %v707_v8 = vpop.f32.mrb[53].mxu0  ;;  %5169 = vmatpush3.bf16.msra.mxu0 %v6515_v32  ;;  %vm1216_vm15 = vcmp.eq.s32.totalorder %v6545_v18, %v6697_v63  ;;  %vm1217_vm0 = vcmp.eq.s32.totalorder %v6529_v48, %v6697_v63  ;;  %vm1218_vm1 = vcmp.eq.s32.totalorder %v6532_v57, %v6697_v63 }
 0x19a   :  { %v6718_v44 = vpack.c.bf16 %v817_v3, %v816_v46  ;;  %v708_v20 = vadd.f32 %v6414_v25, %v707_v8  ;;  %1483 = vmatprep.mubr.f32.mxu1 %v1404_v40  ;;  %v3951_v3 = vsel %vm1008_vm11, 1.0, %v8028_v56  ;;  %v6774_v51 = vmul.f32 %v3945_v35, %v6500_v9 }
 0x19b   :  { %v819_v52 = vmax.f32 %v713_v30, 0.0  ;;  %1484 = vmatmul.mubr.f32.vlgmr.msra.gmra.mrb[0].mxu1 %v1403_v49  ;;  %v6780_v59 = vsel %vm1322_vm10, 1.0, %v8028_v56  ;;  %v3953_v29 = vsel %vm1010_vm13, 1.0, %v8028_v56  ;;  %v6788_v49 = vmul.f32 %v3950_v34, %v6537_v60 }
 0x19c   :  { %8063 = vst [vmem:[#allocation40_spill] sm:$0xff] %v6718_v44  ;;  %v818_v43 = vmax.f32 %v708_v20, 0.0  ;;  %v4685_v45 = vpop.f32.mrb[54].mxu0  ;;  %5171 = vmatprep.subr.bf16.mxu0 %v6718_v44  ;;  %5622 = vmatpush3.bf16.msra.mxu1 %v6515_v32  ;;  %v3982_v9 = vsel %vm1215_vm14, 1.0, %v8028_v56  ;;  %v3983_v41 = vsel %vm1216_vm15, 1.0, %v8028_v56  ;;  %v3984_v22 = vsel %vm1217_vm0, 1.0, %v8028_v56 }
 0x19d   :  { %v723_v0 = vadd.f32 %v4685_v45, %v6414_v25  ;;  %v717_v31 = vpop.f32.mrb[55].mxu0  ;;  %5173 = vmatpush3.bf16.msra.mxu0 %v6525_v47  ;;  %5615 = vmatprep.subr.bf16.mxu1 %v6718_v44  ;;  %v6804_v20 = vmul.f32 %v3951_v3, %v6537_v60  ;;  %v6807_v35 = vmul.f32 %v3952_v26, %v6537_v60  ;;  %v1088_v45 = vpop.permute.xlu0 %1087 }
 0x19e   :  { %v6754_v5 = vpack.c.bf16 %v819_v52, %v818_v43  ;;  %v718_v10 = vadd.f32 %v6414_v25, %v717_v31  ;;  %v3985_v52 = vsel %vm1218_vm1, 1.0, %v8028_v56  ;;  %vm1103_vm2 = vcmp.eq.s32.totalorder %v6518_v36, %v6752_v6  ;;  %v6823_v31 = vpop.permute.xlu1 %1311 }
 0x19f   :  { %v821_v46 = vmax.f32 %v723_v0, 0.0  ;;  %vm1105_vm3 = vcmp.eq.s32.totalorder %v6529_v48, %v6752_v6  ;;  %v6826_v63 = vmul.f32 %v3953_v29, %v6537_v60  ;;  %v6832_v3 = vmul.f32 %v3983_v41, %v6616_v21 }
 0x1a0   :  { %8064 = vst [vmem:[#allocation41_spill] sm:$0xff] %v6754_v5  ;;  %v820_v30 = vmax.f32 %v718_v10, 0.0  ;;  %v4688_v8 = vpop.f32.mrb[56].mxu0  ;;  %5175 = vmatprep.subr.bf16.mxu0 %v6754_v5  ;;  %5623 = vmatpush3.bf16.msra.mxu1 %v6525_v47  ;;  %v6829_v10 = vmul.f32 %v3982_v9, %v6616_v21  ;;  %v6835_v26 = vmul.f32 %v3984_v22, %v6616_v21  ;;  %v3968_v9 = vsel %vm1105_vm3, 1.0, %v8028_v56 }
 0x1a1   :  { %v727_v40 = vpop.f32.mrb[57].mxu0  ;;  %5177 = vmatpush3.bf16.msra.mxu0 %v6539_v61  ;;  %v733_v34 = vadd.f32 %v4688_v8, %v6414_v25  ;;  %5616 = vmatprep.subr.bf16.mxu1 %v6754_v5  ;;  %vm1104_vm4 = vcmp.eq.s32.totalorder %v6545_v18, %v6752_v6  ;;  %vm1011_vm5 = vcmp.eq.s32.totalorder %v6518_v36, %v6740_v39 }
 0x1a2   :  { %v6813_v43 = vpack.c.bf16 %v821_v46, %v820_v30  ;;  %v728_v0 = vadd.f32 %v6414_v25, %v727_v40  ;;  %8066 = vst [vmem:[#allocation43_spill] sm:$0xff] %v6835_v26  ;;  %v6839_v30 = vmul.f32 %v3985_v52, %v6616_v21  ;;  %vm1012_vm6 = vcmp.eq.s32.totalorder %v6545_v18, %v6740_v39  ;;  %v6874_v40 = vpop.permute.xlu0 %1064  ;;  %v1094_v24 = vpop.permute.xlu1 %1093 }
 0x1a3   :  { %v823_v60 = vmax.f32 %v733_v34, 0.0  ;;  %vm1106_vm7 = vcmp.eq.s32.totalorder %v6532_v57, %v6752_v6  ;;  %v3966_v21 = vsel %vm1103_vm2, 1.0, %v8028_v56  ;;  %vm1099_vm8 = vcmp.eq.s32.totalorder %v6518_v36, %v1088_v45 }
 0x1a4   :  { %8065 = vst [vmem:[#allocation42_spill] sm:$0xff] %v6813_v43  ;;  %v4691_v46 = vpop.f32.mrb[58].mxu0  ;;  %5179 = vmatprep.subr.bf16.mxu0 %v6813_v43  ;;  %v822_v29 = vmax.f32 %v728_v0, 0.0  ;;  %5624 = vmatpush3.bf16.msra.mxu1 %v6539_v61  ;;  %vm1100_vm9 = vcmp.eq.s32.totalorder %v6545_v18, %v1088_v45  ;;  %vm1101_vm10 = vcmp.eq.s32.totalorder %v6529_v48, %v1088_v45  ;;  %v3967_v22 = vsel %vm1104_vm4, 1.0, %v8028_v56 }
 0x1a5   :  { %v737_v8 = vpop.f32.mrb[59].mxu0  ;;  %5181 = vmatpush3.bf16.msra.mxu0 %v6556_v13  ;;  %5617 = vmatprep.subr.bf16.mxu1 %v6813_v43  ;;  %vm1013_vm11 = vcmp.eq.s32.totalorder %v6529_v48, %v6740_v39  ;;  %vm1014_vm12 = vcmp.eq.s32.totalorder %v6532_v57, %v6740_v39  ;;  %vm1102_vm13 = vcmp.eq.s32.totalorder %v6532_v57, %v1088_v45  ;;  %v3969_v34 = vsel %vm1106_vm7, 1.0, %v8028_v56 }
 0x1a6   :  { %v6859_v41 = vpack.c.bf16 %v823_v60, %v822_v29  ;;  %v6878_v0 = vmul.f32 %v3966_v21, %v6482_v53  ;;  %v1173_v60 = vmul.f32 %v3968_v9, %v6482_v53  ;;  %v743_v29 = vadd.f32 %v4691_v46, %v6414_v25 }
 0x1a7   :  { %v3962_v6 = vsel %vm1099_vm8, 1.0, %v8028_v56  ;;  %v3963_v43 = vsel %vm1100_vm9, 1.0, %v8028_v56  ;;  %v3964_v21 = vsel %vm1101_vm10, 1.0, %v8028_v56  ;;  %v738_v9 = vadd.f32 %v6414_v25, %v737_v8 }
 0x1a8   :  { %8067 = vst [vmem:[#allocation44_spill] sm:$0xff] %v6859_v41  ;;  %v4694_v52 = vpop.f32.mrb[60].mxu0  ;;  %5183 = vmatprep.subr.bf16.mxu0 %v6859_v41  ;;  %5625 = vmatpush3.bf16.msra.mxu1 %v6556_v13  ;;  %v6896_v46 = vmul.f32 %v3967_v22, %v6482_v53  ;;  %v3965_v61 = vsel %vm1102_vm13, 1.0, %v8028_v56  ;;  %vm1323_vm14 = vcmp.eq.s32.totalorder %v6518_v36, %v6823_v31  ;;  %v825_v5 = vmax.f32 %v743_v29, 0.0 }
 0x1a9   :  { %v747_v27 = vpop.f32.mrb[61].mxu0  ;;  %5185 = vmatpush3.bf16.msra.mxu0 %v6580_v55  ;;  %5618 = vmatprep.subr.bf16.mxu1 %v6859_v41  ;;  %v6905_v47 = vmul.f32 %v3969_v34, %v6482_v53  ;;  %vm1324_vm15 = vcmp.eq.s32.totalorder %v6545_v18, %v6823_v31  ;;  %vm1325_vm0 = vcmp.eq.s32.totalorder %v6529_v48, %v6823_v31  ;;  %v824_v8 = vmax.f32 %v738_v9, 0.0 }
 0x1aa   :  { %v6912_v45 = vadd.f32 %v1173_v60, %v6807_v35  ;;  %v6915_v56 = vmul.f32 %v3962_v6, %v6492_v62  ;;  %v1168_v29 = vmul.f32 %v3963_v43, %v6492_v62  ;;  %v6919_v41 = vmul.f32 %v3964_v21, %v6492_v62 }
 0x1ab   :  { %v6922_v34 = vmul.f32 %v3965_v61, %v6492_v62  ;;  %vm1326_vm1 = vcmp.eq.s32.totalorder %v6532_v57, %v6823_v31  ;;  %v8069_v9 = vmov 0.0   ;;  %v6929_v35 = vpack.c.bf16 %v825_v5, %v824_v8  ;;  %v6938_v62 = vpop.permute.xlu0 %1205  ;;  %v6940_v61 = vpop.permute.xlu1 %1314 }
 0x1ac   :  { %v4697_v22 = vpop.f32.mrb[62].mxu0  ;;  %8068 = vst [vmem:[#allocation45_spill] sm:$0xff] %v6912_v45  ;;  %v6927_v13 = vsel %vm1323_vm14, 1.0, %v8069_v9  ;;  %5626 = vmatpush3.bf16.msra.mxu1 %v6580_v55  ;;  %v3995_v60 = vsel %vm1324_vm15, 1.0, %v8069_v9  ;;  %v6934_v43 = vsel %vm1325_vm0, 1.0, %v8069_v9  ;;  %vm1107_vm2 = vcmp.eq.s32.totalorder %v6518_v36, %v1094_v24 }
 0x1ad   :  { %v757_v53 = vpop.f32.mrb[63].mxu0  ;;  %8070 = vst [vmem:[#allocation46_spill] sm:$0xff] %v6929_v35  ;;  %vm1108_vm3 = vcmp.eq.s32.totalorder %v6545_v18, %v1094_v24  ;;  %vm1109_vm4 = vcmp.eq.s32.totalorder %v6529_v48, %v1094_v24  ;;  %vm1110_vm7 = vcmp.eq.s32.totalorder %v6532_v57, %v1094_v24  ;;  %v753_v5 = vadd.f32 %v4694_v52, %v6414_v25 }
 0x1ae   :  { %v748_v31 = vadd.f32 %v6414_v25, %v747_v27  ;;  %5187 = vmatprep.subr.bf16.mxu0 %v6929_v35  ;;  %v6948_v6 = vsel %vm1326_vm1, 1.0, %v8069_v9  ;;  %v3954_v21 = vsel %vm1011_vm5, 1.0, %v8069_v9  ;;  %v3955_v8 = vsel %vm1012_vm6, 1.0, %v8069_v9  ;;  %5619 = vmatprep.subr.bf16.mxu1 %v6929_v35 }
 0x1af   :  { %v6962_v27 = vsel %vm1013_vm11, 1.0, %v8069_v9  ;;  %v3970_v52 = vsel %vm1107_vm2, 1.0, %v8069_v9  ;;  %v3971_v55 = vsel %vm1108_vm3, 1.0, %v8069_v9  ;;  %v827_v44 = vmax.f32 %v753_v5, 0.0  ;;  %5189 = vmatpush3.bf16.msra.mxu0 %v6610_v23  ;;  %v6994_v24 = vpop.permute.xlu0 %1272  ;;  %v6996_v50 = vpop.permute.xlu1 %1317 }
 0x1b0   :  { %8071 = vst [vmem:[#allocation47_spill] sm:$0xff] %v6962_v27  ;;  %v826_v32 = vmax.f32 %v748_v31, 0.0  ;;  %5627 = vmatpush3.bf16.msra.mxu1 %v6610_v23  ;;  %v3957_v4 = vsel %vm1014_vm12, 1.0, %v8069_v9  ;;  %v6974_v16 = vmul.f32 %v3954_v21, %v6874_v40  ;;  %v3972_v35 = vsel %vm1109_vm4, 1.0, %v8069_v9 }
 0x1b1   :  { %v3973_v5 = vsel %vm1110_vm7, 1.0, %v8069_v9  ;;  %v1080_v31 = vmul.f32 %v3955_v8, %v6874_v40  ;;  %v6984_v23 = vmul.f32 %v3957_v4, %v6874_v40  ;;  %v763_v39 = vadd.f32 %v4697_v22, %v6414_v25 }
 0x1b2   :  { %v6986_v26 = vpack.c.bf16 %v827_v44, %v826_v32  ;;  %v1175_v21 = vmul.f32 %v3970_v52, %v6662_v14  ;;  %v1176_v45 = vmul.f32 %v3971_v55, %v6662_v14  ;;  %vm1327_vm5 = vcmp.eq.s32.totalorder %v6518_v36, %v6940_v61 }
 0x1b3   :  { %v758_v27 = vadd.f32 %v6414_v25, %v757_v53  ;;  %v6999_v4 = vmul.f32 %v3972_v35, %v6662_v14  ;;  %v7002_v32 = vmul.f32 %v3973_v5, %v6662_v14  ;;  %vm1328_vm6 = vcmp.eq.s32.totalorder %v6545_v18, %v6940_v61 }
 0x1b4   :  { %v829_v44 = vmax.f32 %v763_v39, 0.0  ;;  %5191 = vmatprep.subr.bf16.mxu0 %v6986_v26  ;;  %5620 = vmatprep.subr.bf16.mxu1 %v6986_v26  ;;  %vm1219_vm8 = vcmp.eq.s32.totalorder %v6518_v36, %v6938_v62  ;;  %vm1220_vm9 = vcmp.eq.s32.totalorder %v6545_v18, %v6938_v62  ;;  %vm1330_vm10 = vcmp.eq.s32.totalorder %v6532_v57, %v6940_v61 }
 0x1b5   :  { %v828_v25 = vmax.f32 %v758_v27, 0.0  ;;  %5193 = vmatpush3.bf16.msra.mxu0 %v6639_v28  ;;  %5628 = vmatpush3.bf16.msra.mxu1 %v6639_v28  ;;  %vm1329_vm11 = vcmp.eq.s32.totalorder %v6529_v48, %v6940_v61  ;;  %v3998_v55 = vsel %vm1327_vm5, 1.0, %v8069_v9  ;;  %v1184_v14 = vadd.f32 %v1168_v29, %v6589_v7 }
 0x1b6   :  { %v1392_v22 = vmul.f32 %v3995_v60, %v6490_v2  ;;  %vm1332_vm12 = vcmp.eq.s32.totalorder %v6545_v18, %v6996_v50  ;;  %v3999_v53 = vsel %vm1328_vm6, 1.0, %v8069_v9  ;;  %vm1331_vm13 = vcmp.eq.s32.totalorder %v6518_v36, %v6996_v50 }
 0x1b7   :  { %v7027_v35 = vpack.c.bf16 %v829_v44, %v828_v25  ;;  %v1183_v8 = vadd.f32 %v6915_v56, %v6586_v1  ;;  %vm1222_vm14 = vcmp.eq.s32.totalorder %v6532_v57, %v6938_v62  ;;  %v3986_v7 = vsel %vm1219_vm8, 1.0, %v8069_v9 }
 0x1b8   :  { %v1296_v29 = vadd.f32 %v6711_v15, %v1184_v14  ;;  %v1391_v60 = vmul.f32 %v6927_v13, %v6490_v2  ;;  %v4003_v27 = vsel %vm1332_vm12, 1.0, %v8069_v9  ;;  %v4001_v56 = vsel %vm1330_vm10, 1.0, %v8069_v9  ;;  %v7053_v15 = vpop.permute.xlu0 %1384 }
 0x1b9   :  { %v3987_v1 = vsel %vm1220_vm9, 1.0, %v8069_v9  ;;  %v1287_v52 = vmul.f32 %v3986_v7, %v6994_v24  ;;  %v1295_v5 = vadd.f32 %v6676_v19, %v1183_v8  ;;  %5195 = vmatprep.subr.bf16.mxu0 %v7027_v35  ;;  %5621 = vmatprep.subr.bf16.mxu1 %v7027_v35  ;;  %v4002_v44 = vsel %vm1331_vm13, 1.0, %v8069_v9 }
 0x1ba   :  { %v1288_v13 = vmul.f32 %v3987_v1, %v6994_v24  ;;  %v1408_v39 = vadd.f32 %v1392_v22, %v1296_v29  ;;  %v1400_v25 = vmul.f32 %v4003_v27, %v7053_v15  ;;  %5197 = vmatpush3.bf16.msra.mxu0 %v6672_v58  ;;  %v1188_v19 = vadd.f32 %v6896_v46, %v6804_v20 }
 0x1bb   :  { %v1407_v14 = vadd.f32 %v1391_v60, %v1295_v5  ;;  %v1396_v8 = vmul.f32 %v3999_v53, %v6702_v33  ;;  %v1187_v7 = vadd.f32 %v6878_v0, %v6788_v49  ;;  %5629 = vmatpush3.bf16.msra.mxu1 %v6672_v58  ;;  %v1395_v22 = vmul.f32 %v3998_v55, %v6702_v33 }
 0x1bc   :  { %1488 = vmatprep.mubr.f32.mxu1 %v1408_v39  ;;  %v1192_v29 = vadd.f32 %v1176_v45, %v1080_v31  ;;  %v1182_v27 = vadd.f32 %v6727_v42, %v6774_v51  ;;  %v1390_v60 = vmul.f32 %v6780_v59, %v6477_v38  ;;  %v1300_v20 = vadd.f32 %v6832_v3, %v1188_v19 }
 0x1bd   :  { %1489 = vmatmul.mubr.f32.gmra.mrb[2].mxu1 %v1407_v14  ;;  %v1299_v46 = vadd.f32 %v6829_v10, %v1187_v7  ;;  %v1191_v53 = vadd.f32 %v1175_v21, %v6974_v16  ;;  %v1186_v49 = vadd.f32 %v6922_v34, %v6596_v12  ;;  %v1399_v0 = vmul.f32 %v4002_v44, %v7053_v15  ;;  %v8073_v21 = vld [vmem:[#allocation47_spill] sm:$0xff] }
 0x1be   :  { %v1304_v55 = vadd.f32 %v1288_v13, %v1192_v29  ;;  %v1294_v45 = vadd.f32 %v6578_v54, %v1182_v27  ;;  %v1394_v42 = vmul.f32 %v6948_v6, %v6490_v2  ;;  %vm1334_vm15 = vcmp.eq.s32.totalorder %v6532_v57, %v6996_v50  ;;  %v8075_v13 = vld [vmem:[#allocation43_spill] sm:$0xff] }
 0x1bf   :  { %v1412_v38 = vadd.f32 %v1396_v8, %v1300_v20  ;;  %v1411_v51 = vadd.f32 %v1395_v22, %v1299_v46  ;;  %v1190_v59 = vadd.f32 %v6905_v47, %v6826_v63  ;;  %v1303_v3 = vadd.f32 %v1287_v52, %v1191_v53 }
 0x1c0   :  { %v1416_v16 = vadd.f32 %v1400_v25, %v1304_v55  ;;  %v1406_v10 = vadd.f32 %v1390_v60, %v1294_v45  ;;  %v1298_v12 = vadd.f32 %v6724_v17, %v1186_v49  ;;  %v4000_v54 = vsel %vm1329_vm11, 1.0, %v8069_v9 }
 0x1c1   :  { %1493 = vmatprep.mubr.f32.mxu1 %v1412_v38  ;;  %v1398_v34 = vmul.f32 %v4001_v56, %v6702_v33  ;;  %v1185_v6 = vadd.f32 %v6919_v41, %v6593_v11  ;;  %v1393_v31 = vmul.f32 %v6934_v43, %v6490_v2  ;;  %vm1333_vm0 = vcmp.eq.s32.totalorder %v6529_v48, %v6996_v50  ;;  %v8072_v2 = vld [vmem:[#allocation39_spill] sm:$0xff] }
 0x1c2   :  { %v4005_v47 = vsel %vm1334_vm15, 1.0, %v8069_v9  ;;  %1494 = vmatmul.mubr.f32.gmra.mrb[4].mxu1 %v1411_v51  ;;  %1568 = vmatprep.mubr.f32.mxu0 %v1406_v10  ;;  %v1415_v17 = vadd.f32 %v1399_v0, %v1303_v3  ;;  %v1410_v63 = vadd.f32 %v1394_v42, %v1298_v12  ;;  %v3989_v61 = vsel %vm1222_vm14, 1.0, %v8069_v9 }
 0x1c3   :  { %1498 = vmatprep.mubr.f32.mxu1 %v1416_v16  ;;  %1569 = vmatmul.mubr.f32.vlgmr.msra.gmra.mrb[64].mxu0 %v6660_v37  ;;  %v1302_v11 = vadd.f32 %v6839_v30, %v1190_v59  ;;  %v1297_v41 = vadd.f32 %v8072_v2, %v1185_v6  ;;  %v1194_v43 = vadd.f32 %v7002_v32, %v6984_v23  ;;  %v4004_v37 = vsel %vm1333_vm0, 1.0, %v8069_v9  ;;  %v8074_v32 = vld [vmem:[#allocation45_spill] sm:$0xff] }
 0x1c4   :  { %v1081_v56 = vmul.f32 %v8073_v21, %v6874_v40  ;;  %vm1221_vm1 = vcmp.eq.s32.totalorder %v6529_v48, %v6938_v62  ;;  %v1397_v1 = vmul.f32 %v4000_v54, %v6702_v33  ;;  %v1290_v52 = vmul.f32 %v3989_v61, %v6994_v24  ;;  %1573 = vmatprep.mubr.f32.mxu0 %v1410_v63  ;;  %v1703_v63 = vld [vmem:[%s8001_s7] sm:$0xff]  ;;  %v1704_v61 = vld [vmem:[%s8001_s7 + $0x8] sm:$0xff]  ;;  %v1706_v21 = vld [vmem:[%s8001_s7 + $0x18] sm:$0xff] }
 0x1c5   :  { %v1402_v30 = vmul.f32 %v4005_v47, %v7053_v15  ;;  %v1414_v5 = vadd.f32 %v1398_v34, %v1302_v11  ;;  %v1409_v23 = vadd.f32 %v1393_v31, %v1297_v41  ;;  %v1301_v40 = vadd.f32 %v8075_v13, %v8074_v32  ;;  %v1709_v32 = vld [vmem:[%s8001_s7 + $0x30] sm:$0xff]  ;;  %v1710_v13 = vld [vmem:[%s8001_s7 + $0x38] sm:$0xff] }
 0x1c6   :  { %1499 = vmatmul.mubr.f32.gmra.mrb[6].mxu1 %v1415_v17  ;;  %v1193_v62 = vadd.f32 %v6999_v4, %v1081_v56  ;;  %v3988_v33 = vsel %vm1221_vm1, 1.0, %v8069_v9  ;;  %v1306_v39 = vadd.f32 %v1290_v52, %v1194_v43  ;;  %v1401_v50 = vmul.f32 %v4004_v37, %v7053_v15  ;;  %v843_v4 = vld [vmem:[%s7998_s4] sm:$0xff]  ;;  %v1705_v43 = vld [vmem:[%s8001_s7 + $0x10] sm:$0xff]  ;;  %v7159_v56 = vld [vmem:[%s7998_s4 + $0x8] sm:$0xff] }
 0x1c7   :  { %1578 = vmatprep.mubr.f32.mxu1 %v1414_v5  ;;  %1574 = vmatmul.mubr.f32.gmra.mrb[66].mxu0 %v1409_v23  ;;  %v1413_v44 = vadd.f32 %v1397_v1, %v1301_v40  ;;  %v1289_v25 = vmul.f32 %v3988_v33, %v6994_v24  ;;  %vm1589_vm2 = vcmask 261120   ;;  %v5206_v41 = vpack.c.bf16 %v1704_v61, %v1703_v63  ;;  %v7164_v1 = vld [vmem:[%s7998_s4 + $0x10] sm:$0xff]  ;;  %v1707_v37 = vld [vmem:[%s8001_s7 + $0x20] sm:$0xff]  ;;  %v7179_v5 = vld [vmem:[%s7998_s4 + $0x18] sm:$0xff] }
 0x1c8   :  { %v1418_v14 = vadd.f32 %v1402_v30, %v1306_v39  ;;  %4796 = vmatprep.mubr.msk.f32.mxu0 %vm1589_vm2, %v843_v4  ;;  %v5210_v52 = vpack.c.bf16 %v1706_v21, %v1705_v43  ;;  %v1708_v30 = vld [vmem:[%s8001_s7 + $0x28] sm:$0xff]  ;;  %v5218_v40 = vpack.c.bf16 %v1710_v13, %v1709_v32  ;;  %v1701_v61 = vld [vmem:[%s8000_s6 + $0x70] sm:$0xff] }
 0x1c9   :  { %v1305_v19 = vadd.f32 %v1289_v25, %v1193_v62  ;;  %v5214_v23 = vpack.c.bf16 %v1708_v30, %v1707_v37  ;;  %v1711_v62 = vld [vmem:[%s8001_s7 + $0x40] sm:$0xff]  ;;  %v1712_v33 = vld [vmem:[%s8001_s7 + $0x48] sm:$0xff]  ;;  %v1714_v25 = vld [vmem:[%s8001_s7 + $0x58] sm:$0xff] }
 0x1ca   :  { %1579 = vmatmul.mubr.f32.vlgmr.msra.gmra.mrb[8].mxu1 %v1413_v44  ;;  %v5222_v39 = vpack.c.bf16 %v1712_v33, %v1711_v62  ;;  %v1713_v44 = vld [vmem:[%s8001_s7 + $0x50] sm:$0xff]  ;;  %v2206_v43 = vld [vmem:[#allocation10] sm:$0xff]  ;;  %v2209_v30 = vld [vmem:[#allocation10 + $0x18] sm:$0xff] }
 0x1cb   :  { %1583 = vmatprep.mubr.f32.mxu1 %v1418_v14  ;;  %v1417_v8 = vadd.f32 %v1401_v50, %v1305_v19  ;;  %v5226_v50 = vpack.c.bf16 %v1714_v25, %v1713_v44  ;;  %v1715_v14 = vld [vmem:[%s8001_s7 + $0x60] sm:$0xff]  ;;  %v1716_v19 = vld [vmem:[%s8001_s7 + $0x68] sm:$0xff]  ;;  %v2208_v37 = vld [vmem:[#allocation10 + $0x10] sm:$0xff] }
 0x1cc   :  { %v2207_v21 = vld [vmem:[#allocation10 + $0x8] sm:$0xff]  ;;  %v2210_v32 = vld [vmem:[#allocation10 + $0x20] sm:$0xff]  ;;  %v2212_v62 = vld [vmem:[#allocation10 + $0x30] sm:$0xff] }
 0x1cd   :  { %v2211_v13 = vld [vmem:[#allocation10 + $0x28] sm:$0xff]  ;;  %v2213_v33 = vld [vmem:[#allocation10 + $0x38] sm:$0xff]  ;;  %v2214_v44 = vld [vmem:[#allocation10 + $0x40] sm:$0xff] }
 0x1ce   :  { %1584 = vmatmul.mubr.f32.gmra.mrb[10].mxu1 %v1417_v8  ;;  %v5230_v8 = vpack.c.bf16 %v1716_v19, %v1715_v14  ;;  %v2215_v25 = vld [vmem:[#allocation10 + $0x48] sm:$0xff]  ;;  %v2216_v14 = vld [vmem:[#allocation10 + $0x50] sm:$0xff]  ;;  %v2217_v19 = vld [vmem:[#allocation10 + $0x58] sm:$0xff] }
 0x1cf   :  { %4706 = vmatprep.mubr.msk.f32.mxu1 %vm1589_vm2, %v843_v4  ;;  %v1717_v4 = vld [vmem:[%s8001_s7 + $0x70] sm:$0xff] }
 0x26e   :  { %v4224_v7 = vpop.f32.mrb[0].mxu1 }
 0x26f   :  { %v4225_v22 = vpop.f32.mrb[1].mxu1 }
 0x270   :  { %v4226_v24 = vadd.f32 %v4225_v22, %v4224_v7  ;;  %v1718_v7 = vld [vmem:[%s8001_s7 + $0x78] sm:$0xff] }
 0x271   :  { %v5234_v22 = vpack.c.bf16 %v1718_v7, %v1717_v4  ;;  %v2220_v7 = vld [vmem:[#allocation10 + $0x70] sm:$0xff] }
 0x290   :  { %v4227_v29 = vpop.f32.mrb[2].mxu1 }
 0x291   :  { %v4228_v15 = vpop.f32.mrb[3].mxu1 }
 0x292   :  { %v4229_v27 = vadd.f32 %v4228_v15, %v4227_v29  ;;  %v1688_v29 = vld [vmem:[%s8000_s6 + $0x8] sm:$0xff] }
 0x295   :  { %v4230_v60 = vpop.f32.mrb[4].mxu1 }
 0x296   :  { %v4268_v20 = vpop.f32.mrb[64].mxu0  ;;  %v4231_v46 = vpop.f32.mrb[5].mxu1 }
 0x297   :  { %v4232_v53 = vadd.f32 %v4231_v46, %v4230_v60  ;;  %v4269_v49 = vpop.f32.mrb[65].mxu0  ;;  %v1690_v60 = vld [vmem:[%s8000_s6 + $0x18] sm:$0xff] }
 0x298   :  { %v4270_v0 = vadd.f32 %v4269_v49, %v4268_v20  ;;  %v1691_v49 = vld [vmem:[%s8000_s6 + $0x20] sm:$0xff] }
 0x299   :  { %v4233_v55 = vpop.f32.mrb[6].mxu1 }
 0x29a   :  { %v7132_v45 = vadd.f32 %v4270_v0, %v4226_v24  ;;  %v4271_v42 = vpop.f32.mrb[66].mxu0  ;;  %v4234_v38 = vpop.f32.mrb[7].mxu1  ;;  %v1687_v24 = vld [vmem:[%s8000_s6] sm:$0xff]  ;;  %v1692_v0 = vld [vmem:[%s8000_s6 + $0x28] sm:$0xff] }
 0x29b   :  { %v4235_v51 = vadd.f32 %v4234_v38, %v4233_v55  ;;  %v4272_v59 = vpop.f32.mrb[67].mxu0  ;;  %v5238_v15 = vpack.c.bf16 %v1688_v29, %v1687_v24  ;;  %v5246_v38 = vpack.c.bf16 %v1692_v0, %v1691_v49  ;;  %v8076_v24 = vld [vmem:[#allocation24_spill] sm:$0xff]  ;;  %v4010_v29 = vld [vmem:[%s8002_s8] ss:$0 sm:$0xff] }
 0x29c   :  { %v4273_v16 = vadd.f32 %v4272_v59, %v4271_v42  ;;  %v1694_v59 = vld [vmem:[%s8000_s6 + $0x38] sm:$0xff] }
 0x29d   :  { %v4274_v10 = vpop.f32.mrb[8].mxu1 }
 0x29e   :  { %v7134_v3 = vadd.f32 %v4273_v16, %v4229_v27  ;;  %v4275_v12 = vpop.f32.mrb[9].mxu1  ;;  %v1689_v27 = vld [vmem:[%s8000_s6 + $0x10] sm:$0xff] }
 0x29f   :  { %v4276_v54 = vadd.f32 %v4275_v12, %v4274_v10  ;;  %v1695_v10 = vld [vmem:[%s8000_s6 + $0x40] sm:$0xff]  ;;  %v1696_v12 = vld [vmem:[%s8000_s6 + $0x48] sm:$0xff] }
 0x2a0   :  { %v5198_v34 = vpack.c.bf16 %v7134_v3, %v7132_v45 }
 0x2a1   :  { %v7138_v6 = vadd.f32 %v4276_v54, %v4232_v53  ;;  %v4277_v31 = vpop.f32.mrb[10].mxu1  ;;  %v5242_v53 = vpack.c.bf16 %v1690_v60, %v1689_v27  ;;  %v5254_v54 = vpack.c.bf16 %v1696_v12, %v1695_v10 }
 0x2a2   :  { %v4278_v47 = vpop.f32.mrb[11].mxu1  ;;  %5199 = vmatprep.subr.bf16.mxu1 %v5198_v34 }
 0x2a3   :  { %v4279_v17 = vadd.f32 %v4278_v47, %v4277_v31  ;;  %5201 = vmatpush3.bf16.msra.mxu1 %v5198_v34  ;;  %v1697_v34 = vld [vmem:[%s8000_s6 + $0x50] sm:$0xff]  ;;  %v1699_v47 = vld [vmem:[%s8000_s6 + $0x60] sm:$0xff] }
 0x2a5   :  { %v7146_v11 = vadd.f32 %v4279_v17, %v4235_v51  ;;  %v1693_v51 = vld [vmem:[%s8000_s6 + $0x30] sm:$0xff]  ;;  %v1700_v17 = vld [vmem:[%s8000_s6 + $0x68] sm:$0xff] }
 0x2a6   :  { %v5250_v16 = vpack.c.bf16 %v1694_v59, %v1693_v51  ;;  %v5262_v63 = vpack.c.bf16 %v1700_v17, %v1699_v47  ;;  %v2005_v59 = vld [vmem:[#allocation8] sm:$0xff]  ;;  %v2010_v17 = vld [vmem:[#allocation8 + $0x28] sm:$0xff] }
 0x2a7   :  { %v5202_v2 = vpack.c.bf16 %v7146_v11, %v7138_v6  ;;  %v2009_v47 = vld [vmem:[#allocation8 + $0x20] sm:$0xff] }
 0x2a9   :  { %5203 = vmatprep.subr.bf16.mxu1 %v5202_v2 }
 0x2aa   :  { %5205 = vmatpush3.bf16.msra.mxu1 %v5202_v2  ;;  %v1702_v2 = vld [vmem:[%s8000_s6 + $0x78] sm:$0xff] }
 0x2ab   :  { %5207 = vmatprep.subr.bf16.mxu1 %v5206_v41 }
 0x2ad   :  { %4707 = vmatmul.mubr.msk.f32.vlgmr.msra.gmra.mrb[12].mxu1 %vm1589_vm2, %v7159_v56 }
 0x2ae   :  { %4709 = vmatprep.mubr.msk.f32.mxu1 %vm1589_vm2, %v7164_v1  ;;  %5209 = vmatpush3.bf16.msra.mxu1 %v5206_v41  ;;  %v5266_v41 = vpack.c.bf16 %v1702_v2, %v1701_v61  ;;  %v2011_v61 = vld [vmem:[#allocation8 + $0x30] sm:$0xff]  ;;  %v2012_v2 = vld [vmem:[#allocation8 + $0x38] sm:$0xff] }
 0x2af   :  { %5211 = vmatprep.subr.bf16.mxu1 %v5210_v52 }
 0x2b1   :  { %4710 = vmatmul.mubr.msk.f32.gmra.mrb[14].mxu1 %vm1589_vm2, %v7179_v5 }
 0x2b2   :  { %5213 = vmatpush3.bf16.msra.mxu1 %v5210_v52  ;;  %v5342_v52 = vpack.c.bf16 %v2207_v21, %v2206_v43  ;;  %v2013_v43 = vld [vmem:[#allocation8 + $0x40] sm:$0xff]  ;;  %v2014_v21 = vld [vmem:[#allocation8 + $0x48] sm:$0xff] }
 0x2b3   :  { %5215 = vmatprep.subr.bf16.mxu1 %v5214_v23 }
 0x2b6   :  { %5217 = vmatpush3.bf16.msra.mxu1 %v5214_v23  ;;  %v5346_v23 = vpack.c.bf16 %v2209_v30, %v2208_v37  ;;  %v2016_v37 = vld [vmem:[#allocation8 + $0x58] sm:$0xff]  ;;  %v2017_v30 = vld [vmem:[#allocation8 + $0x60] sm:$0xff] }
 0x2b7   :  { %5219 = vmatprep.subr.bf16.mxu1 %v5218_v40 }
 0x2ba   :  { %5221 = vmatpush3.bf16.msra.mxu1 %v5218_v40  ;;  %v5350_v40 = vpack.c.bf16 %v2211_v13, %v2210_v32  ;;  %v2019_v13 = vld [vmem:[#allocation8 + $0x70] sm:$0xff] }
 0x2bb   :  { %5223 = vmatprep.subr.bf16.mxu1 %v5222_v39 }
 0x2be   :  { %5225 = vmatpush3.bf16.msra.mxu1 %v5222_v39  ;;  %v5354_v39 = vpack.c.bf16 %v2213_v33, %v2212_v62  ;;  %v1989_v62 = vld [vmem:[#allocation7] sm:$0xff]  ;;  %v1990_v33 = vld [vmem:[#allocation7 + $0x8] sm:$0xff] }
 0x2bf   :  { %5227 = vmatprep.subr.bf16.mxu1 %v5226_v50 }
 0x2c2   :  { %5229 = vmatpush3.bf16.msra.mxu1 %v5226_v50  ;;  %v5358_v50 = vpack.c.bf16 %v2215_v25, %v2214_v44  ;;  %v1991_v44 = vld [vmem:[#allocation7 + $0x10] sm:$0xff]  ;;  %v1992_v25 = vld [vmem:[#allocation7 + $0x18] sm:$0xff] }
 0x2c3   :  { %5231 = vmatprep.subr.bf16.mxu1 %v5230_v8 }
 0x2c6   :  { %5233 = vmatpush3.bf16.msra.mxu1 %v5230_v8  ;;  %v2219_v8 = vld [vmem:[#allocation10 + $0x68] sm:$0xff] }
 0x2c7   :  { %5235 = vmatprep.subr.bf16.mxu1 %v5234_v22 }
 0x2ca   :  { %5237 = vmatpush3.bf16.msra.mxu1 %v5234_v22 }
 0x2cb   :  { %5239 = vmatprep.subr.bf16.mxu1 %v5238_v15 }
 0x380   :  { %v4708_v20 = vpop.f32.mrb[12].mxu1 }
 0x381   :  { %v1668_v46 = vpop.f32.mrb[13].mxu1 }
 0x382   :  { %4744 = vmatprep.mubr.f32.mxu1 %v1668_v46 }
 0x383   :  { %4745 = vmatmul.mubr.f32.vlgmr.msra.gmra.mrb[16].mxu1 %v4708_v20 }
 0x384   :  { %5241 = vmatpush3.bf16.msra.mxu1 %v5238_v15  ;;  %v4711_v55 = vpop.f32.mrb[14].mxu1 }
 0x385   :  { %v1678_v42 = vpop.f32.mrb[15].mxu1  ;;  %5243 = vmatprep.subr.bf16.mxu1 %v5242_v53 }
 0x386   :  { %4747 = vmatprep.mubr.f32.mxu1 %v1678_v42 }
 0x387   :  { %4748 = vmatmul.mubr.f32.gmra.mrb[18].mxu1 %v4711_v55 }
 0x388   :  { %5245 = vmatpush3.bf16.msra.mxu1 %v5242_v53  ;;  %4782 = vmatprep.mubr.f32.mxu1 %v7132_v45  ;;  %v1698_v45 = vld [vmem:[%s8000_s6 + $0x58] sm:$0xff] }
 0x389   :  { %5247 = vmatprep.subr.bf16.mxu1 %v5246_v38  ;;  %v5258_v31 = vpack.c.bf16 %v1698_v45, %v1697_v34  ;;  %v2007_v34 = vld [vmem:[#allocation8 + $0x10] sm:$0xff]  ;;  %v2008_v45 = vld [vmem:[#allocation8 + $0x18] sm:$0xff] }
 0x38c   :  { %5249 = vmatpush3.bf16.msra.mxu1 %v5246_v38 }
 0x38d   :  { %5251 = vmatprep.subr.bf16.mxu1 %v5250_v16 }
 0x390   :  { %5253 = vmatpush3.bf16.msra.mxu1 %v5250_v16  ;;  %v2006_v16 = vld [vmem:[#allocation8 + $0x8] sm:$0xff] }
 0x391   :  { %5255 = vmatprep.subr.bf16.mxu1 %v5254_v54 }
 0x394   :  { %5257 = vmatpush3.bf16.msra.mxu1 %v5254_v54  ;;  %v5278_v54 = vpack.c.bf16 %v2006_v16, %v2005_v59  ;;  %v2001_v59 = vld [vmem:[#allocation7 + $0x60] sm:$0xff]  ;;  %v2002_v16 = vld [vmem:[#allocation7 + $0x68] sm:$0xff] }
 0x395   :  { %5259 = vmatprep.subr.bf16.mxu1 %v5258_v31 }
 0x398   :  { %5261 = vmatpush3.bf16.msra.mxu1 %v5258_v31  ;;  %v5282_v31 = vpack.c.bf16 %v2008_v45, %v2007_v34  ;;  %v8077_v34 = vld [vmem:[#allocation38_spill] sm:$0xff]  ;;  %v8078_v45 = vld [vmem:[#allocation32_spill] sm:$0xff] }
 0x399   :  { %5263 = vmatprep.subr.bf16.mxu1 %v5262_v63 }
 0x39c   :  { %5265 = vmatpush3.bf16.msra.mxu1 %v5262_v63  ;;  %v5286_v63 = vpack.c.bf16 %v2010_v17, %v2009_v47  ;;  %v8080_v47 = vld [vmem:[#allocation33_spill] sm:$0xff] }
 0x39d   :  { %5267 = vmatprep.subr.bf16.mxu1 %v5266_v41  ;;  %v8081_v17 = vld [vmem:[#allocation41_spill] sm:$0xff] }
 0x3a0   :  { %5269 = vmatpush3.bf16.msra.mxu1 %v5266_v41  ;;  %v5290_v41 = vpack.c.bf16 %v2012_v2, %v2011_v61  ;;  %v8083_v61 = vld [vmem:[#allocation42_spill] sm:$0xff]  ;;  %v8088_v2 = vld [vmem:[#allocation37_spill] sm:$0xff] }
 0x3a1   :  { %5343 = vmatprep.subr.bf16.mxu1 %v5342_v52 }
 0x3a3   :  { %4783 = vmatmul.mubr.f32.vlgmr.msra.gmra.mrb[16].mxu1 %v7134_v3  ;;  %v5362_v3 = vpack.c.bf16 %v2217_v19, %v2216_v14  ;;  %v5314_v19 = vpack.c.bf16 %v1992_v25, %v1991_v44  ;;  %v8098_v44 = vld [vmem:[#allocation29_spill] sm:$0xff] }
 0x3a4   :  { %4785 = vmatprep.mubr.f32.mxu1 %v7138_v6  ;;  %5345 = vmatpush3.bf16.msra.mxu1 %v5342_v52  ;;  %v2218_v6 = vld [vmem:[#allocation10 + $0x60] sm:$0xff]  ;;  %v5294_v52 = vpack.c.bf16 %v2014_v21, %v2013_v43  ;;  %v8099_v25 = vld [vmem:[#allocation21_spill] sm:$0xff] }
 0x3a5   :  { %5347 = vmatprep.subr.bf16.mxu1 %v5346_v23  ;;  %v5366_v4 = vpack.c.bf16 %v2219_v8, %v2218_v6  ;;  %v1994_v6 = vld [vmem:[#allocation7 + $0x28] sm:$0xff] }
 0x3a7   :  { %4786 = vmatmul.mubr.f32.gmra.mrb[18].mxu1 %v7146_v11  ;;  %v2221_v11 = vld [vmem:[#allocation10 + $0x78] sm:$0xff] }
 0x3a8   :  { %5349 = vmatpush3.bf16.msra.mxu1 %v5346_v23  ;;  %v5370_v22 = vpack.c.bf16 %v2221_v11, %v2220_v7  ;;  %v2018_v23 = vld [vmem:[#allocation8 + $0x68] sm:$0xff]  ;;  %v1995_v11 = vld [vmem:[#allocation7 + $0x30] sm:$0xff] }
 0x3a9   :  { %5351 = vmatprep.subr.bf16.mxu1 %v5350_v40  ;;  %v5302_v32 = vpack.c.bf16 %v2018_v23, %v2017_v30  ;;  %v8090_v23 = vld [vmem:[#allocation25_spill] sm:$0xff] }
 0x3ac   :  { %5353 = vmatpush3.bf16.msra.mxu1 %v5350_v40 }
 0x3ad   :  { %5355 = vmatprep.subr.bf16.mxu1 %v5354_v39 }
 0x3b0   :  { %5357 = vmatpush3.bf16.msra.mxu1 %v5354_v39  ;;  %v5310_v39 = vpack.c.bf16 %v1990_v33, %v1989_v62  ;;  %v8095_v62 = vld [vmem:[#allocation19_spill] sm:$0xff]  ;;  %v8096_v33 = vld [vmem:[#allocation28_spill] sm:$0xff] }
 0x3b1   :  { %5359 = vmatprep.subr.bf16.mxu1 %v5358_v50 }
 0x3b4   :  { %5361 = vmatpush3.bf16.msra.mxu1 %v5358_v50 }
 0x3b5   :  { %5363 = vmatprep.subr.bf16.mxu1 %v5362_v3 }
 0x3b8   :  { %5365 = vmatpush3.bf16.msra.mxu1 %v5362_v3  ;;  %v1993_v3 = vld [vmem:[#allocation7 + $0x20] sm:$0xff] }
 0x3b9   :  { %5367 = vmatprep.subr.bf16.mxu1 %v5366_v4  ;;  %v5318_v7 = vpack.c.bf16 %v1994_v6, %v1993_v3  ;;  %v8103_v3 = vld [vmem:[#allocation23_spill] sm:$0xff] }
 0x3ba   :  { %v4016_v6 = vld [vmem:[%s8007_s13] ss:$0 sm:$0xff] }
 0x3bc   :  { %5369 = vmatpush3.bf16.msra.mxu1 %v5366_v4 }
 0x3bd   :  { %5371 = vmatprep.subr.bf16.mxu1 %v5370_v22 }
 0x3c0   :  { %5373 = vmatpush3.bf16.msra.mxu1 %v5370_v22  ;;  %v1996_v22 = vld [vmem:[#allocation7 + $0x38] sm:$0xff] }
 0x3c1   :  { %5375 = vmatprep.subr.bf16.mxu1 %v8076_v24  ;;  %v5322_v24 = vpack.c.bf16 %v1996_v22, %v1995_v11 }
 0x476   :  { %v4784_v15 = vpop.f32.mrb[16].mxu1 }
 0x477   :  { %v7269_v27 = vadd.f32 %v4784_v15, %v4010_v29  ;;  %v1870_v60 = vpop.f32.mrb[17].mxu1  ;;  %v1998_v15 = vld [vmem:[#allocation7 + $0x48] sm:$0xff] }
 0x478   :  { %v7271_v20 = vadd.f32 %v4010_v29, %v1870_v60 }
 0x479   :  { %v1901_v46 = vmax.f32 %v7269_v27, 0.0  ;;  %v8084_v27 = vld [vmem:[#allocation35_spill] sm:$0xff] }
 0x47a   :  { %v1900_v53 = vmax.f32 %v7271_v20, 0.0  ;;  %v4787_v49 = vpop.f32.mrb[18].mxu1  ;;  %v2004_v20 = vld [vmem:[#allocation7 + $0x78] sm:$0xff] }
 0x47b   :  { %v7275_v0 = vadd.f32 %v4787_v49, %v4010_v29  ;;  %v1880_v55 = vpop.f32.mrb[19].mxu1  ;;  %v1999_v49 = vld [vmem:[#allocation7 + $0x50] sm:$0xff] }
 0x47c   :  { %v5270_v42 = vpack.c.bf16 %v1901_v46, %v1900_v53  ;;  %v7281_v38 = vadd.f32 %v4010_v29, %v1880_v55  ;;  %v1997_v29 = vld [vmem:[#allocation7 + $0x40] sm:$0xff]  ;;  %v2000_v55 = vld [vmem:[#allocation7 + $0x58] sm:$0xff] }
 0x47d   :  { %v1903_v51 = vmax.f32 %v7275_v0, 0.0  ;;  %v5326_v60 = vpack.c.bf16 %v1998_v15, %v1997_v29  ;;  %v4015_v0 = vld [vmem:[%s8005_s11] ss:$0 sm:$0xff] }
 0x47e   :  { %v1902_v10 = vmax.f32 %v7281_v38, 0.0  ;;  %5271 = vmatprep.subr.bf16.mxu0 %v5270_v42  ;;  %v8086_v38 = vld [vmem:[#allocation36_spill] sm:$0xff] }
 0x47f   :  { %5273 = vmatpush3.bf16.msra.mxu0 %v5270_v42  ;;  %v5330_v42 = vpack.c.bf16 %v2000_v55, %v1999_v49 }
 0x480   :  { %v5274_v12 = vpack.c.bf16 %v1903_v51, %v1902_v10 }
 0x482   :  { %5275 = vmatprep.subr.bf16.mxu0 %v5274_v12 }
 0x483   :  { %5277 = vmatpush3.bf16.msra.mxu0 %v5274_v12  ;;  %v5334_v12 = vpack.c.bf16 %v2002_v16, %v2001_v59 }
 0x484   :  { %5279 = vmatprep.subr.bf16.mxu0 %v5278_v54 }
 0x486   :  { %4797 = vmatmul.mubr.msk.f32.vlgmr.msra.gmra.mrb[68].mxu0 %vm1589_vm2, %v7159_v56  ;;  %v2015_v56 = vld [vmem:[#allocation8 + $0x50] sm:$0xff] }
 0x487   :  { %4799 = vmatprep.mubr.msk.f32.mxu0 %vm1589_vm2, %v7164_v1  ;;  %5281 = vmatpush3.bf16.msra.mxu0 %v5278_v54  ;;  %v5298_v1 = vpack.c.bf16 %v2016_v37, %v2015_v56  ;;  %v2003_v54 = vld [vmem:[#allocation7 + $0x70] sm:$0xff] }
 0x488   :  { %5283 = vmatprep.subr.bf16.mxu0 %v5282_v31 }
 0x48a   :  { %4800 = vmatmul.mubr.msk.f32.gmra.mrb[70].mxu0 %vm1589_vm2, %v7179_v5  ;;  %v2020_v5 = vld [vmem:[#allocation8 + $0x78] sm:$0xff] }
 0x48b   :  { %5285 = vmatpush3.bf16.msra.mxu0 %v5282_v31  ;;  %v5306_v40 = vpack.c.bf16 %v2020_v5, %v2019_v13  ;;  %v8079_v31 = vld [vmem:[#allocation40_spill] sm:$0xff]  ;;  %v8092_v13 = vld [vmem:[#allocation26_spill] sm:$0xff] }
 0x48c   :  { %5287 = vmatprep.subr.bf16.mxu0 %v5286_v63  ;;  %v8093_v5 = vld [vmem:[#allocation18_spill] sm:$0xff] }
 0x48f   :  { %5289 = vmatpush3.bf16.msra.mxu0 %v5286_v63  ;;  %v8082_v63 = vld [vmem:[#allocation34_spill] sm:$0xff] }
 0x490   :  { %5291 = vmatprep.subr.bf16.mxu0 %v5290_v41 }
 0x493   :  { %5293 = vmatpush3.bf16.msra.mxu0 %v5290_v41 }
 0x494   :  { %5295 = vmatprep.subr.bf16.mxu0 %v5294_v52 }
 0x497   :  { %5297 = vmatpush3.bf16.msra.mxu0 %v5294_v52 }
 0x498   :  { %5299 = vmatprep.subr.bf16.mxu0 %v5298_v1 }
 0x49b   :  { %5301 = vmatpush3.bf16.msra.mxu0 %v5298_v1 }
 0x49c   :  { %5303 = vmatprep.subr.bf16.mxu0 %v5302_v32 }
 0x49f   :  { %5305 = vmatpush3.bf16.msra.mxu0 %v5302_v32  ;;  %v8091_v32 = vld [vmem:[#allocation17_spill] sm:$0xff] }
 0x4a0   :  { %5307 = vmatprep.subr.bf16.mxu0 %v5306_v40 }
 0x4a3   :  { %5309 = vmatpush3.bf16.msra.mxu0 %v5306_v40  ;;  %v8094_v40 = vld [vmem:[#allocation27_spill] sm:$0xff] }
 0x4a4   :  { %5311 = vmatprep.subr.bf16.mxu0 %v5310_v39 }
 0x559   :  { %v4798_v50 = vpop.f32.mrb[68].mxu0 }
 0x55a   :  { %v1970_v14 = vpop.f32.mrb[69].mxu0 }
 0x55b   :  { %4834 = vmatprep.mubr.f32.mxu0 %v1970_v14  ;;  %v8101_v14 = vld [vmem:[#allocation22_spill] sm:$0xff] }
 0x55c   :  { %4835 = vmatmul.mubr.f32.vlgmr.msra.gmra.mrb[72].mxu0 %v4798_v50  ;;  %v8100_v50 = vld [vmem:[#allocation30_spill] sm:$0xff] }
 0x55d   :  { %5313 = vmatpush3.bf16.msra.mxu0 %v5310_v39  ;;  %v4801_v8 = vpop.f32.mrb[70].mxu0  ;;  %v8097_v39 = vld [vmem:[#allocation20_spill] sm:$0xff] }
 0x55e   :  { %v1980_v4 = vpop.f32.mrb[71].mxu0  ;;  %5315 = vmatprep.subr.bf16.mxu0 %v5314_v19 }
 0x55f   :  { %4837 = vmatprep.mubr.f32.mxu0 %v1980_v4 }
 0x560   :  { %4838 = vmatmul.mubr.f32.gmra.mrb[74].mxu0 %v4801_v8 }
 0x561   :  { %5317 = vmatpush3.bf16.msra.mxu0 %v5314_v19  ;;  %4872 = vmatprep.mubr.f32.mxu0 %v1900_v53  ;;  %v5338_v53 = vpack.c.bf16 %v2004_v20, %v2003_v54  ;;  %v8102_v19 = vld [vmem:[#allocation31_spill] sm:$0xff] }
 0x562   :  { %5319 = vmatprep.subr.bf16.mxu0 %v5318_v7 }
 0x565   :  { %5321 = vmatpush3.bf16.msra.mxu0 %v5318_v7 }
 0x566   :  { %5323 = vmatprep.subr.bf16.mxu0 %v5322_v24 }
 0x569   :  { %5325 = vmatpush3.bf16.msra.mxu0 %v5322_v24 }
 0x56a   :  { %5327 = vmatprep.subr.bf16.mxu0 %v5326_v60 }
 0x56d   :  { %5329 = vmatpush3.bf16.msra.mxu0 %v5326_v60 }
 0x56e   :  { %5331 = vmatprep.subr.bf16.mxu0 %v5330_v42 }
 0x571   :  { %5333 = vmatpush3.bf16.msra.mxu0 %v5330_v42 }
 0x572   :  { %5335 = vmatprep.subr.bf16.mxu0 %v5334_v12 }
 0x575   :  { %5337 = vmatpush3.bf16.msra.mxu0 %v5334_v12 }
 0x576   :  { %5339 = vmatprep.subr.bf16.mxu0 %v5338_v53 }
 0x579   :  { %5341 = vmatpush3.bf16.msra.mxu0 %v5338_v53 }
 0x57a   :  { %5407 = vmatprep.subr.bf16.mxu0 %v8077_v34 }
 0x57c   :  { %4873 = vmatmul.mubr.f32.vlgmr.msra.gmra.mrb[72].mxu0 %v1901_v46  ;;  %v8085_v46 = vld [vmem:[#allocation44_spill] sm:$0xff] }
 0x57d   :  { %4875 = vmatprep.mubr.f32.mxu0 %v1902_v10  ;;  %5409 = vmatpush3.bf16.msra.mxu0 %v8078_v45  ;;  %v8087_v10 = vld [vmem:[#allocation46_spill] sm:$0xff] }
 0x57e   :  { %5411 = vmatprep.subr.bf16.mxu0 %v8079_v31 }
 0x580   :  { %4876 = vmatmul.mubr.f32.gmra.mrb[74].mxu0 %v1903_v51 }
 0x581   :  { %5413 = vmatpush3.bf16.msra.mxu0 %v8080_v47 }
 0x582   :  { %5415 = vmatprep.subr.bf16.mxu0 %v8081_v17 }
 0x585   :  { %5417 = vmatpush3.bf16.msra.mxu0 %v8082_v63 }
 0x586   :  { %5419 = vmatprep.subr.bf16.mxu0 %v8083_v61  ;;  %v5707_v61 = vld [vmem:[%s7997_s3 + $0x8] sm:$0xff] }
 0x589   :  { %5421 = vmatpush3.bf16.msra.mxu0 %v8084_v27 }
 0x58a   :  { %5423 = vmatprep.subr.bf16.mxu0 %v8085_v46  ;;  %v5708_v46 = vld [vmem:[%s7997_s3] sm:$0xff] }
 0x58d   :  { %5425 = vmatpush3.bf16.msra.mxu0 %v8086_v38 }
 0x58e   :  { %5427 = vmatprep.subr.bf16.mxu0 %v8087_v10 }
 0x591   :  { %5429 = vmatpush3.bf16.msra.mxu0 %v8088_v2 }
 0x592   :  { %5431 = vmatprep.subr.bf16.mxu0 %v6986_v26 }
 0x595   :  { %5433 = vmatpush3.bf16.msra.mxu0 %v6639_v28 }
 0x596   :  { %5435 = vmatprep.subr.bf16.mxu0 %v7027_v35  ;;  %v8089_v35 = vld [vmem:[#allocation16_spill] sm:$0xff] }
 0x599   :  { %5437 = vmatpush3.bf16.msra.mxu0 %v6672_v58 }
 0x64f   :  { %v4874_v51 = vpop.f32.mrb[72].mxu0 }
 0x650   :  { %v2199_v41 = vadd.f32 %v4874_v51, %v4015_v0  ;;  %v2172_v43 = vpop.f32.mrb[73].mxu0 }
 0x651   :  { %v2198_v21 = vadd.f32 %v4015_v0, %v2172_v43 }
 0x652   :  { %v2203_v37 = vmax.f32 %v2199_v41, 0.0 }
 0x653   :  { %v2202_v52 = vmax.f32 %v2198_v21, 0.0  ;;  %v4877_v56 = vpop.f32.mrb[74].mxu0 }
 0x654   :  { %v2201_v1 = vadd.f32 %v4877_v56, %v4015_v0  ;;  %v2182_v30 = vpop.f32.mrb[75].mxu0 }
 0x655   :  { %v2200_v26 = vadd.f32 %v4015_v0, %v2182_v30  ;;  %4910 = vmatprep.mubr.f32.mxu1 %v2202_v52  ;;  %v5709_v52 = vld [vmem:[%s7997_s3 + $0x18] sm:$0xff]  ;;  %v5710_v30 = vld [vmem:[%s7997_s3 + $0x10] sm:$0xff] }
 0x656   :  { %4911 = vmatmul.mubr.f32.vlgmr.msra.gmra.mrb[20].mxu1 %v2203_v37  ;;  %v2205_v58 = vmax.f32 %v2201_v1, 0.0 }
 0x657   :  { %v2204_v28 = vmax.f32 %v2200_v26, 0.0  ;;  %5377 = vmatpush3.bf16.msra.mxu1 %v8089_v35 }
 0x658   :  { %5379 = vmatprep.subr.bf16.mxu1 %v8090_v23 }
 0x659   :  { %4913 = vmatprep.mubr.f32.mxu1 %v2204_v28 }
 0x65a   :  { %4914 = vmatmul.mubr.f32.gmra.mrb[22].mxu1 %v2205_v58 }
 0x65b   :  { %5381 = vmatpush3.bf16.msra.mxu1 %v8091_v32 }
 0x65c   :  { %5383 = vmatprep.subr.bf16.mxu1 %v8092_v13 }
 0x65f   :  { %5385 = vmatpush3.bf16.msra.mxu1 %v8093_v5 }
 0x660   :  { %5387 = vmatprep.subr.bf16.mxu1 %v8094_v40 }
 0x663   :  { %5389 = vmatpush3.bf16.msra.mxu1 %v8095_v62 }
 0x664   :  { %5391 = vmatprep.subr.bf16.mxu1 %v8096_v33 }
 0x667   :  { %5393 = vmatpush3.bf16.msra.mxu1 %v8097_v39 }
 0x668   :  { %5395 = vmatprep.subr.bf16.mxu1 %v8098_v44 }
 0x66b   :  { %5397 = vmatpush3.bf16.msra.mxu1 %v8099_v25 }
 0x66c   :  { %5399 = vmatprep.subr.bf16.mxu1 %v8100_v50 }
 0x66f   :  { %5401 = vmatpush3.bf16.msra.mxu1 %v8101_v14 }
 0x670   :  { %5403 = vmatprep.subr.bf16.mxu1 %v8102_v19 }
 0x673   :  { %5405 = vmatpush3.bf16.msra.mxu1 %v8103_v3 }
 0x729   :  { %v4912_v8 = vpop.f32.mrb[20].mxu1 }
 0x72a   :  { %v2301_v4 = vadd.f32 %v4912_v8, %v4016_v6  ;;  %v2295_v7 = vpop.f32.mrb[21].mxu1 }
 0x72b   :  { %v2296_v11 = vadd.f32 %v4016_v6, %v2295_v7 }
 0x72c   :  { %v2315_v22 = vmul.f32 %v2301_v4, %v2301_v4 }
 0x72d   :  { %v4915_v24 = vpop.f32.mrb[22].mxu1  ;;  %v2314_v29 = vmul.f32 %v2296_v11, %v2296_v11 }
 0x72e   :  { %v2311_v15 = vadd.f32 %v4915_v24, %v4016_v6  ;;  %2320 = vadd.xlane.f32.xlu0 %v2315_v22  ;;  %v2305_v60 = vpop.f32.mrb[23].mxu1 }
 0x72f   :  { %v2306_v49 = vadd.f32 %v4016_v6, %v2305_v60  ;;  %2318 = vadd.xlane.f32.xlu1 %v2314_v29 }
 0x730   :  { %v2317_v55 = vmul.f32 %v2311_v15, %v2311_v15 }
 0x731   :  { %v2316_v42 = vmul.f32 %v2306_v49, %v2306_v49 }
 0x733   :  { %2324 = vadd.xlane.f32.xlu1 %v2317_v55  ;;  %2322 = vadd.xlane.f32.xlu0 %v2316_v42 }
 0x7bb   :  { %v2321_v59 = vpop.xlane.xlu0 %2320 }
 0x7bc   :  { %v2327_v16 = vadd.f32 1e-12, %v2321_v59  ;;  %v2319_v12 = vpop.xlane.xlu1 %2318 }
 0x7bd   :  { %v2326_v54 = vadd.f32 1e-12, %v2319_v12 }
 0x7be   :  { %5691 = vrsqrt.f32 %v2327_v16 }
 0x7bf   :  { %5693 = vrsqrt.f32 %v2326_v54 }
 0x7c0   :  { %v2325_v20 = vpop.xlane.xlu1 %2324  ;;  %v2323_v53 = vpop.xlane.xlu0 %2322 }
 0x7c1   :  { %v2329_v34 = vadd.f32 1e-12, %v2325_v20  ;;  %v2328_v45 = vadd.f32 1e-12, %v2323_v53 }
 0x7c3   :  { %5695 = vrsqrt.f32 %v2329_v34 }
 0x7c4   :  { %5697 = vrsqrt.f32 %v2328_v45 }
 0x7c8   :  { %v5692_v31 = vpop.eup %5691 }
 0x7c9   :  { %v5694_v47 = vpop.eup %5693  ;;  %v2335_v17 = vmul.f32 %v5692_v31, %v2301_v4 }
 0x7ca   :  { %v2334_v63 = vmul.f32 %v5694_v47, %v2296_v11 }
 0x7cb   :  { %v2339_v27 = vadd.f32 %v5707_v61, %v2335_v17 }
 0x7cc   :  { %v2338_v38 = vadd.f32 %v5708_v46, %v2334_v63 }
 0x7cd   :  { %v5696_v10 = vpop.eup %5695  ;;  %v2343_v2 = vmax.f32 %v2339_v27, 0.0 }
 0x7ce   :  { %v5698_v0 = vpop.eup %5697  ;;  %v2337_v51 = vmul.f32 %v5696_v10, %v2311_v15  ;;  %v2342_v41 = vmax.f32 %v2338_v38, 0.0 }
 0x7cf   :  { %v2336_v43 = vmul.f32 %v5698_v0, %v2306_v49  ;;  %v2347_v21 = vmin.f32 %v2343_v2, 1.0 }
 0x7d0   :  { %v2341_v56 = vadd.f32 %v5709_v52, %v2337_v51  ;;  %v2346_v37 = vmin.f32 %v2342_v41, 1.0 }
 0x7d1   :  { %2351 = vst [vmem:[#allocation11 + $0x8] sm:$0xff] %v2347_v21  ;;  %v2355_v1 = vmul.f32 16.0, %v2347_v21  ;;  %v2340_v26 = vadd.f32 %v5710_v30, %v2336_v43 }
 0x7d2   :  { %v2345_v28 = vmax.f32 %v2341_v56, 0.0  ;;  %2350 = vst [vmem:[#allocation11] sm:$0xff] %v2346_v37  ;;  %v2354_v35 = vmul.f32 16.0, %v2346_v37 }
 0x7d3   :  { %v2359_v58 = vfloor.f32 %v2355_v1  ;;  %v2344_v23 = vmax.f32 %v2340_v26, 0.0 }
 0x7d4   :  { %v2349_v32 = vmin.f32 %v2345_v28, 1.0  ;;  %v2358_v13 = vfloor.f32 %v2354_v35 }
 0x7d5   :  { %v7352_v5 = vsub.f32 %v2355_v1, %v2359_v58  ;;  %v2363_v40 = vadd.f32 1.0, %v2359_v58  ;;  %v2348_v62 = vmin.f32 %v2344_v23, 1.0  ;;  %v2423_v33 = vmax.f32 %v2359_v58, 0.0 }
 0x7d6   :  { %2353 = vst [vmem:[#allocation11 + $0x18] sm:$0xff] %v2349_v32  ;;  %v2362_v39 = vadd.f32 1.0, %v2358_v13  ;;  %v2422_v44 = vmax.f32 %v2358_v13, 0.0  ;;  %v7354_v25 = vmul.f32 16.0, %v2349_v32  ;;  %v7363_v7 = vsub.f32 %v2354_v35, %v2358_v13 }
 0x7d7   :  { %2400 = vrot.lane.b32.xlu0 %v7352_v5, %s5871_s29  ;;  %v7358_v50 = vsub.f32 %v2363_v40, %v2355_v1  ;;  %v2356_v14 = vmul.f32 16.0, %v2348_v62  ;;  %2352 = vst [vmem:[#allocation11 + $0x10] sm:$0xff] %v2348_v62  ;;  %v2427_v19 = vmin.f32 %v2423_v33, 15.0  ;;  %v2435_v3 = vmax.f32 %v2363_v40, 0.0 }
 0x7d8   :  { %v2426_v6 = vmin.f32 %v2422_v44, 15.0  ;;  %v2434_v8 = vmax.f32 %v2362_v39, 0.0  ;;  %v2361_v4 = vfloor.f32 %v7354_v25  ;;  %v7367_v49 = vsub.f32 %v2362_v39, %v2354_v35 }
 0x7d9   :  { %2376 = vrot.lane.b32.xlu1 %v7358_v50, %s5871_s29  ;;  %v2360_v11 = vfloor.f32 %v2356_v14  ;;  %v2439_v22 = vmin.f32 %v2435_v3, 15.0  ;;  %v5664_v29 = vtrunc.f32 %v2427_v19 }
 0x7da   :  { %v5662_v24 = vtrunc.f32 %v2426_v6  ;;  %v2438_v15 = vmin.f32 %v2434_v8, 15.0  ;;  %v2365_v60 = vadd.f32 1.0, %v2361_v4  ;;  %v2425_v42 = vmax.f32 %v2361_v4, 0.0 }
 0x7db   :  { %2398 = vrot.lane.b32.xlu0 %v7363_v7, %s5871_s29  ;;  %v2364_v55 = vadd.f32 1.0, %v2360_v11  ;;  %v7369_v59 = vsub.f32 %v2356_v14, %v2360_v11  ;;  %v5672_v12 = vtrunc.f32 %v2439_v22  ;;  %v7375_v53 = vcvt.f32.s32 %v5664_v29 }
 0x7dc   :  { %v7373_v16 = vcvt.f32.s32 %v5662_v24  ;;  %v2437_v20 = vmax.f32 %v2365_v60, 0.0  ;;  %v5670_v34 = vtrunc.f32 %v2438_v15  ;;  %v2429_v47 = vmin.f32 %v2425_v42, 15.0 }
 0x7dd   :  { %2374 = vrot.lane.b32.xlu1 %v7367_v49, %s5871_s29  ;;  %v2436_v54 = vmax.f32 %v2364_v55, 0.0  ;;  %v7379_v45 = vsub.f32 %v2364_v55, %v2356_v14  ;;  %v2424_v17 = vmax.f32 %v2360_v11, 0.0  ;;  %v7384_v61 = vcvt.f32.s32 %v5672_v12 }
 0x7de   :  { %v2450_v63 = vmul.u32 16, %v7373_v16  ;;  %v2441_v46 = vmin.f32 %v2437_v20, 15.0  ;;  %v2451_v38 = vmul.u32 16, %v7375_v53  ;;  %v7388_v10 = vcvt.f32.s32 %v5670_v34 }
 0x7df   :  { %2402 = vrot.lane.b32.xlu0 %v7369_v59, %s5871_s29  ;;  %v2440_v31 = vmin.f32 %v2436_v54, 15.0  ;;  %v5668_v2 = vtrunc.f32 %v2429_v47  ;;  %v2428_v0 = vmin.f32 %v2424_v17, 15.0  ;;  %v2467_v51 = vmul.u32 16, %v7384_v61 }
 0x7e0   :  { %v5676_v43 = vtrunc.f32 %v2441_v46  ;;  %v2466_v21 = vmul.u32 16, %v7388_v10  ;;  %v7412_v58 = vsub.f32 %v7354_v25, %v2361_v4  ;;  %v2369_v23 = vsub.f32 %v2365_v60, %v7354_v25 }
 0x7e1   :  { %2378 = vrot.lane.b32.xlu1 %v7379_v45, %s5871_s29  ;;  %v5674_v27 = vtrunc.f32 %v2440_v31  ;;  %v7396_v52 = vcvt.f32.s32 %v5668_v2  ;;  %v5666_v56 = vtrunc.f32 %v2428_v0  ;;  %v5711_v31 = vld [vmem:[%s7999_s5] sm:$0xff] }
 0x7e2   :  { %v7400_v1 = vcvt.f32.s32 %v5676_v43  ;;  %v2446_v47 = vadd.s32 %v5711_v31, %v7373_v16 }
 0x7e3   :  { %2454 = vrot.lane.b32.xlu0 %v2450_v63, %s5871_s29  ;;  %v7392_v41 = vcvt.f32.s32 %v5674_v27  ;;  %v2453_v30 = vmul.u32 16, %v7396_v52  ;;  %v7404_v26 = vcvt.f32.s32 %v5666_v56  ;;  %v5712_v63 = vld [vmem:[%s7999_s5 + $0x8] sm:$0xff]  ;;  %v2482_v27 = vadd.s32 %v5711_v31, %v7388_v10 }
 0x7e4   :  { %v2469_v28 = vmul.u32 16, %v7400_v1 }
 0x7e5   :  { %2456 = vrot.lane.b32.xlu1 %v2451_v38, %s5871_s29  ;;  %v2468_v37 = vmul.u32 16, %v7392_v41  ;;  %v2452_v35 = vmul.u32 16, %v7404_v26  ;;  %v2483_v38 = vadd.s32 %v5712_v63, %v7384_v61 }
 0x7e7   :  { %2472 = vrot.lane.b32.xlu0 %v2467_v51, %s5871_s29 }
 0x7e9   :  { %2470 = vrot.lane.b32.xlu1 %v2466_v21, %s5871_s29 }
 0x7eb   :  { %2474 = vrot.lane.b32.xlu0 %v2468_v37, %s5871_s29  ;;  %v5714_v37 = vld [vmem:[%s7999_s5 + $0x10] sm:$0xff] }
 0x7ed   :  { %2460 = vrot.lane.b32.xlu1 %v2453_v30, %s5871_s29  ;;  %v2448_v30 = vadd.s32 %v5714_v37, %v7404_v26 }
 0x7ef   :  { %2476 = vrot.lane.b32.xlu0 %v2469_v28, %s5871_s29 }
 0x7f1   :  { %2458 = vrot.lane.b32.xlu1 %v2452_v35, %s5871_s29 }
 0x7f3   :  { %2404 = vrot.lane.b32.xlu0 %v7412_v58, %s5871_s29 }
 0x7f5   :  { %2380 = vrot.lane.b32.xlu1 %v2369_v23, %s5871_s29 }
 0x849   :  { %v2401_v32 = vpop.permute.xlu0 %2400 }
 0x84a   :  { %v2411_v13 = vmul.f32 %v2401_v32, %v7358_v50  ;;  %v2419_v33 = vmul.f32 %v2401_v32, %v7352_v5 }
 0x84b   :  { %v2377_v40 = vpop.permute.xlu1 %2376 }
 0x84c   :  { %2657 = vperm.xlu1 %5690, %v2411_v13   ;;  %v2387_v19 = vmul.f32 %v2377_v40, %v7358_v50  ;;  %v2415_v8 = vmul.f32 %v7352_v5, %v2377_v40 }
 0x84d   :  { %v2399_v62 = vpop.permute.xlu0 %2398 }
 0x84e   :  { %v2410_v39 = vmul.f32 %v2399_v62, %v7367_v49  ;;  %v2418_v25 = vmul.f32 %v2399_v62, %v7363_v7 }
 0x84f   :  { %v2375_v44 = vpop.permute.xlu1 %2374 }
 0x850   :  { %2881 = vperm.xlu1 %5690, %v2419_v33   ;;  %2652 = vperm.xlu0 %5689, %v2410_v39   ;;  %v2386_v4 = vmul.f32 %v2375_v44, %v7367_v49  ;;  %v2414_v24 = vmul.f32 %v7363_v7, %v2375_v44 }
 0x851   :  { %v2403_v14 = vpop.permute.xlu0 %2402 }
 0x852   :  { %v2412_v5 = vmul.f32 %v2403_v14, %v7379_v45  ;;  %v2420_v34 = vmul.f32 %v2403_v14, %v7369_v59 }
 0x853   :  { %v2379_v3 = vpop.permute.xlu1 %2378 }
 0x854   :  { %2876 = vperm.xlu1 %5690, %v2418_v25   ;;  %2561 = vperm.xlu0 %5689, %v2387_v19   ;;  %v2388_v49 = vmul.f32 %v2379_v3, %v7379_v45  ;;  %v2416_v7 = vmul.f32 %v7369_v59, %v2379_v3  ;;  %v2447_v45 = vadd.s32 %v5712_v63, %v7375_v53  ;;  %v5713_v53 = vld [vmem:[%s7999_s5 + $0x18] sm:$0xff] }
 0x855   :  { %v2455_v6 = vpop.permute.xlu0 %2454  ;;  %v2449_v43 = vadd.s32 %v5713_v53, %v7396_v52  ;;  %v2485_v61 = vadd.s32 %v5713_v53, %v7400_v1  ;;  %v2484_v52 = vadd.s32 %v5714_v37, %v7392_v41 }
 0x856   :  { %v2462_v17 = vadd.s32 %v2455_v6, %v2446_v47  ;;  %v2486_v59 = vadd.s32 %v2482_v27, %v2455_v6 }
 0x857   :  { %v2457_v11 = vpop.permute.xlu1 %2456 }
 0x858   :  { %2556 = vperm.xlu1 %5690, %v2386_v4   ;;  %2769 = vperm.xlu0 %5689, %v2415_v8   ;;  %v2463_v46 = vadd.s32 %v2457_v11, %v2447_v45  ;;  %v2487_v2 = vadd.s32 %v2483_v38, %v2457_v11 }
 0x859   :  { %v2473_v22 = vpop.permute.xlu0 %2472 }
 0x85a   :  { %v2479_v16 = vadd.s32 %v2473_v22, %v2447_v45  ;;  %v2491_v51 = vadd.s32 %v2483_v38, %v2473_v22 }
 0x85b   :  { %v2471_v29 = vpop.permute.xlu1 %2470 }
 0x85c   :  { %2764 = vperm.xlu0 %5689, %v2414_v24   ;;  %v2478_v0 = vadd.s32 %v2471_v29, %v2446_v47  ;;  %v2490_v21 = vadd.s32 %v2482_v27, %v2471_v29 }
 0x85d   :  { %v2475_v15 = vpop.permute.xlu0 %2474 }
 0x85e   :  { %v2492_v1 = vadd.s32 %v2484_v52, %v2475_v15 }
 0x85f   :  { %v2461_v50 = vpop.permute.xlu1 %2460 }
 0x860   :  { %v2465_v10 = vadd.s32 %v2461_v50, %v2449_v43  ;;  %v2489_v56 = vadd.s32 %v2485_v61, %v2461_v50 }
 0x861   :  { %v2477_v60 = vpop.permute.xlu0 %2476 }
 0x862   :  { %v2481_v28 = vadd.s32 %v2477_v60, %v2449_v43  ;;  %v2493_v40 = vadd.s32 %v2485_v61, %v2477_v60 }
 0x863   :  { %v2459_v55 = vpop.permute.xlu1 %2458 }
 0x864   :  { %v2464_v35 = vadd.s32 %v2459_v55, %v2448_v30  ;;  %v2488_v32 = vadd.s32 %v2484_v52, %v2459_v55 }
 0x865   :  { %v2405_v42 = vpop.permute.xlu0 %2404 }
 0x866   :  { %v2413_v12 = vmul.f32 %v2405_v42, %v2369_v23  ;;  %v2421_v62 = vmul.f32 %v2405_v42, %v7412_v58 }
 0x867   :  { %v2381_v54 = vpop.permute.xlu1 %2380 }
 0x868   :  { %v2389_v20 = vmul.f32 %v2381_v54, %v2369_v23  ;;  %2667 = vperm.xlu1 %5690, %v2413_v12   ;;  %v2480_v23 = vadd.s32 %v2475_v15, %v2448_v30  ;;  %v2417_v13 = vmul.f32 %v7412_v58, %v2381_v54 }
 0x86a   :  { %2571 = vperm.xlu0 %5689, %v2389_v20  }
 0x86c   :  { %2662 = vperm.xlu1 %5690, %v2412_v5  }
 0x86e   :  { %2566 = vperm.xlu0 %5689, %v2388_v49  }
 0x870   :  { %2886 = vperm.xlu1 %5690, %v2420_v34  }
 0x872   :  { %2774 = vperm.xlu0 %5689, %v2416_v7  }
 0x874   :  { %2495 = vperm.xlu1 %5690, %v2462_v17  }
 0x876   :  { %2498 = vperm.xlu0 %5689, %v2463_v46  }
 0x878   :  { %2703 = vperm.xlu1 %5690, %v2486_v59  }
 0x87a   :  { %2706 = vperm.xlu0 %5689, %v2487_v2  }
 0x87c   :  { %2594 = vperm.xlu1 %5690, %v2479_v16  }
 0x87e   :  { %2591 = vperm.xlu0 %5689, %v2478_v0  }
 0x880   :  { %2818 = vperm.xlu1 %5690, %v2491_v51  }
 0x882   :  { %2504 = vperm.xlu0 %5689, %v2465_v10  }
 0x884   :  { %2815 = vperm.xlu1 %5690, %v2490_v21  }
 0x886   :  { %2712 = vperm.xlu0 %5689, %v2489_v56  }
 0x888   :  { %2600 = vperm.xlu1 %5690, %v2481_v28  }
 0x88a   :  { %2501 = vperm.xlu0 %5689, %v2464_v35  }
 0x88c   :  { %2597 = vperm.xlu1 %5690, %v2480_v23  }
 0x88e   :  { %2709 = vperm.xlu0 %5689, %v2488_v32  }
 0x890   :  { %2821 = vperm.xlu1 %5690, %v2492_v1  }
 0x892   :  { %2779 = vperm.xlu0 %5689, %v2417_v13  }
 0x894   :  { %2824 = vperm.xlu1 %5690, %v2493_v40  }
 0x896   :  { %2891 = vperm.xlu0 %5689, %v2421_v62  }
 0x8cb   :  { %v7452_v26 = vpop.permute.xlu1 %2657 }
 0x8cf   :  { %v7454_v33 = vpop.permute.xlu0 %2652  ;;  %v7456_v41 = vpop.permute.xlu1 %2881 }
 0x8d3   :  { %v2562_v39 = vpop.permute.xlu0 %2561  ;;  %v7458_v44 = vpop.permute.xlu1 %2876 }
 0x8d7   :  { %v7460_v14 = vpop.permute.xlu0 %2769  ;;  %v2557_v19 = vpop.permute.xlu1 %2556 }
 0x8db   :  { %v2765_v25 = vpop.permute.xlu0 %2764 }
 0x8e7   :  { %v7462_v3 = vpop.permute.xlu1 %2667 }
 0x8e9   :  { %v7464_v6 = vpop.permute.xlu0 %2571 }
 0x8eb   :  { %v7466_v58 = vpop.permute.xlu1 %2662 }
 0x8ed   :  { %v7468_v8 = vpop.permute.xlu0 %2566 }
 0x8ef   :  { %v7470_v4 = vpop.permute.xlu1 %2886 }
 0x8f1   :  { %v7472_v11 = vpop.permute.xlu0 %2774 }
 0x8f3   :  { %v2496_v22 = vpop.permute.xlu1 %2495 }
 0x8f4   :  { %vm2506_vm3 = vcmp.eq.s32.totalorder %v6518_v36, %v2496_v22  ;;  %vm2507_vm4 = vcmp.eq.s32.totalorder %v6545_v18, %v2496_v22  ;;  %vm2508_vm7 = vcmp.eq.s32.totalorder %v6529_v48, %v2496_v22  ;;  %vm2509_vm5 = vcmp.eq.s32.totalorder %v6532_v57, %v2496_v22 }
 0x8f5   :  { %v2499_v24 = vpop.permute.xlu0 %2498  ;;  %v4017_v29 = vsel %vm2506_vm3, 1.0, %v8069_v9  ;;  %v4018_v15 = vsel %vm2507_vm4, 1.0, %v8069_v9  ;;  %v4019_v60 = vsel %vm2508_vm7, 1.0, %v8069_v9  ;;  %v4020_v55 = vsel %vm2509_vm5, 1.0, %v8069_v9 }
 0x8f6   :  { %vm2510_vm6 = vcmp.eq.s32.totalorder %v6518_v36, %v2499_v24  ;;  %vm2511_vm8 = vcmp.eq.s32.totalorder %v6545_v18, %v2499_v24  ;;  %vm2512_vm9 = vcmp.eq.s32.totalorder %v6529_v48, %v2499_v24  ;;  %vm2513_vm10 = vcmp.eq.s32.totalorder %v6532_v57, %v2499_v24 }
 0x8f7   :  { %v2704_v50 = vpop.permute.xlu1 %2703  ;;  %v4021_v42 = vsel %vm2510_vm6, 1.0, %v8069_v9  ;;  %v4022_v12 = vsel %vm2511_vm8, 1.0, %v8069_v9  ;;  %v7488_v54 = vmul.f32 %v4017_v29, %v2557_v19  ;;  %v7490_v20 = vmul.f32 %v4018_v15, %v2557_v19 }
 0x8f8   :  { %v4023_v5 = vsel %vm2512_vm9, 1.0, %v8069_v9  ;;  %v4024_v49 = vsel %vm2513_vm10, 1.0, %v8069_v9  ;;  %vm2714_vm11 = vcmp.eq.s32.totalorder %v6518_v36, %v2704_v50  ;;  %vm2715_vm12 = vcmp.eq.s32.totalorder %v6545_v18, %v2704_v50 }
 0x8f9   :  { %v2707_v34 = vpop.permute.xlu0 %2706  ;;  %vm2716_vm13 = vcmp.eq.s32.totalorder %v6529_v48, %v2704_v50  ;;  %vm2717_vm14 = vcmp.eq.s32.totalorder %v6532_v57, %v2704_v50  ;;  %v7498_v7 = vmul.f32 %v4019_v60, %v2557_v19  ;;  %v7500_v31 = vmul.f32 %v4020_v55, %v2557_v19 }
 0x8fa   :  { %v7502_v47 = vmul.f32 %v4021_v42, %v2562_v39  ;;  %v7504_v17 = vmul.f32 %v4022_v12, %v2562_v39  ;;  %v4049_v45 = vsel %vm2714_vm11, 1.0, %v8069_v9  ;;  %v4050_v27 = vsel %vm2715_vm12, 1.0, %v8069_v9 }
 0x8fb   :  { %v2595_v63 = vpop.permute.xlu1 %2594  ;;  %v4051_v46 = vsel %vm2716_vm13, 1.0, %v8069_v9  ;;  %v4052_v59 = vsel %vm2717_vm14, 1.0, %v8069_v9  ;;  %v7510_v38 = vmul.f32 %v4023_v5, %v2562_v39  ;;  %v7512_v2 = vmul.f32 %v4024_v49, %v2562_v39 }
 0x8fc   :  { %vm2718_vm15 = vcmp.eq.s32.totalorder %v6518_v36, %v2707_v34  ;;  %vm2719_vm0 = vcmp.eq.s32.totalorder %v6545_v18, %v2707_v34  ;;  %vm2720_vm1 = vcmp.eq.s32.totalorder %v6529_v48, %v2707_v34  ;;  %vm2721_vm3 = vcmp.eq.s32.totalorder %v6532_v57, %v2707_v34 }
 0x8fd   :  { %v4053_v16 = vsel %vm2718_vm15, 1.0, %v8069_v9  ;;  %v4054_v0 = vsel %vm2719_vm0, 1.0, %v8069_v9  ;;  %v2592_v51 = vpop.permute.xlu0 %2591  ;;  %v7520_v53 = vmul.f32 %v4049_v45, %v2765_v25  ;;  %v7522_v43 = vmul.f32 %v4050_v27, %v2765_v25 }
 0x8fe   :  { %v7524_v10 = vmul.f32 %v4051_v46, %v2765_v25  ;;  %v7526_v21 = vmul.f32 %v4052_v59, %v2765_v25  ;;  %vm2606_vm4 = vcmp.eq.s32.totalorder %v6518_v36, %v2595_v63  ;;  %vm2607_vm7 = vcmp.eq.s32.totalorder %v6545_v18, %v2595_v63 }
 0x8ff   :  { %vm2608_vm5 = vcmp.eq.s32.totalorder %v6529_v48, %v2595_v63  ;;  %vm2609_vm6 = vcmp.eq.s32.totalorder %v6532_v57, %v2595_v63  ;;  %v7532_v61 = vpop.permute.xlu1 %2818  ;;  %v4055_v56 = vsel %vm2720_vm1, 1.0, %v8069_v9  ;;  %v4056_v37 = vsel %vm2721_vm3, 1.0, %v8069_v9 }
 0x900   :  { %v7537_v30 = vmul.f32 %v4053_v16, %v7460_v14  ;;  %v7540_v28 = vmul.f32 %v4054_v0, %v7460_v14  ;;  %v4037_v35 = vsel %vm2606_vm4, 1.0, %v8069_v9  ;;  %v4038_v52 = vsel %vm2607_vm7, 1.0, %v8069_v9 }
 0x901   :  { %v4039_v23 = vsel %vm2608_vm5, 1.0, %v8069_v9  ;;  %v4040_v32 = vsel %vm2609_vm6, 1.0, %v8069_v9  ;;  %vm2602_vm8 = vcmp.eq.s32.totalorder %v6518_v36, %v2592_v51  ;;  %vm2603_vm9 = vcmp.eq.s32.totalorder %v6545_v18, %v2592_v51  ;;  %v2505_v39 = vpop.permute.xlu0 %2504 }
 0x902   :  { %vm2604_vm10 = vcmp.eq.s32.totalorder %v6529_v48, %v2592_v51  ;;  %vm2605_vm11 = vcmp.eq.s32.totalorder %v6532_v57, %v2592_v51  ;;  %v4033_v1 = vsel %vm2602_vm8, 1.0, %v8069_v9  ;;  %v4034_v13 = vsel %vm2603_vm9, 1.0, %v8069_v9 }
 0x903   :  { %v4035_v40 = vsel %vm2604_vm10, 1.0, %v8069_v9  ;;  %v4036_v62 = vsel %vm2605_vm11, 1.0, %v8069_v9  ;;  %v7555_v19 = vmul.f32 %v4055_v56, %v7460_v14  ;;  %v7558_v25 = vmul.f32 %v4056_v37, %v7460_v14  ;;  %v2816_v55 = vpop.permute.xlu1 %2815 }
 0x904   :  { %v7561_v22 = vmul.f32 %v4037_v35, %v7452_v26  ;;  %v2670_v24 = vmul.f32 %v4033_v1, %v7454_v33  ;;  %v7565_v29 = vmul.f32 %v4038_v52, %v7452_v26  ;;  %v7568_v15 = vmul.f32 %v4039_v23, %v7452_v26 }
 0x905   :  { %v7571_v50 = vmul.f32 %v4040_v32, %v7452_v26  ;;  %v2672_v60 = vmul.f32 %v4035_v40, %v7454_v33  ;;  %v7575_v14 = vmul.f32 %v4034_v13, %v7454_v33  ;;  %v7578_v42 = vmul.f32 %v4036_v62, %v7454_v33  ;;  %v7599_v63 = vpop.permute.xlu0 %2712 }
 0x906   :  { %vm2830_vm12 = vcmp.eq.s32.totalorder %v6518_v36, %v7532_v61  ;;  %vm2831_vm13 = vcmp.eq.s32.totalorder %v6545_v18, %v7532_v61  ;;  %v2686_v12 = vadd.f32 %v2670_v24, %v7488_v54  ;;  %vm2833_vm14 = vcmp.eq.s32.totalorder %v6532_v57, %v7532_v61 }
 0x907   :  { %vm2518_vm15 = vcmp.eq.s32.totalorder %v6518_v36, %v2505_v39  ;;  %vm2519_vm0 = vcmp.eq.s32.totalorder %v6545_v18, %v2505_v39  ;;  %vm2520_vm1 = vcmp.eq.s32.totalorder %v6529_v48, %v2505_v39  ;;  %vm2521_vm3 = vcmp.eq.s32.totalorder %v6532_v57, %v2505_v39  ;;  %v2601_v59 = vpop.permute.xlu1 %2600 }
 0x908   :  { %v4029_v26 = vsel %vm2518_vm15, 1.0, %v8069_v9  ;;  %v4030_v33 = vsel %vm2519_vm0, 1.0, %v8069_v9  ;;  %v2688_v5 = vadd.f32 %v2672_v60, %v7498_v7  ;;  %v7595_v49 = vsel %vm2830_vm12, 1.0, %v8069_v9 }
 0x909   :  { %v4031_v54 = vsel %vm2520_vm1, 1.0, %v8069_v9  ;;  %v4032_v34 = vsel %vm2521_vm3, 1.0, %v8069_v9  ;;  %v7602_v45 = vsel %vm2831_vm13, 1.0, %v8069_v9  ;;  %v7605_v27 = vsel %vm2833_vm14, 1.0, %v8069_v9 }
 0x90a   :  { %v7608_v46 = vmul.f32 %v4029_v26, %v7464_v6  ;;  %v7611_v7 = vmul.f32 %v4030_v33, %v7464_v6  ;;  %vm2826_vm4 = vcmp.eq.s32.totalorder %v6518_v36, %v2816_v55  ;;  %vm2827_vm7 = vcmp.eq.s32.totalorder %v6545_v18, %v2816_v55 }
 0x90b   :  { %vm2828_vm5 = vcmp.eq.s32.totalorder %v6529_v48, %v2816_v55  ;;  %vm2829_vm6 = vcmp.eq.s32.totalorder %v6532_v57, %v2816_v55  ;;  %v7618_v16 = vmul.f32 %v4031_v54, %v7464_v6  ;;  %v7621_v0 = vmul.f32 %v4032_v34, %v7464_v6  ;;  %v2598_v54 = vpop.permute.xlu1 %2597 }
 0x90c   :  { %v4065_v51 = vsel %vm2826_vm4, 1.0, %v8069_v9  ;;  %v4067_v56 = vsel %vm2828_vm5, 1.0, %v8069_v9  ;;  %v2798_v37 = vadd.f32 %v7520_v53, %v2686_v12  ;;  %v2800_v35 = vadd.f32 %v7524_v10, %v2688_v5  ;;  %v2502_v53 = vpop.permute.xlu0 %2501 }
 0x90d   :  { %v2894_v52 = vmul.f32 %v4065_v51, %v7458_v44  ;;  %v2896_v23 = vmul.f32 %v4067_v56, %v7458_v44  ;;  %v4066_v32 = vsel %vm2827_vm7, 1.0, %v8069_v9  ;;  %v4068_v1 = vsel %vm2829_vm6, 1.0, %v8069_v9 }
 0x90e   :  { %vm2614_vm8 = vcmp.eq.s32.totalorder %v6518_v36, %v2601_v59  ;;  %vm2615_vm9 = vcmp.eq.s32.totalorder %v6545_v18, %v2601_v59  ;;  %vm2616_vm10 = vcmp.eq.s32.totalorder %v6529_v48, %v2601_v59  ;;  %vm2617_vm11 = vcmp.eq.s32.totalorder %v6532_v57, %v2601_v59 }
 0x90f   :  { %v2910_v6 = vadd.f32 %v2894_v52, %v2798_v37  ;;  %v2912_v13 = vadd.f32 %v2896_v23, %v2800_v35  ;;  %vm2832_vm12 = vcmp.eq.s32.totalorder %v6529_v48, %v7532_v61  ;;  %v4045_v10 = vsel %vm2614_vm8, 1.0, %v8069_v9 }
 0x910   :  { %v4046_v40 = vsel %vm2615_vm9, 1.0, %v8069_v9  ;;  %v4047_v62 = vsel %vm2616_vm10, 1.0, %v8069_v9  ;;  %v4048_v39 = vsel %vm2617_vm11, 1.0, %v8069_v9  ;;  %v7642_v24 = vmul.f32 %v4045_v10, %v7462_v3 }
 0x911   :  { %v7645_v60 = vmul.f32 %v4046_v40, %v7462_v3  ;;  %v7648_v55 = vmul.f32 %v4047_v62, %v7462_v3  ;;  %v7651_v12 = vmul.f32 %v4048_v39, %v7462_v3  ;;  %vm2726_vm13 = vcmp.eq.s32.totalorder %v6518_v36, %v7599_v63 }
 0x912   :  { %vm2514_vm14 = vcmp.eq.s32.totalorder %v6518_v36, %v2502_v53  ;;  %vm2515_vm15 = vcmp.eq.s32.totalorder %v6545_v18, %v2502_v53  ;;  %vm2516_vm0 = vcmp.eq.s32.totalorder %v6529_v48, %v2502_v53  ;;  %vm2517_vm1 = vcmp.eq.s32.totalorder %v6532_v57, %v2502_v53  ;;  %v2710_v53 = vpop.permute.xlu0 %2709 }
 0x913   :  { %v4025_v26 = vsel %vm2514_vm14, 1.0, %v8069_v9  ;;  %v4026_v33 = vsel %vm2515_vm15, 1.0, %v8069_v9  ;;  %v4027_v5 = vsel %vm2516_vm0, 1.0, %v8069_v9  ;;  %v4028_v3 = vsel %vm2517_vm1, 1.0, %v8069_v9 }
 0x914   :  { %v7664_v34 = vmul.f32 %v4025_v26, %v7468_v8  ;;  %v7667_v59 = vmul.f32 %v4026_v33, %v7468_v8  ;;  %v7670_v51 = vmul.f32 %v4027_v5, %v7468_v8  ;;  %v7673_v56 = vmul.f32 %v4028_v3, %v7468_v8 }
 0x915   :  { %v2687_v37 = vadd.f32 %v7575_v14, %v7490_v20  ;;  %v2895_v35 = vmul.f32 %v4066_v32, %v7458_v44  ;;  %v2689_v52 = vadd.f32 %v7578_v42, %v7500_v31  ;;  %v2897_v23 = vmul.f32 %v4068_v1, %v7458_v44 }
 0x916   :  { %vm2610_vm3 = vcmp.eq.s32.totalorder %v6518_v36, %v2598_v54  ;;  %vm2611_vm4 = vcmp.eq.s32.totalorder %v6545_v18, %v2598_v54  ;;  %vm2612_vm7 = vcmp.eq.s32.totalorder %v6529_v48, %v2598_v54  ;;  %vm2613_vm5 = vcmp.eq.s32.totalorder %v6532_v57, %v2598_v54  ;;  %v2780_v3 = vpop.permute.xlu0 %2779 }
 0x917   :  { %vm2727_vm6 = vcmp.eq.s32.totalorder %v6545_v18, %v7599_v63  ;;  %vm2728_vm8 = vcmp.eq.s32.totalorder %v6529_v48, %v7599_v63  ;;  %vm2729_vm9 = vcmp.eq.s32.totalorder %v6532_v57, %v7599_v63  ;;  %v2799_v8 = vadd.f32 %v7522_v43, %v2687_v37 }
 0x918   :  { %v2801_v44 = vadd.f32 %v7526_v21, %v2689_v52  ;;  %v4041_v20 = vsel %vm2610_vm3, 1.0, %v8069_v9  ;;  %v4042_v31 = vsel %vm2611_vm4, 1.0, %v8069_v9  ;;  %v4043_v14 = vsel %vm2612_vm7, 1.0, %v8069_v9 }
 0x919   :  { %v4044_v42 = vsel %vm2613_vm5, 1.0, %v8069_v9  ;;  %v7698_v32 = vmul.f32 %v4041_v20, %v7466_v58  ;;  %v7701_v1 = vmul.f32 %v4042_v31, %v7466_v58  ;;  %v2911_v10 = vadd.f32 %v2895_v35, %v2799_v8 }
 0x91a   :  { %v2913_v40 = vadd.f32 %v2897_v23, %v2801_v44  ;;  %v7704_v43 = vmul.f32 %v4043_v14, %v7466_v58  ;;  %v7707_v21 = vmul.f32 %v4044_v42, %v7466_v58  ;;  %v2691_v62 = vadd.f32 %v7565_v29, %v7504_v17  ;;  %v2822_v58 = vpop.permute.xlu1 %2821 }
 0x91b   :  { %v2899_v39 = vmul.f32 %v7602_v45, %v7456_v41  ;;  %v2693_v26 = vadd.f32 %v7571_v50, %v7512_v2  ;;  %v2901_v33 = vmul.f32 %v7605_v27, %v7456_v41  ;;  %v4071_v5 = vsel %vm2832_vm12, 1.0, %v8069_v9  ;;  %2990 = vmatprep.mubr.f32.mxu1 %v2911_v10  ;;  %v2892_v10 = vpop.permute.xlu0 %2891 }
 0x91c   :  { %3075 = vmatprep.mubr.f32.mxu0 %v2913_v40  ;;  %vm2722_vm10 = vcmp.eq.s32.totalorder %v6518_v36, %v2710_v53  ;;  %vm2723_vm11 = vcmp.eq.s32.totalorder %v6545_v18, %v2710_v53  ;;  %vm2724_vm14 = vcmp.eq.s32.totalorder %v6529_v48, %v2710_v53  ;;  %2991 = vmatmul.mubr.f32.vlgmr.msra.gmra.mrb[24].mxu1 %v2910_v6  ;;  %v4061_v27 = vsel %vm2726_vm13, 1.0, %v8069_v9 }
 0x91d   :  { %3076 = vmatmul.mubr.f32.vlgmr.msra.gmra.mrb[76].mxu0 %v2912_v13  ;;  %v2803_v17 = vadd.f32 %v7540_v28, %v2691_v62  ;;  %v2805_v2 = vadd.f32 %v7558_v25, %v2693_v26  ;;  %vm2725_vm15 = vcmp.eq.s32.totalorder %v6532_v57, %v2710_v53  ;;  %v4057_v61 = vsel %vm2722_vm10, 1.0, %v8069_v9 }
 0x91e   :  { %v4058_v29 = vsel %vm2723_vm11, 1.0, %v8069_v9  ;;  %v4059_v50 = vsel %vm2724_vm14, 1.0, %v8069_v9  ;;  %v4060_v45 = vsel %vm2725_vm15, 1.0, %v8069_v9  ;;  %v2790_v28 = vmul.f32 %v4057_v61, %v7472_v11  ;;  %v2825_v20 = vpop.permute.xlu1 %2824 }
 0x91f   :  { %v2915_v6 = vadd.f32 %v2899_v39, %v2803_v17  ;;  %v2917_v13 = vadd.f32 %v2901_v33, %v2805_v2  ;;  %v2791_v25 = vmul.f32 %v4058_v29, %v7472_v11  ;;  %v2792_v54 = vmul.f32 %v4059_v50, %v7472_v11 }
 0x920   :  { %v2793_v37 = vmul.f32 %v4060_v45, %v7472_v11  ;;  %vm2834_vm12 = vcmp.eq.s32.totalorder %v6518_v36, %v2822_v58  ;;  %vm2835_vm0 = vcmp.eq.s32.totalorder %v6545_v18, %v2822_v58  ;;  %vm2836_vm1 = vcmp.eq.s32.totalorder %v6529_v48, %v2822_v58 }
 0x921   :  { %2995 = vmatprep.mubr.f32.mxu1 %v2915_v6  ;;  %3080 = vmatprep.mubr.f32.mxu0 %v2917_v13  ;;  %vm2837_vm13 = vcmp.eq.s32.totalorder %v6532_v57, %v2822_v58  ;;  %v4073_v35 = vsel %vm2834_vm12, 1.0, %v8069_v9  ;;  %v4074_v52 = vsel %vm2835_vm0, 1.0, %v8069_v9  ;;  %v2690_v8 = vadd.f32 %v7561_v22, %v7502_v47 }
 0x922   :  { %v4076_v23 = vsel %vm2837_vm13, 1.0, %v8069_v9  ;;  %v2898_v11 = vmul.f32 %v7595_v49, %v7456_v41  ;;  %v2692_v44 = vadd.f32 %v7568_v15, %v7510_v38  ;;  %v2900_v31 = vmul.f32 %v4071_v5, %v7456_v41 }
 0x923   :  { %v4062_v14 = vsel %vm2727_vm6, 1.0, %v8069_v9  ;;  %v4063_v42 = vsel %vm2728_vm8, 1.0, %v8069_v9  ;;  %v4064_v47 = vsel %vm2729_vm9, 1.0, %v8069_v9  ;;  %v2802_v38 = vadd.f32 %v7537_v30, %v2690_v8 }
 0x924   :  { %v2804_v22 = vadd.f32 %v7555_v19, %v2692_v44  ;;  %v2794_v41 = vmul.f32 %v4061_v27, %v2780_v3  ;;  %v2795_v15 = vmul.f32 %v4062_v14, %v2780_v3  ;;  %v2796_v49 = vmul.f32 %v4063_v42, %v2780_v3 }
 0x925   :  { %v2797_v53 = vmul.f32 %v4064_v47, %v2780_v3  ;;  %vm2838_vm3 = vcmp.eq.s32.totalorder %v6518_v36, %v2825_v20  ;;  %vm2839_vm4 = vcmp.eq.s32.totalorder %v6545_v18, %v2825_v20  ;;  %v2914_v40 = vadd.f32 %v2898_v11, %v2802_v38 }
 0x926   :  { %v2916_v62 = vadd.f32 %v2900_v31, %v2804_v22  ;;  %vm2840_vm7 = vcmp.eq.s32.totalorder %v6529_v48, %v2825_v20  ;;  %vm2841_vm5 = vcmp.eq.s32.totalorder %v6532_v57, %v2825_v20  ;;  %v4077_v63 = vsel %vm2838_vm3, 1.0, %v8069_v9 }
 0x927   :  { %v4078_v30 = vsel %vm2839_vm4, 1.0, %v8069_v9  ;;  %v4079_v19 = vsel %vm2840_vm7, 1.0, %v8069_v9  ;;  %v4080_v39 = vsel %vm2841_vm5, 1.0, %v8069_v9  ;;  %v4075_v36 = vsel %vm2836_vm1, 1.0, %v8069_v9  ;;  %2996 = vmatmul.mubr.f32.gmra.mrb[26].mxu1 %v2914_v40 }
 0x928   :  { %3081 = vmatmul.mubr.f32.gmra.mrb[78].mxu0 %v2916_v62  ;;  %v2906_v18 = vmul.f32 %v4077_v63, %v2892_v10  ;;  %v2907_v26 = vmul.f32 %v4078_v30, %v2892_v10  ;;  %v2908_v33 = vmul.f32 %v4079_v19, %v2892_v10  ;;  %v2909_v5 = vmul.f32 %v4080_v39, %v2892_v10  ;;  %v4101_v19 = vld [vmem:[%s8001_s7 + $0x80] sm:$0xff]  ;;  %v4102_v39 = vld [vmem:[%s8001_s7 + $0x88] sm:$0xff] }
 0x929   :  { %v2695_v57 = vadd.f32 %v7701_v1, %v7667_v59  ;;  %v2903_v17 = vmul.f32 %v4074_v52, %v7470_v4  ;;  %v2697_v2 = vadd.f32 %v7707_v21, %v7673_v56  ;;  %v2905_v61 = vmul.f32 %v4076_v23, %v7470_v4 }
 0x92a   :  { %v2694_v48 = vadd.f32 %v7698_v32, %v7664_v34  ;;  %v2902_v9 = vmul.f32 %v4073_v35, %v7470_v4  ;;  %v2696_v58 = vadd.f32 %v7704_v43, %v7670_v51  ;;  %v2904_v45 = vmul.f32 %v4075_v36, %v7470_v4 }
 0x92b   :  { %v2807_v29 = vadd.f32 %v2791_v25, %v2695_v57  ;;  %v2809_v50 = vadd.f32 %v2793_v37, %v2697_v2  ;;  %v2699_v59 = vadd.f32 %v7645_v60, %v7611_v7  ;;  %v2701_v56 = vadd.f32 %v7651_v12, %v7621_v0  ;;  %v4106_v2 = vld [vmem:[%s8001_s7 + $0xa8] sm:$0xff] }
 0x92c   :  { %v2806_v1 = vadd.f32 %v2790_v28, %v2694_v48  ;;  %v2808_v27 = vadd.f32 %v2792_v54, %v2696_v58  ;;  %v2698_v34 = vadd.f32 %v7642_v24, %v7608_v46  ;;  %v2700_v51 = vadd.f32 %v7648_v55, %v7618_v16  ;;  %v5715_v16 = vld [vmem:[%s7998_s4] sm:$0xff]  ;;  %v7843_v48 = vld [vmem:[%s7998_s4 + $0x10] sm:$0xff] }
 0x92d   :  { %v2919_v32 = vadd.f32 %v2903_v17, %v2807_v29  ;;  %v2921_v21 = vadd.f32 %v2905_v61, %v2809_v50  ;;  %v2811_v6 = vadd.f32 %v2795_v15, %v2699_v59  ;;  %v2813_v4 = vadd.f32 %v2797_v53, %v2701_v56  ;;  %v4105_v17 = vld [vmem:[%s8001_s7 + $0xa0] sm:$0xff]  ;;  %v7836_v61 = vld [vmem:[%s7998_s4 + $0x8] sm:$0xff]  ;;  %v4107_v58 = vld [vmem:[%s8001_s7 + $0xb0] sm:$0xff] }
 0x92e   :  { %v2918_v43 = vadd.f32 %v2902_v9, %v2806_v1  ;;  %v2920_v13 = vadd.f32 %v2904_v45, %v2808_v27  ;;  %v2810_v25 = vadd.f32 %v2794_v41, %v2698_v34  ;;  %v2812_v60 = vadd.f32 %v2796_v49, %v2700_v51  ;;  %v4108_v29 = vld [vmem:[%s8001_s7 + $0xb8] sm:$0xff]  ;;  %v4109_v59 = vld [vmem:[%s8001_s7 + $0xc0] sm:$0xff]  ;;  %v4110_v1 = vld [vmem:[%s8001_s7 + $0xc8] sm:$0xff] }
 0x92f   :  { %3000 = vmatprep.mubr.f32.mxu1 %v2919_v32  ;;  %3085 = vmatprep.mubr.f32.mxu0 %v2921_v21  ;;  %v2923_v7 = vadd.f32 %v2907_v26, %v2811_v6  ;;  %v2925_v0 = vadd.f32 %v2909_v5, %v2813_v4  ;;  %v5446_v26 = vpack.c.bf16 %v4102_v39, %v4101_v19  ;;  %v4104_v5 = vld [vmem:[%s8001_s7 + $0x98] sm:$0xff]  ;;  %v4111_v56 = vld [vmem:[%s8001_s7 + $0xd0] sm:$0xff]  ;;  %v4113_v21 = vld [vmem:[%s8001_s7 + $0xe0] sm:$0xff] }
 0x930   :  { %3001 = vmatmul.mubr.f32.gmra.mrb[28].mxu1 %v2918_v43  ;;  %3086 = vmatmul.mubr.f32.gmra.mrb[80].mxu0 %v2920_v13  ;;  %v2922_v12 = vadd.f32 %v2906_v18, %v2810_v25  ;;  %v2924_v46 = vadd.f32 %v2908_v33, %v2812_v60  ;;  %v4103_v33 = vld [vmem:[%s8001_s7 + $0x90] sm:$0xff]  ;;  %v5454_v9 = vpack.c.bf16 %v4106_v2, %v4105_v17  ;;  %v7856_v50 = vld [vmem:[%s7998_s4 + $0x18] sm:$0xff]  ;;  %v4114_v6 = vld [vmem:[%s8001_s7 + $0xe8] sm:$0xff] }
 0x931   :  { %3005 = vmatprep.mubr.f32.mxu1 %v2923_v7  ;;  %3090 = vmatprep.mubr.f32.mxu0 %v2925_v0  ;;  %v5450_v57 = vpack.c.bf16 %v4104_v5, %v4103_v33  ;;  %v5458_v45 = vpack.c.bf16 %v4108_v29, %v4107_v58  ;;  %v5462_v27 = vpack.c.bf16 %v4110_v1, %v4109_v59  ;;  %v4112_v34 = vld [vmem:[%s8001_s7 + $0xd8] sm:$0xff]  ;;  %v4115_v43 = vld [vmem:[%s8001_s7 + $0xf0] sm:$0xff]  ;;  %v4085_v25 = vld [vmem:[%s8000_s6 + $0x80] sm:$0xff] }
 0x932   :  { %v5466_v32 = vpack.c.bf16 %v4112_v34, %v4111_v56  ;;  %v5470_v51 = vpack.c.bf16 %v4114_v6, %v4113_v21  ;;  %v4116_v13 = vld [vmem:[%s8001_s7 + $0xf8] sm:$0xff]  ;;  %v4086_v7 = vld [vmem:[%s8000_s6 + $0x88] sm:$0xff]  ;;  %v4087_v0 = vld [vmem:[%s8000_s6 + $0x90] sm:$0xff] }
 0x933   :  { %v5474_v4 = vpack.c.bf16 %v4116_v13, %v4115_v43  ;;  %v5478_v60 = vpack.c.bf16 %v4086_v7, %v4085_v25  ;;  %v3504_v5 = vld [vmem:[#allocation8 + $0x80] sm:$0xff]  ;;  %v3506_v58 = vld [vmem:[#allocation8 + $0x90] sm:$0xff]  ;;  %v3507_v29 = vld [vmem:[#allocation8 + $0x98] sm:$0xff] }
 0x934   :  { %3006 = vmatmul.mubr.f32.gmra.mrb[30].mxu1 %v2922_v12  ;;  %3091 = vmatmul.mubr.f32.gmra.mrb[82].mxu0 %v2924_v46  ;;  %v4088_v12 = vld [vmem:[%s8000_s6 + $0x98] sm:$0xff]  ;;  %v3508_v59 = vld [vmem:[#allocation8 + $0xa0] sm:$0xff]  ;;  %v3509_v1 = vld [vmem:[#allocation8 + $0xa8] sm:$0xff] }
 0x935   :  { %4924 = vmatprep.mubr.msk.f32.mxu1 %vm1589_vm2, %v5715_v16  ;;  %5014 = vmatprep.mubr.msk.f32.mxu0 %vm1589_vm2, %v5715_v16  ;;  %v3510_v56 = vld [vmem:[#allocation8 + $0xb0] sm:$0xff]  ;;  %v3511_v34 = vld [vmem:[#allocation8 + $0xb8] sm:$0xff]  ;;  %v3512_v21 = vld [vmem:[#allocation8 + $0xc0] sm:$0xff] }
 0x936   :  { %v3513_v6 = vld [vmem:[#allocation8 + $0xc8] sm:$0xff]  ;;  %v3515_v43 = vld [vmem:[#allocation8 + $0xd8] sm:$0xff]  ;;  %v3516_v13 = vld [vmem:[#allocation8 + $0xe0] sm:$0xff] }
 0x937   :  { %v3518_v7 = vld [vmem:[#allocation8 + $0xf0] sm:$0xff] }
 0x9ef   :  { %v4428_v24 = vpop.f32.mrb[24].mxu1 }
 0x9f0   :  { %v4472_v55 = vpop.f32.mrb[76].mxu0  ;;  %v4429_v28 = vpop.f32.mrb[25].mxu1 }
 0x9f1   :  { %v4473_v3 = vpop.f32.mrb[77].mxu0  ;;  %v4430_v54 = vadd.f32 %v4429_v28, %v4428_v24  ;;  %v5482_v24 = vpack.c.bf16 %v4088_v12, %v4087_v0  ;;  %v4090_v28 = vld [vmem:[%s8000_s6 + $0xa8] sm:$0xff] }
 0x9f2   :  { %v4474_v37 = vadd.f32 %v4473_v3, %v4472_v55  ;;  %v4089_v55 = vld [vmem:[%s8000_s6 + $0xa0] sm:$0xff]  ;;  %v3488_v12 = vld [vmem:[#allocation7 + $0x88] sm:$0xff] }
 0x9f3   :  { %v3487_v0 = vld [vmem:[#allocation7 + $0x80] sm:$0xff] }
 0x9f4   :  { %v7803_v35 = vadd.f32 %v4474_v37, %v4430_v54  ;;  %v5486_v37 = vpack.c.bf16 %v4090_v28, %v4089_v55  ;;  %v3709_v55 = vld [vmem:[#allocation10 + $0x90] sm:$0xff] }
 0x9fa   :  { %v4431_v52 = vpop.f32.mrb[26].mxu1 }
 0x9fb   :  { %v4475_v23 = vpop.f32.mrb[78].mxu0  ;;  %v4432_v8 = vpop.f32.mrb[27].mxu1 }
 0x9fc   :  { %v4476_v11 = vpop.f32.mrb[79].mxu0  ;;  %v4433_v44 = vadd.f32 %v4432_v8, %v4431_v52  ;;  %v4091_v52 = vld [vmem:[%s8000_s6 + $0xb0] sm:$0xff] }
 0x9fd   :  { %v4477_v20 = vadd.f32 %v4476_v11, %v4475_v23  ;;  %v4092_v23 = vld [vmem:[%s8000_s6 + $0xb8] sm:$0xff]  ;;  %v4093_v11 = vld [vmem:[%s8000_s6 + $0xc0] sm:$0xff] }
 0x9fe   :  { %v5490_v8 = vpack.c.bf16 %v4092_v23, %v4091_v52  ;;  %v3712_v52 = vld [vmem:[#allocation10 + $0xa8] sm:$0xff] }
 0x9ff   :  { %v7805_v31 = vadd.f32 %v4477_v20, %v4433_v44  ;;  %v4094_v44 = vld [vmem:[%s8000_s6 + $0xc8] sm:$0xff] }
 0xa00   :  { %v5494_v20 = vpack.c.bf16 %v4094_v44, %v4093_v11  ;;  %v3714_v11 = vld [vmem:[#allocation10 + $0xb8] sm:$0xff] }
 0xa01   :  { %v5438_v14 = vpack.c.bf16 %v7805_v31, %v7803_v35 }
 0xa03   :  { %v4434_v42 = vpop.f32.mrb[28].mxu1  ;;  %v4478_v47 = vpop.f32.mrb[80].mxu0  ;;  %5439 = vmatprep.subr.bf16.mxu1 %v5438_v14 }
 0xa04   :  { %v4435_v38 = vpop.f32.mrb[29].mxu1  ;;  %v4479_v22 = vpop.f32.mrb[81].mxu0  ;;  %5441 = vmatpush3.bf16.msra.mxu1 %v5438_v14  ;;  %v4095_v14 = vld [vmem:[%s8000_s6 + $0xd0] sm:$0xff] }
 0xa05   :  { %v4436_v41 = vadd.f32 %v4435_v38, %v4434_v42  ;;  %v4480_v15 = vadd.f32 %v4479_v22, %v4478_v47  ;;  %v4097_v47 = vld [vmem:[%s8000_s6 + $0xe0] sm:$0xff]  ;;  %v4098_v38 = vld [vmem:[%s8000_s6 + $0xe8] sm:$0xff] }
 0xa06   :  { %v5502_v22 = vpack.c.bf16 %v4098_v38, %v4097_v47  ;;  %v3718_v47 = vld [vmem:[#allocation10 + $0xd8] sm:$0xff] }
 0xa07   :  { %v7809_v49 = vadd.f32 %v4480_v15, %v4436_v41  ;;  %v4437_v53 = vpop.f32.mrb[30].mxu1  ;;  %v4481_v10 = vpop.f32.mrb[82].mxu0  ;;  %v4099_v41 = vld [vmem:[%s8000_s6 + $0xf0] sm:$0xff]  ;;  %v4100_v15 = vld [vmem:[%s8000_s6 + $0xf8] sm:$0xff] }
 0xa08   :  { %v4438_v40 = vpop.f32.mrb[31].mxu1  ;;  %v4482_v62 = vpop.f32.mrb[83].mxu0 }
 0xa09   :  { %v4439_v63 = vadd.f32 %v4438_v40, %v4437_v53  ;;  %v4483_v30 = vadd.f32 %v4482_v62, %v4481_v10  ;;  %v5506_v53 = vpack.c.bf16 %v4100_v15, %v4099_v41  ;;  %v4118_v10 = vld [vmem:[%s8002_s8 + $0x1] ss:$0 sm:$0xff]  ;;  %v3720_v41 = vld [vmem:[#allocation10 + $0xe8] sm:$0xff] }
 0xa0b   :  { %v7817_v36 = vadd.f32 %v4483_v30, %v4439_v63 }
 0xa0d   :  { %v5442_v18 = vpack.c.bf16 %v7817_v36, %v7809_v49 }
 0xa0f   :  { %5443 = vmatprep.subr.bf16.mxu1 %v5442_v18 }
 0xa10   :  { %5445 = vmatpush3.bf16.msra.mxu1 %v5442_v18 }
 0xa11   :  { %5447 = vmatprep.subr.bf16.mxu1 %v5446_v26 }
 0xa13   :  { %4925 = vmatmul.mubr.msk.f32.vlgmr.msra.gmra.mrb[32].mxu1 %vm1589_vm2, %v7836_v61 }
 0xa14   :  { %4927 = vmatprep.mubr.msk.f32.mxu1 %vm1589_vm2, %v7843_v48  ;;  %5449 = vmatpush3.bf16.msra.mxu1 %v5446_v26 }
 0xa15   :  { %5451 = vmatprep.subr.bf16.mxu1 %v5450_v57 }
 0xa17   :  { %4928 = vmatmul.mubr.msk.f32.gmra.mrb[34].mxu1 %vm1589_vm2, %v7856_v50 }
 0xa18   :  { %5453 = vmatpush3.bf16.msra.mxu1 %v5450_v57  ;;  %v3505_v57 = vld [vmem:[#allocation8 + $0x88] sm:$0xff] }
 0xa19   :  { %5455 = vmatprep.subr.bf16.mxu1 %v5454_v9 }
 0xa1c   :  { %5457 = vmatpush3.bf16.msra.mxu1 %v5454_v9  ;;  %v5518_v9 = vpack.c.bf16 %v3505_v57, %v3504_v5 }
 0xa1d   :  { %5459 = vmatprep.subr.bf16.mxu1 %v5458_v45 }
 0xa20   :  { %5461 = vmatpush3.bf16.msra.mxu1 %v5458_v45  ;;  %v5522_v45 = vpack.c.bf16 %v3507_v29, %v3506_v58  ;;  %v3494_v58 = vld [vmem:[#allocation7 + $0xb8] sm:$0xff] }
 0xa21   :  { %5463 = vmatprep.subr.bf16.mxu1 %v5462_v27 }
 0xa24   :  { %5465 = vmatpush3.bf16.msra.mxu1 %v5462_v27  ;;  %v5526_v27 = vpack.c.bf16 %v3509_v1, %v3508_v59  ;;  %v3496_v59 = vld [vmem:[#allocation7 + $0xc8] sm:$0xff] }
 0xa25   :  { %5467 = vmatprep.subr.bf16.mxu1 %v5466_v32 }
 0xa28   :  { %5469 = vmatpush3.bf16.msra.mxu1 %v5466_v32  ;;  %v5530_v32 = vpack.c.bf16 %v3511_v34, %v3510_v56  ;;  %v3498_v56 = vld [vmem:[#allocation7 + $0xd8] sm:$0xff] }
 0xa29   :  { %5471 = vmatprep.subr.bf16.mxu1 %v5470_v51 }
 0xa2c   :  { %5473 = vmatpush3.bf16.msra.mxu1 %v5470_v51  ;;  %v5534_v51 = vpack.c.bf16 %v3513_v6, %v3512_v21  ;;  %v3500_v21 = vld [vmem:[#allocation7 + $0xe8] sm:$0xff] }
 0xa2d   :  { %5475 = vmatprep.subr.bf16.mxu1 %v5474_v4 }
 0xa30   :  { %5477 = vmatpush3.bf16.msra.mxu1 %v5474_v4  ;;  %v3517_v4 = vld [vmem:[#allocation8 + $0xe8] sm:$0xff] }
 0xa31   :  { %5479 = vmatprep.subr.bf16.mxu1 %v5478_v60  ;;  %v5542_v25 = vpack.c.bf16 %v3517_v4, %v3516_v13  ;;  %v4124_v13 = vld [vmem:[%s8005_s11 + $0x1] ss:$0 sm:$0xff]  ;;  %s5873_s11 = smov [#allocation11]  }
 0xae6   :  { %v4926_v46 = vpop.f32.mrb[32].mxu1 }
 0xae7   :  { %v3162_v16 = vpop.f32.mrb[33].mxu1 }
 0xae8   :  { %4962 = vmatprep.mubr.f32.mxu1 %v3162_v16  ;;  %v3707_v16 = vld [vmem:[#allocation10 + $0x80] sm:$0xff] }
 0xae9   :  { %4963 = vmatmul.mubr.f32.vlgmr.msra.gmra.mrb[36].mxu1 %v4926_v46  ;;  %v5550_v46 = vpack.c.bf16 %v3488_v12, %v3487_v0  ;;  %v4126_v12 = vld [vmem:[%s8007_s13 + $0x1] ss:$0 sm:$0xff]  ;;  %s3862_s13 = sshll.u32 %s5873_s11, 4  ;;  %s3863_s13 = int_to_ptr.vmem [resolvable:$true] %s3862_s13 }
 0xaea   :  { %5481 = vmatpush3.bf16.msra.mxu1 %v5478_v60  ;;  %v4929_v3 = vpop.f32.mrb[34].mxu1  ;;  %s5833_s28 = scalar_lea.vmem %s3863_s13, 1024  ;;  %p5838_p13 = scmp.lt.s32.totalorder %s3863_s13, %s3863_s13 }
 0xaeb   :  { %v3172_v54 = vpop.f32.mrb[35].mxu1  ;;  %5483 = vmatprep.subr.bf16.mxu1 %v5482_v24  ;;  %p5834_p12 = scmp.ne.s32.totalorder %s3863_s13, %s5833_s28  ;;  %p5839_p0 = scmp.lt.s32.totalorder %s5833_s28, %s5833_s28 }
 0xaec   :  { %4965 = vmatprep.mubr.f32.mxu1 %v3172_v54 }
 0xaed   :  { %4966 = vmatmul.mubr.f32.gmra.mrb[38].mxu1 %v4929_v3  ;;  %v3710_v3 = vld [vmem:[#allocation10 + $0x98] sm:$0xff]  ;;  %p5840_p1 = por %p5839_p0, %p5838_p13 }
 0xaee   :  { %5485 = vmatpush3.bf16.msra.mxu1 %v5482_v24  ;;  %5000 = vmatprep.mubr.f32.mxu1 %v7803_v35  ;;  %v4096_v35 = vld [vmem:[%s8000_s6 + $0xd8] sm:$0xff]  ;;  %v3708_v24 = vld [vmem:[#allocation10 + $0x88] sm:$0xff]  ;;  %v5586_v54 = vpack.c.bf16 %v3710_v3, %v3709_v55 }
 0xaef   :  { %5487 = vmatprep.subr.bf16.mxu1 %v5486_v37  ;;  %v5498_v42 = vpack.c.bf16 %v4096_v35, %v4095_v14  ;;  %v5582_v28 = vpack.c.bf16 %v3708_v24, %v3707_v16  ;;  %v3716_v14 = vld [vmem:[#allocation10 + $0xc8] sm:$0xff]  ;;  %p5841_p2 = pnand %p5840_p1, %p5834_p12 }
 0xaf2   :  { %5489 = vmatpush3.bf16.msra.mxu1 %v5486_v37  ;;  %v3711_v37 = vld [vmem:[#allocation10 + $0xa0] sm:$0xff] }
 0xaf3   :  { %5491 = vmatprep.subr.bf16.mxu1 %v5490_v8  ;;  %v5590_v23 = vpack.c.bf16 %v3712_v52, %v3711_v37 }
 0xaf6   :  { %5493 = vmatpush3.bf16.msra.mxu1 %v5490_v8  ;;  %v3713_v8 = vld [vmem:[#allocation10 + $0xb0] sm:$0xff] }
 0xaf7   :  { %5495 = vmatprep.subr.bf16.mxu1 %v5494_v20  ;;  %v5594_v44 = vpack.c.bf16 %v3714_v11, %v3713_v8 }
 0xafa   :  { %5497 = vmatpush3.bf16.msra.mxu1 %v5494_v20  ;;  %v3715_v20 = vld [vmem:[#allocation10 + $0xc0] sm:$0xff] }
 0xafb   :  { %5499 = vmatprep.subr.bf16.mxu1 %v5498_v42  ;;  %v5598_v35 = vpack.c.bf16 %v3716_v14, %v3715_v20 }
 0xafe   :  { %5501 = vmatpush3.bf16.msra.mxu1 %v5498_v42  ;;  %v3717_v42 = vld [vmem:[#allocation10 + $0xd0] sm:$0xff] }
 0xaff   :  { %5503 = vmatprep.subr.bf16.mxu1 %v5502_v22  ;;  %v5602_v38 = vpack.c.bf16 %v3718_v47, %v3717_v42 }
 0xb02   :  { %5505 = vmatpush3.bf16.msra.mxu1 %v5502_v22  ;;  %v3719_v22 = vld [vmem:[#allocation10 + $0xe0] sm:$0xff] }
 0xb03   :  { %5507 = vmatprep.subr.bf16.mxu1 %v5506_v53  ;;  %v5606_v15 = vpack.c.bf16 %v3720_v41, %v3719_v22 }
 0xb06   :  { %5509 = vmatpush3.bf16.msra.mxu1 %v5506_v53  ;;  %v3489_v53 = vld [vmem:[#allocation7 + $0x90] sm:$0xff] }
 0xb07   :  { %5583 = vmatprep.subr.bf16.mxu1 %v5582_v28 }
 0xb09   :  { %5001 = vmatmul.mubr.f32.vlgmr.msra.gmra.mrb[36].mxu1 %v7805_v31 }
 0xb0a   :  { %5003 = vmatprep.mubr.f32.mxu1 %v7809_v49  ;;  %5585 = vmatpush3.bf16.msra.mxu1 %v5582_v28 }
 0xb0b   :  { %5587 = vmatprep.subr.bf16.mxu1 %v5586_v54 }
 0xb0d   :  { %5004 = vmatmul.mubr.f32.gmra.mrb[38].mxu1 %v7817_v36 }
 0xb0e   :  { %5589 = vmatpush3.bf16.msra.mxu1 %v5586_v54 }
 0xb0f   :  { %5591 = vmatprep.subr.bf16.mxu1 %v5590_v23 }
 0xb12   :  { %5593 = vmatpush3.bf16.msra.mxu1 %v5590_v23 }
 0xb13   :  { %5595 = vmatprep.subr.bf16.mxu1 %v5594_v44 }
 0xb16   :  { %5597 = vmatpush3.bf16.msra.mxu1 %v5594_v44 }
 0xb17   :  { %5599 = vmatprep.subr.bf16.mxu1 %v5598_v35 }
 0xb1a   :  { %5601 = vmatpush3.bf16.msra.mxu1 %v5598_v35 }
 0xb1b   :  { %5603 = vmatprep.subr.bf16.mxu1 %v5602_v38 }
 0xb1e   :  { %5605 = vmatpush3.bf16.msra.mxu1 %v5602_v38 }
 0xb1f   :  { %5607 = vmatprep.subr.bf16.mxu1 %v5606_v15 }
 0xb22   :  { %5609 = vmatpush3.bf16.msra.mxu1 %v5606_v15 }
 0xbdc   :  { %v5002_v40 = vpop.f32.mrb[36].mxu1 }
 0xbdd   :  { %v7939_v62 = vadd.f32 %v5002_v40, %v4118_v10  ;;  %v3366_v63 = vpop.f32.mrb[37].mxu1 }
 0xbde   :  { %v7941_v30 = vadd.f32 %v4118_v10, %v3366_v63 }
 0xbdf   :  { %v3398_v19 = vmax.f32 %v7939_v62, 0.0 }
 0xbe0   :  { %v3397_v39 = vmax.f32 %v7941_v30, 0.0  ;;  %v5005_v18 = vpop.f32.mrb[38].mxu1  ;;  %v3502_v30 = vld [vmem:[#allocation7 + $0xf8] sm:$0xff] }
 0xbe1   :  { %v7945_v31 = vadd.f32 %v5005_v18, %v4118_v10  ;;  %v3376_v49 = vpop.f32.mrb[39].mxu1 }
 0xbe2   :  { %v5510_v36 = vpack.c.bf16 %v3398_v19, %v3397_v39  ;;  %v7951_v26 = vadd.f32 %v4118_v10, %v3376_v49  ;;  %v3490_v10 = vld [vmem:[#allocation7 + $0x98] sm:$0xff]  ;;  %v3491_v49 = vld [vmem:[#allocation7 + $0xa0] sm:$0xff] }
 0xbe3   :  { %v3400_v33 = vmax.f32 %v7945_v31, 0.0  ;;  %v5554_v18 = vpack.c.bf16 %v3490_v10, %v3489_v53 }
 0xbe4   :  { %v3399_v17 = vmax.f32 %v7951_v26, 0.0  ;;  %5511 = vmatprep.subr.bf16.mxu0 %v5510_v36 }
 0xbe5   :  { %5513 = vmatpush3.bf16.msra.mxu0 %v5510_v36  ;;  %v3492_v36 = vld [vmem:[#allocation7 + $0xa8] sm:$0xff] }
 0xbe6   :  { %v5514_v2 = vpack.c.bf16 %v3400_v33, %v3399_v17 }
 0xbe8   :  { %5515 = vmatprep.subr.bf16.mxu0 %v5514_v2 }
 0xbe9   :  { %5517 = vmatpush3.bf16.msra.mxu0 %v5514_v2  ;;  %v5558_v2 = vpack.c.bf16 %v3492_v36, %v3491_v49 }
 0xbea   :  { %5519 = vmatprep.subr.bf16.mxu0 %v5518_v9 }
 0xbec   :  { %5015 = vmatmul.mubr.msk.f32.vlgmr.msra.gmra.mrb[84].mxu0 %vm1589_vm2, %v7836_v61  ;;  %v3514_v61 = vld [vmem:[#allocation8 + $0xd0] sm:$0xff] }
 0xbed   :  { %5017 = vmatprep.mubr.msk.f32.mxu0 %vm1589_vm2, %v7843_v48  ;;  %5521 = vmatpush3.bf16.msra.mxu0 %v5518_v9  ;;  %v5538_v48 = vpack.c.bf16 %v3515_v43, %v3514_v61  ;;  %v3493_v9 = vld [vmem:[#allocation7 + $0xb0] sm:$0xff]  ;;  %v3722_v43 = vld [vmem:[#allocation10 + $0xf8] sm:$0xff] }
 0xbee   :  { %5523 = vmatprep.subr.bf16.mxu0 %v5522_v45  ;;  %v5562_v29 = vpack.c.bf16 %v3494_v58, %v3493_v9  ;;  %v3721_v61 = vld [vmem:[#allocation10 + $0xf0] sm:$0xff] }
 0xbf0   :  { %5018 = vmatmul.mubr.msk.f32.gmra.mrb[86].mxu0 %vm1589_vm2, %v7856_v50  ;;  %v3519_v50 = vld [vmem:[#allocation8 + $0xf8] sm:$0xff] }
 0xbf1   :  { %5525 = vmatpush3.bf16.msra.mxu0 %v5522_v45  ;;  %v5546_v60 = vpack.c.bf16 %v3519_v50, %v3518_v7  ;;  %v3495_v45 = vld [vmem:[#allocation7 + $0xc0] sm:$0xff] }
 0xbf2   :  { %5527 = vmatprep.subr.bf16.mxu0 %v5526_v27  ;;  %v5566_v1 = vpack.c.bf16 %v3496_v59, %v3495_v45  ;;  %v5721_v59 = vld [vmem:[#allocation11 + $0x18] sm:$0xff] }
 0xbf5   :  { %5529 = vmatpush3.bf16.msra.mxu0 %v5526_v27  ;;  %v3497_v27 = vld [vmem:[#allocation7 + $0xd0] sm:$0xff] }
 0xbf6   :  { %5531 = vmatprep.subr.bf16.mxu0 %v5530_v32  ;;  %v5570_v34 = vpack.c.bf16 %v3498_v56, %v3497_v27  ;;  %v5722_v27 = vld [vmem:[#allocation11 + $0x10] sm:$0xff] }
 0xbf9   :  { %5533 = vmatpush3.bf16.msra.mxu0 %v5530_v32  ;;  %v3499_v32 = vld [vmem:[#allocation7 + $0xe0] sm:$0xff] }
 0xbfa   :  { %5535 = vmatprep.subr.bf16.mxu0 %v5534_v51  ;;  %v5574_v6 = vpack.c.bf16 %v3500_v21, %v3499_v32 }
 0xbfd   :  { %5537 = vmatpush3.bf16.msra.mxu0 %v5534_v51  ;;  %v3501_v51 = vld [vmem:[#allocation7 + $0xf0] sm:$0xff] }
 0xbfe   :  { %5539 = vmatprep.subr.bf16.mxu0 %v5538_v48 }
 0xc01   :  { %5541 = vmatpush3.bf16.msra.mxu0 %v5538_v48  ;;  %v5610_v48 = vpack.c.bf16 %v3722_v43, %v3721_v61 }
 0xc02   :  { %5543 = vmatprep.subr.bf16.mxu0 %v5542_v25 }
 0xc03   :  { %5611 = vmatprep.subr.bf16.mxu1 %v5610_v48 }
 0xc04   :  { %5613 = vmatpush3.bf16.msra.mxu1 %v5610_v48 }
 0xc05   :  { %5545 = vmatpush3.bf16.msra.mxu0 %v5542_v25 }
 0xc06   :  { %5547 = vmatprep.subr.bf16.mxu0 %v5546_v60 }
 0xc09   :  { %5549 = vmatpush3.bf16.msra.mxu0 %v5546_v60 }
 0xc0a   :  { %5551 = vmatprep.subr.bf16.mxu0 %v5550_v46 }
 0xcbf   :  { %v5016_v40 = vpop.f32.mrb[84].mxu0 }
 0xcc0   :  { %v3467_v63 = vpop.f32.mrb[85].mxu0 }
 0xcc1   :  { %5052 = vmatprep.mubr.f32.mxu0 %v3467_v63 }
 0xcc2   :  { %5053 = vmatmul.mubr.f32.vlgmr.msra.gmra.mrb[88].mxu0 %v5016_v40  ;;  %v5719_v40 = vld [vmem:[#allocation11 + $0x8] sm:$0xff] }
 0xcc3   :  { %5553 = vmatpush3.bf16.msra.mxu0 %v5550_v46  ;;  %v5019_v5 = vpop.f32.mrb[86].mxu0 }
 0xcc4   :  { %v3477_v57 = vpop.f32.mrb[87].mxu0  ;;  %5555 = vmatprep.subr.bf16.mxu0 %v5554_v18 }
 0xcc5   :  { %5055 = vmatprep.mubr.f32.mxu0 %v3477_v57 }
 0xcc6   :  { %5056 = vmatmul.mubr.f32.gmra.mrb[90].mxu0 %v5019_v5 }
 0xcc7   :  { %5557 = vmatpush3.bf16.msra.mxu0 %v5554_v18  ;;  %5090 = vmatprep.mubr.f32.mxu0 %v3397_v39  ;;  %v5578_v39 = vpack.c.bf16 %v3502_v30, %v3501_v51  ;;  %v5720_v18 = vld [vmem:[#allocation11] sm:$0xff] }
 0xcc8   :  { %5559 = vmatprep.subr.bf16.mxu0 %v5558_v2 }
 0xccb   :  { %5561 = vmatpush3.bf16.msra.mxu0 %v5558_v2 }
 0xccc   :  { %5563 = vmatprep.subr.bf16.mxu0 %v5562_v29 }
 0xccf   :  { %5565 = vmatpush3.bf16.msra.mxu0 %v5562_v29 }
 0xcd0   :  { %5567 = vmatprep.subr.bf16.mxu0 %v5566_v1 }
 0xcd3   :  { %5569 = vmatpush3.bf16.msra.mxu0 %v5566_v1 }
 0xcd4   :  { %5571 = vmatprep.subr.bf16.mxu0 %v5570_v34 }
 0xcd7   :  { %5573 = vmatpush3.bf16.msra.mxu0 %v5570_v34 }
 0xcd8   :  { %5575 = vmatprep.subr.bf16.mxu0 %v5574_v6 }
 0xcdb   :  { %5577 = vmatpush3.bf16.msra.mxu0 %v5574_v6 }
 0xcdc   :  { %5579 = vmatprep.subr.bf16.mxu0 %v5578_v39 }
 0xcdf   :  { %5581 = vmatpush3.bf16.msra.mxu0 %v5578_v39 }
 0xce2   :  { %5091 = vmatmul.mubr.f32.vlgmr.msra.gmra.mrb[88].mxu0 %v3398_v19 }
 0xce3   :  { %5093 = vmatprep.mubr.f32.mxu0 %v3399_v17 }
 0xce6   :  { %5094 = vmatmul.mubr.f32.gmra.mrb[90].mxu0 %v3400_v33 }
 0xdb5   :  { %v5092_v4 = vpop.f32.mrb[88].mxu0 }
 0xdb6   :  { %v3699_v25 = vadd.f32 %v5092_v4, %v4124_v13  ;;  %v3671_v7 = vpop.f32.mrb[89].mxu0 }
 0xdb7   :  { %v3698_v62 = vadd.f32 %v4124_v13, %v3671_v7 }
 0xdb8   :  { %v3703_v26 = vmax.f32 %v3699_v25, 0.0 }
 0xdb9   :  { %v3702_v19 = vmax.f32 %v3698_v62, 0.0  ;;  %v5095_v50 = vpop.f32.mrb[90].mxu0 }
 0xdba   :  { %v3701_v17 = vadd.f32 %v5095_v50, %v4124_v13  ;;  %v3681_v60 = vpop.f32.mrb[91].mxu0 }
 0xdbb   :  { %v3700_v31 = vadd.f32 %v4124_v13, %v3681_v60  ;;  %5128 = vmatprep.mubr.f32.mxu1 %v3702_v19 }
 0xdbc   :  { %5129 = vmatmul.mubr.f32.vlgmr.msra.gmra.mrb[40].mxu1 %v3703_v26  ;;  %v3705_v0 = vmax.f32 %v3701_v17, 0.0 }
 0xdbd   :  { %v3704_v33 = vmax.f32 %v3700_v31, 0.0 }
 0xdbf   :  { %5131 = vmatprep.mubr.f32.mxu1 %v3704_v33 }
 0xdc0   :  { %5132 = vmatmul.mubr.f32.gmra.mrb[42].mxu1 %v3705_v0 }
 0xe8f   :  { %v5130_v46 = vpop.f32.mrb[40].mxu1 }
 0xe90   :  { %v3803_v16 = vadd.f32 %v5130_v46, %v4126_v12  ;;  %v3797_v24 = vpop.f32.mrb[41].mxu1 }
 0xe91   :  { %v3798_v55 = vadd.f32 %v4126_v12, %v3797_v24 }
 0xe92   :  { %v3817_v28 = vmul.f32 %v3803_v16, %v3803_v16 }
 0xe93   :  { %v3816_v3 = vmul.f32 %v3798_v55, %v3798_v55  ;;  %v5133_v54 = vpop.f32.mrb[42].mxu1 }
 0xe94   :  { %v3813_v37 = vadd.f32 %v5133_v54, %v4126_v12  ;;  %3822 = vadd.xlane.f32.xlu0 %v3817_v28  ;;  %v3807_v52 = vpop.f32.mrb[43].mxu1 }
 0xe95   :  { %v3808_v23 = vadd.f32 %v4126_v12, %v3807_v52  ;;  %3820 = vadd.xlane.f32.xlu1 %v3816_v3 }
 0xe96   :  { %v3819_v8 = vmul.f32 %v3813_v37, %v3813_v37 }
 0xe97   :  { %v3818_v11 = vmul.f32 %v3808_v23, %v3808_v23 }
 0xe99   :  { %3826 = vadd.xlane.f32.xlu1 %v3819_v8  ;;  %3824 = vadd.xlane.f32.xlu0 %v3818_v11 }
 0xf21   :  { %v3823_v44 = vpop.xlane.xlu0 %3822 }
 0xf22   :  { %v3829_v20 = vadd.f32 1e-12, %v3823_v44  ;;  %v3821_v14 = vpop.xlane.xlu1 %3820 }
 0xf23   :  { %v3828_v35 = vadd.f32 1e-12, %v3821_v14 }
 0xf24   :  { %5699 = vrsqrt.f32 %v3829_v20 }
 0xf25   :  { %5701 = vrsqrt.f32 %v3828_v35 }
 0xf26   :  { %v3827_v42 = vpop.xlane.xlu1 %3826  ;;  %v3825_v47 = vpop.xlane.xlu0 %3824 }
 0xf27   :  { %v3831_v38 = vadd.f32 1e-12, %v3827_v42  ;;  %v3830_v22 = vadd.f32 1e-12, %v3825_v47 }
 0xf29   :  { %5703 = vrsqrt.f32 %v3831_v38 }
 0xf2a   :  { %5705 = vrsqrt.f32 %v3830_v22 }
 0xf2e   :  { %v5700_v41 = vpop.eup %5699 }
 0xf2f   :  { %v5702_v15 = vpop.eup %5701  ;;  %v3837_v53 = vmul.f32 %v5700_v41, %v3803_v16 }
 0xf30   :  { %v3836_v10 = vmul.f32 %v5702_v15, %v3798_v55 }
 0xf31   :  { %v3841_v63 = vadd.f32 %v5719_v40, %v3837_v53 }
 0xf32   :  { %v3840_v49 = vadd.f32 %v5720_v18, %v3836_v10 }
 0xf33   :  { %v5704_v36 = vpop.eup %5703  ;;  %v3845_v5 = vmax.f32 %v3841_v63, 0.0 }
 0xf34   :  { %v5706_v57 = vpop.eup %5705  ;;  %v3844_v2 = vmax.f32 %v3840_v49, 0.0  ;;  %v3839_v9 = vmul.f32 %v5704_v36, %v3813_v37 }
 0xf35   :  { %v3849_v58 = vmin.f32 %v3845_v5, 1.0  ;;  %v3838_v29 = vmul.f32 %v5706_v57, %v3808_v23 }
 0xf36   :  { %v3848_v45 = vmin.f32 %v3844_v2, 1.0  ;;  %v3843_v1 = vadd.f32 %v5721_v59, %v3839_v9 }
 0xf37   :  { %3854 = vst [vmem:[#allocation11 + $0x28] sm:$0xff] %v3849_v58  ;;  %v3842_v56 = vadd.f32 %v5722_v27, %v3838_v29 }
 0xf38   :  { %3853 = vst [vmem:[#allocation11 + $0x20] sm:$0xff] %v3848_v45  ;;  %v3847_v34 = vmax.f32 %v3843_v1, 0.0 }
 0xf39   :  { %v3846_v32 = vmax.f32 %v3842_v56, 0.0 }
 0xf3a   :  { %v3851_v21 = vmin.f32 %v3847_v34, 1.0 }
 0xf3b   :  { %v3850_v6 = vmin.f32 %v3846_v32, 1.0 }
 0xf3c   :  { %3856 = vst [vmem:[#allocation11 + $0x38] sm:$0xff] %v3851_v21 }
 0xf3d   :  { %3855 = vst [vmem:[#allocation11 + $0x30] sm:$0xff] %v3850_v6 }
 0xf3e   :  { %5844 = shalt.err (!%p5841_p2)
}
 0xf3f   :  { %s5845_s16 = scalar_lea.hbm %s8008_s14, 1024 }
 0xf40   :  { %p5846_p3 = scmp.ne.s32.totalorder %s8008_s14, %s5845_s16  ;;  %p5849_p4 = scmp.lt.u32.totalorder %s5845_s16, %s8008_s14 }
 0xf42   :  { %p5851_p5 = pnand %p5849_p4, %p5846_p3 }
 0xf44   :  { %5854 = shalt.err (!%p5851_p5)
}
 0xf45   :  { %3868 = dma.vmem_to_hbm [thread:$0]  %s3863_s13, 1024, %s8008_s14, [#allocation4], %s5866_s30, %s5866_s30, %s5867_s22  }
 0xf46   :  { %5861 = dma.done.wait [#allocation4], 1024  }
 0xf47   :  { %5862 = vsyncadd [#allocation4], 4294966272 }
 0xf48   :  { %3872 = vsyncpa [#allocation3], 1 }
 0xf49   :  { %3873 = vsyncpa [#allocation6], 1 }
 0xf4a   :  { %3874 = vsyncpa [#allocation9], 1 }
 0xf4b   :  { %3875 = vsyncpa [#allocation4], 1 }

</bundles_post_ra>
